<compile_context>
chip_gen: v6e
topology: v6e:2x2x1
jax: 0.10.0
libtpu: 0.0.40
codegen_flags: <defaults>
</compile_context>

<pallas_src>
import functools
import math

import jax
import jax.numpy as jnp
from jax.experimental import pallas as pl
from jax.experimental.pallas import tpu as pltpu


FUSED_ORDER = [
    "wx", "wh", "bx", "bhn",
    "encw", "encb",
    "qwm", "qws", "qbm", "qbs",
    "fw1y", "fw1c", "fb1", "fw2", "fb2", "fw3", "fb3",
    "hw", "hb",
    "g1w", "g1b", "g2w", "g2b",
    "pw", "pb", "pz0m", "pz0ls",
]


def _latent_sde_kernel(xs_ref, z0n_ref, bmn_ref,
                       wx_ref, wh_ref, bx_ref, bhn_ref,
                       encw_ref, encb_ref,
                       qwm_ref, qws_ref, qbm_ref, qbs_ref,
                       fw1y_ref, fw1c_ref, fb1_ref, fw2_ref, fb2_ref,
                       fw3_ref, fb3_ref,
                       hw_ref, hb_ref,
                       g1w_ref, g1b_ref, g2w_ref, g2b_ref,
                       pw_ref, pb_ref, pz0m_ref, pz0ls_ref,
                       log_pxs_ref, logqp_ref, r_ref,
                       *, noise_std, dt, kl_path_weight, inv_batch):
    T, B, D = xs_ref.shape
    f32 = jnp.float32
    Hg = wh_ref.shape[0]          # GRU hidden size
    C = encw_ref.shape[1]         # context size
    Hf = fw2_ref.shape[0]         # f_net hidden size
    L = fw3_ref.shape[1]          # latent size
    LH = g1w_ref.shape[1]         # L * diffusion hidden (= 128 here)

    def dot(a, b):
        return jnp.dot(a, b, preferred_element_type=f32)

    # ---------------- hoisted parameter reads & bias broadcasts --------------
    WX = wx_ref[...]                                   # (D, 3H) controller-fused
    WH = wh_ref[...]                                   # (H, 3H)
    BX = jnp.broadcast_to(bx_ref[...], (B, 3 * Hg))    # controller-fused gate bias
    BHN = jnp.broadcast_to(bhn_ref[...], (B, Hg))
    ENCW = encw_ref[...]
    ENCB = jnp.broadcast_to(encb_ref[...], (B, C))
    QWM, QWS = qwm_ref[...], qws_ref[...]
    QBM, QBS = qbm_ref[...], qbs_ref[...]
    FW1Y, FW1C = fw1y_ref[...], fw1c_ref[...]
    FB1 = jnp.broadcast_to(fb1_ref[...], (B, Hf))
    FW2 = fw2_ref[...]
    FB2 = jnp.broadcast_to(fb2_ref[...], (B, Hf))
    FW3 = fw3_ref[...]
    FB3 = jnp.broadcast_to(fb3_ref[...], (B, L))
    HW = hw_ref[...]                                   # (L, L) projector+controller fused
    HB = jnp.broadcast_to(hb_ref[...], (B, L))
    G1W = g1w_ref[...]                                 # (L, L*Hd) block-structured
    G1B = jnp.broadcast_to(g1b_ref[...], (B, LH))
    G2W = g2w_ref[...]                                 # (L*Hd, L) block-diagonal
    G2B = jnp.broadcast_to(g2b_ref[...], (B, L))
    PW = pw_ref[...]
    PB = jnp.broadcast_to(pb_ref[...], (B, D))
    PZ0M, PZ0LS = pz0m_ref[...], pz0ls_ref[...]

    # ---------------- Encoder: (controller-fused) reversed GRU ---------------
    # ctx[t] = Linear(GRU hidden after consuming xus[T-1], ..., xus[t]),
    # equivalent to flip -> GRU -> Linear -> flip in the reference.
    ctx = [None] * T
    h = jnp.zeros((B, Hg), f32)
    for t in range(T - 1, -1, -1):                     # fully unrolled (T static)
        x_t = xs_ref[t]                                # (B, D)
        gx = dot(x_t, WX) + BX                         # (B, 3H), gates r|z|n
        gh = dot(h, WH)                                # (B, 3H)
        rg = jax.nn.sigmoid(gx[:, :Hg] + gh[:, :Hg])
        zg = jax.nn.sigmoid(gx[:, Hg:2 * Hg] + gh[:, Hg:2 * Hg])
        ng = jnp.tanh(gx[:, 2 * Hg:] + rg * (gh[:, 2 * Hg:] + BHN))
        h = (1.0 - zg) * ng + zg * h
        ctx[t] = dot(h, ENCW) + ENCB                   # (B, C)

    # ---------------- q(z0) and initial latent --------------------------------
    ctx0 = ctx[0]
    qz0_mean = dot(ctx0, QWM) + QBM                    # (B, L)
    qz0_logstd = dot(ctx0, QWS) + QBS                  # (B, L)
    z = qz0_mean + 0.2 * jnp.exp(qz0_logstd) * z0n_ref[...]

    # ---------------- fused projector / likelihood / norm scoring ------------
    log_c = 0.5 * math.log(2.0 * math.pi) + math.log(noise_std)

    def score(z_t, t):
        x_hat = dot(z_t, PW) + PB                      # (B, D)
        diff = (xs_ref[t] - x_hat) / noise_std
        lp_t = -0.5 * jnp.sum(diff * diff) - (B * D) * log_c
        r_t = jnp.sum(jnp.sqrt(jnp.sum(x_hat * x_hat, axis=1, keepdims=True)))
        return lp_t, r_t

    lp_acc, r_acc = score(z, 0)
    lq_acc = jnp.zeros((), f32)

    # ---------------- Euler-Maruyama SDE integration with logqp --------------
    # bmn_ref is already scaled by sqrt(dt) in the wrapper.
    for i in range(T - 1):                             # fully unrolled
        ctx_i = ctx[min(i + 1, T - 1)]                 # searchsorted(ts, ts[i], right=True)

        # posterior drift: f_net(cat(z, ctx_i))
        f1 = jax.nn.softplus(dot(z, FW1Y) + dot(ctx_i, FW1C) + FB1)
        f2 = jax.nn.softplus(dot(f1, FW2) + FB2)
        f_val = dot(f2, FW3) + FB3                     # (B, L)

        # prior drift h_net(cat(z, controller(projector(z)))) collapsed to z@HW+HB
        h_val = dot(z, HW) + HB                        # (B, L)

        # diagonal diffusion, lane-dense: (B, L*Hd) softplus tile + block-diag matmul
        g1 = jax.nn.softplus(dot(z, G1W) + G1B)        # (B, 128)
        g_val = jax.nn.sigmoid(dot(g1, G2W) + G2B)     # (B, L)

        # torchsde-style stable division for the logqp term
        g_safe = jnp.where(jnp.abs(g_val) > 1e-7, g_val, 1e-7)
        uq = (f_val - h_val) / g_safe
        lq_acc = lq_acc + (0.5 * dt) * jnp.sum(uq * uq)

        z = z + f_val * dt + g_val * bmn_ref[i]        # Euler-Maruyama step

        lp_t, r_t = score(z, i + 1)
        lp_acc = lp_acc + lp_t
        r_acc = r_acc + r_t

    # ---------------- KL(q(z0) || p(z0)) for diagonal Normals ----------------
    p_std = jnp.exp(PZ0LS)
    q_std = jnp.exp(qz0_logstd)
    var_ratio = (q_std / p_std) ** 2
    t1 = ((qz0_mean - PZ0M) / p_std) ** 2
    kl = 0.5 * (var_ratio + t1 - 1.0 - jnp.log(var_ratio))     # (B, L)
    lq0 = jnp.sum(kl)

    # sums over time/latent, mean over batch
    log_pxs_ref[0, 0] = lp_acc * inv_batch
    logqp_ref[0, 0] = (lq0 + kl_path_weight * lq_acc) * inv_batch
    r_ref[0, 0] = r_acc * inv_batch


def _fuse_params(p):
    """Algebraic weight fusion done once in the wrapper (outside the kernel)."""
    cw, cb = p["cw"], p["cb"]                          # controller (D,1), (1,1)

    fused = {}
    # Controller folded into GRU gates: u*W_u == x@(cw@W_u) + cb*W_u
    fused["wx"] = jnp.concatenate([p["wxr"] + cw @ p["wur"],
                                   p["wxz"] + cw @ p["wuz"],
                                   p["wxn"] + cw @ p["wun"]], axis=1)   # (D, 3H)
    fused["wh"] = jnp.concatenate([p["whr"], p["whz"], p["whn"]], axis=1)  # (H, 3H)
    fused["bx"] = jnp.concatenate([p["br"] + cb * p["wur"],
                                   p["bz"] + cb * p["wuz"],
                                   p["bin"] + cb * p["wun"]], axis=1)   # (1, 3H)
    fused["bhn"] = p["bhn"]

    fused["encw"], fused["encb"] = p["encw"], p["encb"]
    fused["qwm"], fused["qws"] = p["qwm"], p["qws"]
    fused["qbm"], fused["qbs"] = p["qbm"], p["qbs"]
    fused["fw1y"], fused["fw1c"], fused["fb1"] = p["fw1y"], p["fw1c"], p["fb1"]
    fused["fw2"], fused["fb2"] = p["fw2"], p["fb2"]
    fused["fw3"], fused["fb3"] = p["fw3"], p["fb3"]

    # Prior drift collapsed: h(z) = z@hwy + controller(projector(z))*hwu + hb
    #                             = z@(hwy + (pw@cw)@hwu) + (hb + (pb@cw + cb)*hwu)
    fused["hw"] = p["hwy"] + (p["pw"] @ cw) @ p["hwu"]          # (L, L)
    fused["hb"] = p["hb"] + (p["pb"] @ cw + cb) * p["hwu"]      # (1, L)

    # Diffusion: per-latent Linear(1,Hd)->softplus->Linear(Hd,1)->sigmoid
    # reformulated as (B,L)@(L,L*Hd) -> softplus -> (B,L*Hd)@(L*Hd,L) block-diag.
    L, Hd = p["gw1"].shape
    eyeL = jnp.eye(L, dtype=jnp.float32)
    fused["g1w"] = (eyeL[:, :, None] * p["gw1"][None, :, :]).reshape(L, L * Hd)
    fused["g1b"] = p["gb1"].reshape(1, L * Hd)
    fused["g2w"] = (p["gw2"][:, :, None] * eyeL[:, None, :]).reshape(L * Hd, L)
    fused["g2b"] = p["gb2"]

    fused["pw"], fused["pb"] = p["pw"], p["pb"]
    fused["pz0m"], fused["pz0ls"] = p["pz0m"], p["pz0ls"]
    return fused


def latent_sde_forward(xs, ts, noise_std, params, z0_noise, bm_noise,
                       kl_path_weight=35.0):
    T, B, D = xs.shape

    # constant spacing == sde dt (documented assumption); pre-scale the noise
    dt = float(ts[1]) - float(ts[0])
    bm_scaled = (math.sqrt(dt) * bm_noise).astype(jnp.float32)

    fused = _fuse_params(params)
    ordered = [fused[k] for k in FUSED_ORDER]

    vmem = pl.BlockSpec(memory_space=pltpu.MemorySpace.VMEM)
    smem = pl.BlockSpec(memory_space=pltpu.MemorySpace.SMEM)

    kernel = functools.partial(_latent_sde_kernel,
                               noise_std=float(noise_std),
                               dt=dt,
                               kl_path_weight=float(kl_path_weight),
                               inv_batch=1.0 / B)

    # Single program (no grid): the whole problem is a few KB and recurrent in
    # time.  For large batch on v7x, the scaling path is a leading "parallel"
    # grid axis over batch chunks (all recurrences are over T only).
    lp, lq, r = pl.pallas_call(
        kernel,
        out_shape=(jax.ShapeDtypeStruct((1, 1), jnp.float32),
                   jax.ShapeDtypeStruct((1, 1), jnp.float32),
                   jax.ShapeDtypeStruct((1, 1), jnp.float32)),
        in_specs=[vmem, vmem, vmem] + [vmem] * len(ordered),
        out_specs=(smem, smem, smem),
    )(xs, z0_noise, bm_scaled, *ordered)
    return lp[0, 0], lq[0, 0], r[0, 0]


def init_params(key, data_size=4, latent_size=4, context_size=16,
                hidden_size=32, u_size=1):
    """Reference-layout parameters (PyTorch init conventions), pre-transposed
    to (in, out).  Fusion for the kernel happens in _fuse_params."""
    D, L, C, H, U = data_size, latent_size, context_size, hidden_size, u_size
    keys = iter(jax.random.split(key, 64))

    def unif(shape, fan_in):
        bound = 1.0 / math.sqrt(fan_in)
        return jax.random.uniform(next(keys), shape, jnp.float32, -bound, bound)

    p = {}
    # Controller: weight fixed as in the reference, bias default-initialized.
    p["cw"] = jnp.array([[-0.0652], [-0.2577], [-1.308], [-0.6947]], jnp.float32)  # (D, U)
    p["cb"] = unif((1, U), D)

    # GRU (PyTorch gate order r, z, n), split per-gate and pre-transposed.
    wih = unif((3 * H, D + U), H)
    whh = unif((3 * H, H), H)
    bih = unif((1, 3 * H), H)
    bhh = unif((1, 3 * H), H)
    p["wxr"], p["wxz"], p["wxn"] = wih[0:H, :D].T, wih[H:2 * H, :D].T, wih[2 * H:, :D].T
    p["wur"], p["wuz"], p["wun"] = wih[0:H, D:].T, wih[H:2 * H, D:].T, wih[2 * H:, D:].T
    p["whr"], p["whz"], p["whn"] = whh[0:H].T, whh[H:2 * H].T, whh[2 * H:].T
    p["br"] = bih[:, 0:H] + bhh[:, 0:H]
    p["bz"] = bih[:, H:2 * H] + bhh[:, H:2 * H]
    p["bin"] = bih[:, 2 * H:]
    p["bhn"] = bhh[:, 2 * H:]

    # Encoder output linear (H -> C)
    p["encw"] = unif((C, H), H).T
    p["encb"] = unif((1, C), H)

    # qz0_net (C -> 2L), split into mean / logstd halves
    qw = unif((2 * L, C), C)
    qb = unif((1, 2 * L), C)
    p["qwm"], p["qws"] = qw[:L].T, qw[L:].T
    p["qbm"], p["qbs"] = qb[:, :L], qb[:, L:]

    # f_net (L + C -> H -> H -> L)
    fw1 = unif((H, L + C), L + C)
    p["fw1y"], p["fw1c"] = fw1[:, :L].T, fw1[:, L:].T
    p["fb1"] = unif((1, H), L + C)
    p["fw2"] = unif((H, H), H).T
    p["fb2"] = unif((1, H), H)
    p["fw3"] = unif((L, H), H).T
    p["fb3"] = unif((1, L), H)

    # h_net (L + U -> L)
    hw = unif((L, L + U), L + U)
    p["hwy"], p["hwu"] = hw[:, :L].T, hw[:, L:].T
    p["hb"] = unif((1, L), L + U)

    # g_nets: L copies of Linear(1,H) -> Softplus -> Linear(H,1) -> Sigmoid
    p["gw1"] = unif((L, H), 1)
    p["gb1"] = unif((L, H), 1)
    p["gw2"] = unif((L, H), H)
    p["gb2"] = unif((1, L), H)

    # projector (L -> D)
    p["pw"] = unif((D, L), L).T
    p["pb"] = unif((1, D), L)

    # pz0
    p["pz0m"] = jnp.zeros((1, L), jnp.float32)
    p["pz0ls"] = jnp.zeros((1, L), jnp.float32)
    return p


if __name__ == "__main__":
    key = jax.random.PRNGKey(0)
    D, L, C, H, U = 4, 4, 16, 32, 1
    T, B = 8, 8

    k_par, k_xs, k_z0, k_bm = jax.random.split(key, 4)
    params = init_params(k_par, D, L, C, H, U)

    xs = 0.5 * jax.random.normal(k_xs, (T, B, D), jnp.float32)
    ts = jnp.arange(T, dtype=jnp.float32) * 0.01   # spacing == sde dt -> 1 Euler step / interval
    noise_std = 0.01

    # TODO(synk): torch.randn_like / torchsde Brownian motion RNG cannot be
    # reproduced bit-for-bit; the same role is played by these precomputed
    # standard-normal draws passed into the kernel.
    z0_noise = jax.random.normal(k_z0, (B, L), jnp.float32)
    bm_noise = jax.random.normal(k_bm, (T - 1, B, L), jnp.float32)

    log_pxs, logqp, r = latent_sde_forward(xs, ts, noise_std, params,
                                           z0_noise, bm_noise)
    jax.block_until_ready((log_pxs, logqp, r))
    print("KERNEL_OK")
</pallas_src>

<mosaic_0001>
module attributes {stable_mosaic.version = 11 : i64} {
  func.func @_latent_sde_kernel(%arg0: memref<8x8x4xf32, #tpu.memory_space<vmem>>, %arg1: memref<8x4xf32, #tpu.memory_space<vmem>>, %arg2: memref<7x8x4xf32, #tpu.memory_space<vmem>>, %arg3: memref<4x96xf32, #tpu.memory_space<vmem>>, %arg4: memref<32x96xf32, #tpu.memory_space<vmem>>, %arg5: memref<1x96xf32, #tpu.memory_space<vmem>>, %arg6: memref<1x32xf32, #tpu.memory_space<vmem>>, %arg7: memref<32x16xf32, #tpu.memory_space<vmem>>, %arg8: memref<1x16xf32, #tpu.memory_space<vmem>>, %arg9: memref<16x4xf32, #tpu.memory_space<vmem>>, %arg10: memref<16x4xf32, #tpu.memory_space<vmem>>, %arg11: memref<1x4xf32, #tpu.memory_space<vmem>>, %arg12: memref<1x4xf32, #tpu.memory_space<vmem>>, %arg13: memref<4x32xf32, #tpu.memory_space<vmem>>, %arg14: memref<16x32xf32, #tpu.memory_space<vmem>>, %arg15: memref<1x32xf32, #tpu.memory_space<vmem>>, %arg16: memref<32x32xf32, #tpu.memory_space<vmem>>, %arg17: memref<1x32xf32, #tpu.memory_space<vmem>>, %arg18: memref<32x4xf32, #tpu.memory_space<vmem>>, %arg19: memref<1x4xf32, #tpu.memory_space<vmem>>, %arg20: memref<4x4xf32, #tpu.memory_space<vmem>>, %arg21: memref<1x4xf32, #tpu.memory_space<vmem>>, %arg22: memref<4x128xf32, #tpu.memory_space<vmem>>, %arg23: memref<1x128xf32, #tpu.memory_space<vmem>>, %arg24: memref<128x4xf32, #tpu.memory_space<vmem>>, %arg25: memref<1x4xf32, #tpu.memory_space<vmem>>, %arg26: memref<4x4xf32, #tpu.memory_space<vmem>>, %arg27: memref<1x4xf32, #tpu.memory_space<vmem>>, %arg28: memref<1x4xf32, #tpu.memory_space<vmem>>, %arg29: memref<1x4xf32, #tpu.memory_space<vmem>>, %arg30: memref<1x1xf32, #tpu.memory_space<smem>>, %arg31: memref<1x1xf32, #tpu.memory_space<smem>>, %arg32: memref<1x1xf32, #tpu.memory_space<smem>>) attributes {dimension_semantics = [], scalar_prefetch = 0 : i64, scratch_operands = 0 : i64, tpu.core_type = #tpu.core_type<tc>} {
    %c0 = arith.constant 0 : index
    %c0_0 = arith.constant 0 : index
    %0 = vector.load %arg3[%c0, %c0_0] : memref<4x96xf32, #tpu.memory_space<vmem>>, vector<4x96xf32>
    %c0_1 = arith.constant 0 : index
    %c0_2 = arith.constant 0 : index
    %1 = vector.load %arg4[%c0_1, %c0_2] : memref<32x96xf32, #tpu.memory_space<vmem>>, vector<32x96xf32>
    %c0_3 = arith.constant 0 : index
    %c0_4 = arith.constant 0 : index
    %2 = vector.load %arg5[%c0_3, %c0_4] : memref<1x96xf32, #tpu.memory_space<vmem>>, vector<1x96xf32>
    %3 = vector.shape_cast %2 : vector<1x96xf32> to vector<1x96xf32>
    %4 = vector.broadcast %3 : vector<1x96xf32> to vector<8x96xf32>
    %c0_5 = arith.constant 0 : index
    %c0_6 = arith.constant 0 : index
    %5 = vector.load %arg6[%c0_5, %c0_6] : memref<1x32xf32, #tpu.memory_space<vmem>>, vector<1x32xf32>
    %6 = vector.shape_cast %5 : vector<1x32xf32> to vector<1x32xf32>
    %7 = vector.broadcast %6 : vector<1x32xf32> to vector<8x32xf32>
    %c0_7 = arith.constant 0 : index
    %c0_8 = arith.constant 0 : index
    %8 = vector.load %arg7[%c0_7, %c0_8] : memref<32x16xf32, #tpu.memory_space<vmem>>, vector<32x16xf32>
    %c0_9 = arith.constant 0 : index
    %c0_10 = arith.constant 0 : index
    %9 = vector.load %arg8[%c0_9, %c0_10] : memref<1x16xf32, #tpu.memory_space<vmem>>, vector<1x16xf32>
    %10 = vector.shape_cast %9 : vector<1x16xf32> to vector<1x16xf32>
    %11 = vector.broadcast %10 : vector<1x16xf32> to vector<8x16xf32>
    %c0_11 = arith.constant 0 : index
    %c0_12 = arith.constant 0 : index
    %12 = vector.load %arg9[%c0_11, %c0_12] : memref<16x4xf32, #tpu.memory_space<vmem>>, vector<16x4xf32>
    %c0_13 = arith.constant 0 : index
    %c0_14 = arith.constant 0 : index
    %13 = vector.load %arg10[%c0_13, %c0_14] : memref<16x4xf32, #tpu.memory_space<vmem>>, vector<16x4xf32>
    %c0_15 = arith.constant 0 : index
    %c0_16 = arith.constant 0 : index
    %14 = vector.load %arg11[%c0_15, %c0_16] : memref<1x4xf32, #tpu.memory_space<vmem>>, vector<1x4xf32>
    %c0_17 = arith.constant 0 : index
    %c0_18 = arith.constant 0 : index
    %15 = vector.load %arg12[%c0_17, %c0_18] : memref<1x4xf32, #tpu.memory_space<vmem>>, vector<1x4xf32>
    %c0_19 = arith.constant 0 : index
    %c0_20 = arith.constant 0 : index
    %16 = vector.load %arg13[%c0_19, %c0_20] : memref<4x32xf32, #tpu.memory_space<vmem>>, vector<4x32xf32>
    %c0_21 = arith.constant 0 : index
    %c0_22 = arith.constant 0 : index
    %17 = vector.load %arg14[%c0_21, %c0_22] : memref<16x32xf32, #tpu.memory_space<vmem>>, vector<16x32xf32>
    %c0_23 = arith.constant 0 : index
    %c0_24 = arith.constant 0 : index
    %18 = vector.load %arg15[%c0_23, %c0_24] : memref<1x32xf32, #tpu.memory_space<vmem>>, vector<1x32xf32>
    %19 = vector.shape_cast %18 : vector<1x32xf32> to vector<1x32xf32>
    %20 = vector.broadcast %19 : vector<1x32xf32> to vector<8x32xf32>
    %c0_25 = arith.constant 0 : index
    %c0_26 = arith.constant 0 : index
    %21 = vector.load %arg16[%c0_25, %c0_26] : memref<32x32xf32, #tpu.memory_space<vmem>>, vector<32x32xf32>
    %c0_27 = arith.constant 0 : index
    %c0_28 = arith.constant 0 : index
    %22 = vector.load %arg17[%c0_27, %c0_28] : memref<1x32xf32, #tpu.memory_space<vmem>>, vector<1x32xf32>
    %23 = vector.shape_cast %22 : vector<1x32xf32> to vector<1x32xf32>
    %24 = vector.broadcast %23 : vector<1x32xf32> to vector<8x32xf32>
    %c0_29 = arith.constant 0 : index
    %c0_30 = arith.constant 0 : index
    %25 = vector.load %arg18[%c0_29, %c0_30] : memref<32x4xf32, #tpu.memory_space<vmem>>, vector<32x4xf32>
    %c0_31 = arith.constant 0 : index
    %c0_32 = arith.constant 0 : index
    %26 = vector.load %arg19[%c0_31, %c0_32] : memref<1x4xf32, #tpu.memory_space<vmem>>, vector<1x4xf32>
    %27 = vector.shape_cast %26 : vector<1x4xf32> to vector<1x4xf32>
    %28 = vector.broadcast %27 : vector<1x4xf32> to vector<8x4xf32>
    %c0_33 = arith.constant 0 : index
    %c0_34 = arith.constant 0 : index
    %29 = vector.load %arg20[%c0_33, %c0_34] : memref<4x4xf32, #tpu.memory_space<vmem>>, vector<4x4xf32>
    %c0_35 = arith.constant 0 : index
    %c0_36 = arith.constant 0 : index
    %30 = vector.load %arg21[%c0_35, %c0_36] : memref<1x4xf32, #tpu.memory_space<vmem>>, vector<1x4xf32>
    %31 = vector.shape_cast %30 : vector<1x4xf32> to vector<1x4xf32>
    %32 = vector.broadcast %31 : vector<1x4xf32> to vector<8x4xf32>
    %c0_37 = arith.constant 0 : index
    %c0_38 = arith.constant 0 : index
    %33 = vector.load %arg22[%c0_37, %c0_38] : memref<4x128xf32, #tpu.memory_space<vmem>>, vector<4x128xf32>
    %c0_39 = arith.constant 0 : index
    %c0_40 = arith.constant 0 : index
    %34 = vector.load %arg23[%c0_39, %c0_40] : memref<1x128xf32, #tpu.memory_space<vmem>>, vector<1x128xf32>
    %35 = vector.shape_cast %34 : vector<1x128xf32> to vector<1x128xf32>
    %36 = vector.broadcast %35 : vector<1x128xf32> to vector<8x128xf32>
    %c0_41 = arith.constant 0 : index
    %c0_42 = arith.constant 0 : index
    %37 = vector.load %arg24[%c0_41, %c0_42] : memref<128x4xf32, #tpu.memory_space<vmem>>, vector<128x4xf32>
    %c0_43 = arith.constant 0 : index
    %c0_44 = arith.constant 0 : index
    %38 = vector.load %arg25[%c0_43, %c0_44] : memref<1x4xf32, #tpu.memory_space<vmem>>, vector<1x4xf32>
    %39 = vector.shape_cast %38 : vector<1x4xf32> to vector<1x4xf32>
    %40 = vector.broadcast %39 : vector<1x4xf32> to vector<8x4xf32>
    %c0_45 = arith.constant 0 : index
    %c0_46 = arith.constant 0 : index
    %41 = vector.load %arg26[%c0_45, %c0_46] : memref<4x4xf32, #tpu.memory_space<vmem>>, vector<4x4xf32>
    %c0_47 = arith.constant 0 : index
    %c0_48 = arith.constant 0 : index
    %42 = vector.load %arg27[%c0_47, %c0_48] : memref<1x4xf32, #tpu.memory_space<vmem>>, vector<1x4xf32>
    %43 = vector.shape_cast %42 : vector<1x4xf32> to vector<1x4xf32>
    %44 = vector.broadcast %43 : vector<1x4xf32> to vector<8x4xf32>
    %c0_49 = arith.constant 0 : index
    %c0_50 = arith.constant 0 : index
    %45 = vector.load %arg28[%c0_49, %c0_50] : memref<1x4xf32, #tpu.memory_space<vmem>>, vector<1x4xf32>
    %c0_51 = arith.constant 0 : index
    %c0_52 = arith.constant 0 : index
    %46 = vector.load %arg29[%c0_51, %c0_52] : memref<1x4xf32, #tpu.memory_space<vmem>>, vector<1x4xf32>
    %cst = arith.constant 0.000000e+00 : f32
    %47 = vector.broadcast %cst : f32 to vector<8x32xf32>
    %c7 = arith.constant 7 : index
    %c0_53 = arith.constant 0 : index
    %c0_54 = arith.constant 0 : index
    %48 = vector.load %arg0[%c7, %c0_53, %c0_54] : memref<8x8x4xf32, #tpu.memory_space<vmem>>, vector<1x8x4xf32>
    %49 = vector.shape_cast %48 : vector<1x8x4xf32> to vector<8x4xf32>
    %cst_55 = arith.constant dense<0.000000e+00> : vector<8x96xf32>
    %50 = tpu.matmul %49, %0, %cst_55 {dimension_numbers = #tpu.dot_dimension_numbers<[1], [0], [0], [1], [0, 0, 1, 1], [], []>} : vector<8x4xf32>, vector<4x96xf32>, vector<8x96xf32> -> vector<8x96xf32>
    %51 = arith.addf %50, %4 : vector<8x96xf32>
    %cst_56 = arith.constant dense<0.000000e+00> : vector<8x96xf32>
    %52 = tpu.matmul %47, %1, %cst_56 {dimension_numbers = #tpu.dot_dimension_numbers<[1], [0], [0], [1], [0, 0, 1, 1], [], []>} : vector<8x32xf32>, vector<32x96xf32>, vector<8x96xf32> -> vector<8x96xf32>
    %53 = vector.extract_strided_slice %51 {offsets = [0, 0], sizes = [8, 32], strides = [1, 1]} : vector<8x96xf32> to vector<8x32xf32>
    %54 = vector.extract_strided_slice %52 {offsets = [0, 0], sizes = [8, 32], strides = [1, 1]} : vector<8x96xf32> to vector<8x32xf32>
    %55 = arith.addf %53, %54 : vector<8x32xf32>
    %56 = arith.negf %55 : vector<8x32xf32>
    %57 = math.exp %56 : vector<8x32xf32>
    %cst_57 = arith.constant 1.000000e+00 : f32
    %58 = vector.broadcast %cst_57 : f32 to vector<8x32xf32>
    %59 = arith.addf %58, %57 : vector<8x32xf32>
    %60 = arith.divf %58, %59 : vector<8x32xf32>
    %61 = vector.extract_strided_slice %51 {offsets = [0, 32], sizes = [8, 32], strides = [1, 1]} : vector<8x96xf32> to vector<8x32xf32>
    %62 = vector.extract_strided_slice %52 {offsets = [0, 32], sizes = [8, 32], strides = [1, 1]} : vector<8x96xf32> to vector<8x32xf32>
    %63 = arith.addf %61, %62 : vector<8x32xf32>
    %64 = arith.negf %63 : vector<8x32xf32>
    %65 = math.exp %64 : vector<8x32xf32>
    %cst_58 = arith.constant 1.000000e+00 : f32
    %66 = vector.broadcast %cst_58 : f32 to vector<8x32xf32>
    %67 = arith.addf %66, %65 : vector<8x32xf32>
    %68 = arith.divf %66, %67 : vector<8x32xf32>
    %69 = vector.extract_strided_slice %51 {offsets = [0, 64], sizes = [8, 32], strides = [1, 1]} : vector<8x96xf32> to vector<8x32xf32>
    %70 = vector.extract_strided_slice %52 {offsets = [0, 64], sizes = [8, 32], strides = [1, 1]} : vector<8x96xf32> to vector<8x32xf32>
    %71 = arith.addf %70, %7 : vector<8x32xf32>
    %72 = arith.mulf %60, %71 : vector<8x32xf32>
    %73 = arith.addf %69, %72 : vector<8x32xf32>
    %74 = math.tanh %73 : vector<8x32xf32>
    %cst_59 = arith.constant 1.000000e+00 : f32
    %75 = vector.broadcast %cst_59 : f32 to vector<8x32xf32>
    %76 = arith.subf %75, %68 : vector<8x32xf32>
    %77 = arith.mulf %76, %74 : vector<8x32xf32>
    %78 = arith.mulf %68, %47 : vector<8x32xf32>
    %79 = arith.addf %77, %78 : vector<8x32xf32>
    %cst_60 = arith.constant dense<0.000000e+00> : vector<8x16xf32>
    %80 = tpu.matmul %79, %8, %cst_60 {dimension_numbers = #tpu.dot_dimension_numbers<[1], [0], [0], [1], [0, 0, 1, 1], [], []>} : vector<8x32xf32>, vector<32x16xf32>, vector<8x16xf32> -> vector<8x16xf32>
    %81 = arith.addf %80, %11 : vector<8x16xf32>
    %c6 = arith.constant 6 : index
    %c0_61 = arith.constant 0 : index
    %c0_62 = arith.constant 0 : index
    %82 = vector.load %arg0[%c6, %c0_61, %c0_62] : memref<8x8x4xf32, #tpu.memory_space<vmem>>, vector<1x8x4xf32>
    %83 = vector.shape_cast %82 : vector<1x8x4xf32> to vector<8x4xf32>
    %cst_63 = arith.constant dense<0.000000e+00> : vector<8x96xf32>
    %84 = tpu.matmul %83, %0, %cst_63 {dimension_numbers = #tpu.dot_dimension_numbers<[1], [0], [0], [1], [0, 0, 1, 1], [], []>} : vector<8x4xf32>, vector<4x96xf32>, vector<8x96xf32> -> vector<8x96xf32>
    %85 = arith.addf %84, %4 : vector<8x96xf32>
    %cst_64 = arith.constant dense<0.000000e+00> : vector<8x96xf32>
    %86 = tpu.matmul %79, %1, %cst_64 {dimension_numbers = #tpu.dot_dimension_numbers<[1], [0], [0], [1], [0, 0, 1, 1], [], []>} : vector<8x32xf32>, vector<32x96xf32>, vector<8x96xf32> -> vector<8x96xf32>
    %87 = vector.extract_strided_slice %85 {offsets = [0, 0], sizes = [8, 32], strides = [1, 1]} : vector<8x96xf32> to vector<8x32xf32>
    %88 = vector.extract_strided_slice %86 {offsets = [0, 0], sizes = [8, 32], strides = [1, 1]} : vector<8x96xf32> to vector<8x32xf32>
    %89 = arith.addf %87, %88 : vector<8x32xf32>
    %90 = arith.negf %89 : vector<8x32xf32>
    %91 = math.exp %90 : vector<8x32xf32>
    %cst_65 = arith.constant 1.000000e+00 : f32
    %92 = vector.broadcast %cst_65 : f32 to vector<8x32xf32>
    %93 = arith.addf %92, %91 : vector<8x32xf32>
    %94 = arith.divf %92, %93 : vector<8x32xf32>
    %95 = vector.extract_strided_slice %85 {offsets = [0, 32], sizes = [8, 32], strides = [1, 1]} : vector<8x96xf32> to vector<8x32xf32>
    %96 = vector.extract_strided_slice %86 {offsets = [0, 32], sizes = [8, 32], strides = [1, 1]} : vector<8x96xf32> to vector<8x32xf32>
    %97 = arith.addf %95, %96 : vector<8x32xf32>
    %98 = arith.negf %97 : vector<8x32xf32>
    %99 = math.exp %98 : vector<8x32xf32>
    %cst_66 = arith.constant 1.000000e+00 : f32
    %100 = vector.broadcast %cst_66 : f32 to vector<8x32xf32>
    %101 = arith.addf %100, %99 : vector<8x32xf32>
    %102 = arith.divf %100, %101 : vector<8x32xf32>
    %103 = vector.extract_strided_slice %85 {offsets = [0, 64], sizes = [8, 32], strides = [1, 1]} : vector<8x96xf32> to vector<8x32xf32>
    %104 = vector.extract_strided_slice %86 {offsets = [0, 64], sizes = [8, 32], strides = [1, 1]} : vector<8x96xf32> to vector<8x32xf32>
    %105 = arith.addf %104, %7 : vector<8x32xf32>
    %106 = arith.mulf %94, %105 : vector<8x32xf32>
    %107 = arith.addf %103, %106 : vector<8x32xf32>
    %108 = math.tanh %107 : vector<8x32xf32>
    %cst_67 = arith.constant 1.000000e+00 : f32
    %109 = vector.broadcast %cst_67 : f32 to vector<8x32xf32>
    %110 = arith.subf %109, %102 : vector<8x32xf32>
    %111 = arith.mulf %110, %108 : vector<8x32xf32>
    %112 = arith.mulf %102, %79 : vector<8x32xf32>
    %113 = arith.addf %111, %112 : vector<8x32xf32>
    %cst_68 = arith.constant dense<0.000000e+00> : vector<8x16xf32>
    %114 = tpu.matmul %113, %8, %cst_68 {dimension_numbers = #tpu.dot_dimension_numbers<[1], [0], [0], [1], [0, 0, 1, 1], [], []>} : vector<8x32xf32>, vector<32x16xf32>, vector<8x16xf32> -> vector<8x16xf32>
    %115 = arith.addf %114, %11 : vector<8x16xf32>
    %c5 = arith.constant 5 : index
    %c0_69 = arith.constant 0 : index
    %c0_70 = arith.constant 0 : index
    %116 = vector.load %arg0[%c5, %c0_69, %c0_70] : memref<8x8x4xf32, #tpu.memory_space<vmem>>, vector<1x8x4xf32>
    %117 = vector.shape_cast %116 : vector<1x8x4xf32> to vector<8x4xf32>
    %cst_71 = arith.constant dense<0.000000e+00> : vector<8x96xf32>
    %118 = tpu.matmul %117, %0, %cst_71 {dimension_numbers = #tpu.dot_dimension_numbers<[1], [0], [0], [1], [0, 0, 1, 1], [], []>} : vector<8x4xf32>, vector<4x96xf32>, vector<8x96xf32> -> vector<8x96xf32>
    %119 = arith.addf %118, %4 : vector<8x96xf32>
    %cst_72 = arith.constant dense<0.000000e+00> : vector<8x96xf32>
    %120 = tpu.matmul %113, %1, %cst_72 {dimension_numbers = #tpu.dot_dimension_numbers<[1], [0], [0], [1], [0, 0, 1, 1], [], []>} : vector<8x32xf32>, vector<32x96xf32>, vector<8x96xf32> -> vector<8x96xf32>
    %121 = vector.extract_strided_slice %119 {offsets = [0, 0], sizes = [8, 32], strides = [1, 1]} : vector<8x96xf32> to vector<8x32xf32>
    %122 = vector.extract_strided_slice %120 {offsets = [0, 0], sizes = [8, 32], strides = [1, 1]} : vector<8x96xf32> to vector<8x32xf32>
    %123 = arith.addf %121, %122 : vector<8x32xf32>
    %124 = arith.negf %123 : vector<8x32xf32>
    %125 = math.exp %124 : vector<8x32xf32>
    %cst_73 = arith.constant 1.000000e+00 : f32
    %126 = vector.broadcast %cst_73 : f32 to vector<8x32xf32>
    %127 = arith.addf %126, %125 : vector<8x32xf32>
    %128 = arith.divf %126, %127 : vector<8x32xf32>
    %129 = vector.extract_strided_slice %119 {offsets = [0, 32], sizes = [8, 32], strides = [1, 1]} : vector<8x96xf32> to vector<8x32xf32>
    %130 = vector.extract_strided_slice %120 {offsets = [0, 32], sizes = [8, 32], strides = [1, 1]} : vector<8x96xf32> to vector<8x32xf32>
    %131 = arith.addf %129, %130 : vector<8x32xf32>
    %132 = arith.negf %131 : vector<8x32xf32>
    %133 = math.exp %132 : vector<8x32xf32>
    %cst_74 = arith.constant 1.000000e+00 : f32
    %134 = vector.broadcast %cst_74 : f32 to vector<8x32xf32>
    %135 = arith.addf %134, %133 : vector<8x32xf32>
    %136 = arith.divf %134, %135 : vector<8x32xf32>
    %137 = vector.extract_strided_slice %119 {offsets = [0, 64], sizes = [8, 32], strides = [1, 1]} : vector<8x96xf32> to vector<8x32xf32>
    %138 = vector.extract_strided_slice %120 {offsets = [0, 64], sizes = [8, 32], strides = [1, 1]} : vector<8x96xf32> to vector<8x32xf32>
    %139 = arith.addf %138, %7 : vector<8x32xf32>
    %140 = arith.mulf %128, %139 : vector<8x32xf32>
    %141 = arith.addf %137, %140 : vector<8x32xf32>
    %142 = math.tanh %141 : vector<8x32xf32>
    %cst_75 = arith.constant 1.000000e+00 : f32
    %143 = vector.broadcast %cst_75 : f32 to vector<8x32xf32>
    %144 = arith.subf %143, %136 : vector<8x32xf32>
    %145 = arith.mulf %144, %142 : vector<8x32xf32>
    %146 = arith.mulf %136, %113 : vector<8x32xf32>
    %147 = arith.addf %145, %146 : vector<8x32xf32>
    %cst_76 = arith.constant dense<0.000000e+00> : vector<8x16xf32>
    %148 = tpu.matmul %147, %8, %cst_76 {dimension_numbers = #tpu.dot_dimension_numbers<[1], [0], [0], [1], [0, 0, 1, 1], [], []>} : vector<8x32xf32>, vector<32x16xf32>, vector<8x16xf32> -> vector<8x16xf32>
    %149 = arith.addf %148, %11 : vector<8x16xf32>
    %c4 = arith.constant 4 : index
    %c0_77 = arith.constant 0 : index
    %c0_78 = arith.constant 0 : index
    %150 = vector.load %arg0[%c4, %c0_77, %c0_78] : memref<8x8x4xf32, #tpu.memory_space<vmem>>, vector<1x8x4xf32>
    %151 = vector.shape_cast %150 : vector<1x8x4xf32> to vector<8x4xf32>
    %cst_79 = arith.constant dense<0.000000e+00> : vector<8x96xf32>
    %152 = tpu.matmul %151, %0, %cst_79 {dimension_numbers = #tpu.dot_dimension_numbers<[1], [0], [0], [1], [0, 0, 1, 1], [], []>} : vector<8x4xf32>, vector<4x96xf32>, vector<8x96xf32> -> vector<8x96xf32>
    %153 = arith.addf %152, %4 : vector<8x96xf32>
    %cst_80 = arith.constant dense<0.000000e+00> : vector<8x96xf32>
    %154 = tpu.matmul %147, %1, %cst_80 {dimension_numbers = #tpu.dot_dimension_numbers<[1], [0], [0], [1], [0, 0, 1, 1], [], []>} : vector<8x32xf32>, vector<32x96xf32>, vector<8x96xf32> -> vector<8x96xf32>
    %155 = vector.extract_strided_slice %153 {offsets = [0, 0], sizes = [8, 32], strides = [1, 1]} : vector<8x96xf32> to vector<8x32xf32>
    %156 = vector.extract_strided_slice %154 {offsets = [0, 0], sizes = [8, 32], strides = [1, 1]} : vector<8x96xf32> to vector<8x32xf32>
    %157 = arith.addf %155, %156 : vector<8x32xf32>
    %158 = arith.negf %157 : vector<8x32xf32>
    %159 = math.exp %158 : vector<8x32xf32>
    %cst_81 = arith.constant 1.000000e+00 : f32
    %160 = vector.broadcast %cst_81 : f32 to vector<8x32xf32>
    %161 = arith.addf %160, %159 : vector<8x32xf32>
    %162 = arith.divf %160, %161 : vector<8x32xf32>
    %163 = vector.extract_strided_slice %153 {offsets = [0, 32], sizes = [8, 32], strides = [1, 1]} : vector<8x96xf32> to vector<8x32xf32>
    %164 = vector.extract_strided_slice %154 {offsets = [0, 32], sizes = [8, 32], strides = [1, 1]} : vector<8x96xf32> to vector<8x32xf32>
    %165 = arith.addf %163, %164 : vector<8x32xf32>
    %166 = arith.negf %165 : vector<8x32xf32>
    %167 = math.exp %166 : vector<8x32xf32>
    %cst_82 = arith.constant 1.000000e+00 : f32
    %168 = vector.broadcast %cst_82 : f32 to vector<8x32xf32>
    %169 = arith.addf %168, %167 : vector<8x32xf32>
    %170 = arith.divf %168, %169 : vector<8x32xf32>
    %171 = vector.extract_strided_slice %153 {offsets = [0, 64], sizes = [8, 32], strides = [1, 1]} : vector<8x96xf32> to vector<8x32xf32>
    %172 = vector.extract_strided_slice %154 {offsets = [0, 64], sizes = [8, 32], strides = [1, 1]} : vector<8x96xf32> to vector<8x32xf32>
    %173 = arith.addf %172, %7 : vector<8x32xf32>
    %174 = arith.mulf %162, %173 : vector<8x32xf32>
    %175 = arith.addf %171, %174 : vector<8x32xf32>
    %176 = math.tanh %175 : vector<8x32xf32>
    %cst_83 = arith.constant 1.000000e+00 : f32
    %177 = vector.broadcast %cst_83 : f32 to vector<8x32xf32>
    %178 = arith.subf %177, %170 : vector<8x32xf32>
    %179 = arith.mulf %178, %176 : vector<8x32xf32>
    %180 = arith.mulf %170, %147 : vector<8x32xf32>
    %181 = arith.addf %179, %180 : vector<8x32xf32>
    %cst_84 = arith.constant dense<0.000000e+00> : vector<8x16xf32>
    %182 = tpu.matmul %181, %8, %cst_84 {dimension_numbers = #tpu.dot_dimension_numbers<[1], [0], [0], [1], [0, 0, 1, 1], [], []>} : vector<8x32xf32>, vector<32x16xf32>, vector<8x16xf32> -> vector<8x16xf32>
    %183 = arith.addf %182, %11 : vector<8x16xf32>
    %c3 = arith.constant 3 : index
    %c0_85 = arith.constant 0 : index
    %c0_86 = arith.constant 0 : index
    %184 = vector.load %arg0[%c3, %c0_85, %c0_86] : memref<8x8x4xf32, #tpu.memory_space<vmem>>, vector<1x8x4xf32>
    %185 = vector.shape_cast %184 : vector<1x8x4xf32> to vector<8x4xf32>
    %cst_87 = arith.constant dense<0.000000e+00> : vector<8x96xf32>
    %186 = tpu.matmul %185, %0, %cst_87 {dimension_numbers = #tpu.dot_dimension_numbers<[1], [0], [0], [1], [0, 0, 1, 1], [], []>} : vector<8x4xf32>, vector<4x96xf32>, vector<8x96xf32> -> vector<8x96xf32>
    %187 = arith.addf %186, %4 : vector<8x96xf32>
    %cst_88 = arith.constant dense<0.000000e+00> : vector<8x96xf32>
    %188 = tpu.matmul %181, %1, %cst_88 {dimension_numbers = #tpu.dot_dimension_numbers<[1], [0], [0], [1], [0, 0, 1, 1], [], []>} : vector<8x32xf32>, vector<32x96xf32>, vector<8x96xf32> -> vector<8x96xf32>
    %189 = vector.extract_strided_slice %187 {offsets = [0, 0], sizes = [8, 32], strides = [1, 1]} : vector<8x96xf32> to vector<8x32xf32>
    %190 = vector.extract_strided_slice %188 {offsets = [0, 0], sizes = [8, 32], strides = [1, 1]} : vector<8x96xf32> to vector<8x32xf32>
    %191 = arith.addf %189, %190 : vector<8x32xf32>
    %192 = arith.negf %191 : vector<8x32xf32>
    %193 = math.exp %192 : vector<8x32xf32>
    %cst_89 = arith.constant 1.000000e+00 : f32
    %194 = vector.broadcast %cst_89 : f32 to vector<8x32xf32>
    %195 = arith.addf %194, %193 : vector<8x32xf32>
    %196 = arith.divf %194, %195 : vector<8x32xf32>
    %197 = vector.extract_strided_slice %187 {offsets = [0, 32], sizes = [8, 32], strides = [1, 1]} : vector<8x96xf32> to vector<8x32xf32>
    %198 = vector.extract_strided_slice %188 {offsets = [0, 32], sizes = [8, 32], strides = [1, 1]} : vector<8x96xf32> to vector<8x32xf32>
    %199 = arith.addf %197, %198 : vector<8x32xf32>
    %200 = arith.negf %199 : vector<8x32xf32>
    %201 = math.exp %200 : vector<8x32xf32>
    %cst_90 = arith.constant 1.000000e+00 : f32
    %202 = vector.broadcast %cst_90 : f32 to vector<8x32xf32>
    %203 = arith.addf %202, %201 : vector<8x32xf32>
    %204 = arith.divf %202, %203 : vector<8x32xf32>
    %205 = vector.extract_strided_slice %187 {offsets = [0, 64], sizes = [8, 32], strides = [1, 1]} : vector<8x96xf32> to vector<8x32xf32>
    %206 = vector.extract_strided_slice %188 {offsets = [0, 64], sizes = [8, 32], strides = [1, 1]} : vector<8x96xf32> to vector<8x32xf32>
    %207 = arith.addf %206, %7 : vector<8x32xf32>
    %208 = arith.mulf %196, %207 : vector<8x32xf32>
    %209 = arith.addf %205, %208 : vector<8x32xf32>
    %210 = math.tanh %209 : vector<8x32xf32>
    %cst_91 = arith.constant 1.000000e+00 : f32
    %211 = vector.broadcast %cst_91 : f32 to vector<8x32xf32>
    %212 = arith.subf %211, %204 : vector<8x32xf32>
    %213 = arith.mulf %212, %210 : vector<8x32xf32>
    %214 = arith.mulf %204, %181 : vector<8x32xf32>
    %215 = arith.addf %213, %214 : vector<8x32xf32>
    %cst_92 = arith.constant dense<0.000000e+00> : vector<8x16xf32>
    %216 = tpu.matmul %215, %8, %cst_92 {dimension_numbers = #tpu.dot_dimension_numbers<[1], [0], [0], [1], [0, 0, 1, 1], [], []>} : vector<8x32xf32>, vector<32x16xf32>, vector<8x16xf32> -> vector<8x16xf32>
    %217 = arith.addf %216, %11 : vector<8x16xf32>
    %c2 = arith.constant 2 : index
    %c0_93 = arith.constant 0 : index
    %c0_94 = arith.constant 0 : index
    %218 = vector.load %arg0[%c2, %c0_93, %c0_94] : memref<8x8x4xf32, #tpu.memory_space<vmem>>, vector<1x8x4xf32>
    %219 = vector.shape_cast %218 : vector<1x8x4xf32> to vector<8x4xf32>
    %cst_95 = arith.constant dense<0.000000e+00> : vector<8x96xf32>
    %220 = tpu.matmul %219, %0, %cst_95 {dimension_numbers = #tpu.dot_dimension_numbers<[1], [0], [0], [1], [0, 0, 1, 1], [], []>} : vector<8x4xf32>, vector<4x96xf32>, vector<8x96xf32> -> vector<8x96xf32>
    %221 = arith.addf %220, %4 : vector<8x96xf32>
    %cst_96 = arith.constant dense<0.000000e+00> : vector<8x96xf32>
    %222 = tpu.matmul %215, %1, %cst_96 {dimension_numbers = #tpu.dot_dimension_numbers<[1], [0], [0], [1], [0, 0, 1, 1], [], []>} : vector<8x32xf32>, vector<32x96xf32>, vector<8x96xf32> -> vector<8x96xf32>
    %223 = vector.extract_strided_slice %221 {offsets = [0, 0], sizes = [8, 32], strides = [1, 1]} : vector<8x96xf32> to vector<8x32xf32>
    %224 = vector.extract_strided_slice %222 {offsets = [0, 0], sizes = [8, 32], strides = [1, 1]} : vector<8x96xf32> to vector<8x32xf32>
    %225 = arith.addf %223, %224 : vector<8x32xf32>
    %226 = arith.negf %225 : vector<8x32xf32>
    %227 = math.exp %226 : vector<8x32xf32>
    %cst_97 = arith.constant 1.000000e+00 : f32
    %228 = vector.broadcast %cst_97 : f32 to vector<8x32xf32>
    %229 = arith.addf %228, %227 : vector<8x32xf32>
    %230 = arith.divf %228, %229 : vector<8x32xf32>
    %231 = vector.extract_strided_slice %221 {offsets = [0, 32], sizes = [8, 32], strides = [1, 1]} : vector<8x96xf32> to vector<8x32xf32>
    %232 = vector.extract_strided_slice %222 {offsets = [0, 32], sizes = [8, 32], strides = [1, 1]} : vector<8x96xf32> to vector<8x32xf32>
    %233 = arith.addf %231, %232 : vector<8x32xf32>
    %234 = arith.negf %233 : vector<8x32xf32>
    %235 = math.exp %234 : vector<8x32xf32>
    %cst_98 = arith.constant 1.000000e+00 : f32
    %236 = vector.broadcast %cst_98 : f32 to vector<8x32xf32>
    %237 = arith.addf %236, %235 : vector<8x32xf32>
    %238 = arith.divf %236, %237 : vector<8x32xf32>
    %239 = vector.extract_strided_slice %221 {offsets = [0, 64], sizes = [8, 32], strides = [1, 1]} : vector<8x96xf32> to vector<8x32xf32>
    %240 = vector.extract_strided_slice %222 {offsets = [0, 64], sizes = [8, 32], strides = [1, 1]} : vector<8x96xf32> to vector<8x32xf32>
    %241 = arith.addf %240, %7 : vector<8x32xf32>
    %242 = arith.mulf %230, %241 : vector<8x32xf32>
    %243 = arith.addf %239, %242 : vector<8x32xf32>
    %244 = math.tanh %243 : vector<8x32xf32>
    %cst_99 = arith.constant 1.000000e+00 : f32
    %245 = vector.broadcast %cst_99 : f32 to vector<8x32xf32>
    %246 = arith.subf %245, %238 : vector<8x32xf32>
    %247 = arith.mulf %246, %244 : vector<8x32xf32>
    %248 = arith.mulf %238, %215 : vector<8x32xf32>
    %249 = arith.addf %247, %248 : vector<8x32xf32>
    %cst_100 = arith.constant dense<0.000000e+00> : vector<8x16xf32>
    %250 = tpu.matmul %249, %8, %cst_100 {dimension_numbers = #tpu.dot_dimension_numbers<[1], [0], [0], [1], [0, 0, 1, 1], [], []>} : vector<8x32xf32>, vector<32x16xf32>, vector<8x16xf32> -> vector<8x16xf32>
    %251 = arith.addf %250, %11 : vector<8x16xf32>
    %c1 = arith.constant 1 : index
    %c0_101 = arith.constant 0 : index
    %c0_102 = arith.constant 0 : index
    %252 = vector.load %arg0[%c1, %c0_101, %c0_102] : memref<8x8x4xf32, #tpu.memory_space<vmem>>, vector<1x8x4xf32>
    %253 = vector.shape_cast %252 : vector<1x8x4xf32> to vector<8x4xf32>
    %cst_103 = arith.constant dense<0.000000e+00> : vector<8x96xf32>
    %254 = tpu.matmul %253, %0, %cst_103 {dimension_numbers = #tpu.dot_dimension_numbers<[1], [0], [0], [1], [0, 0, 1, 1], [], []>} : vector<8x4xf32>, vector<4x96xf32>, vector<8x96xf32> -> vector<8x96xf32>
    %255 = arith.addf %254, %4 : vector<8x96xf32>
    %cst_104 = arith.constant dense<0.000000e+00> : vector<8x96xf32>
    %256 = tpu.matmul %249, %1, %cst_104 {dimension_numbers = #tpu.dot_dimension_numbers<[1], [0], [0], [1], [0, 0, 1, 1], [], []>} : vector<8x32xf32>, vector<32x96xf32>, vector<8x96xf32> -> vector<8x96xf32>
    %257 = vector.extract_strided_slice %255 {offsets = [0, 0], sizes = [8, 32], strides = [1, 1]} : vector<8x96xf32> to vector<8x32xf32>
    %258 = vector.extract_strided_slice %256 {offsets = [0, 0], sizes = [8, 32], strides = [1, 1]} : vector<8x96xf32> to vector<8x32xf32>
    %259 = arith.addf %257, %258 : vector<8x32xf32>
    %260 = arith.negf %259 : vector<8x32xf32>
    %261 = math.exp %260 : vector<8x32xf32>
    %cst_105 = arith.constant 1.000000e+00 : f32
    %262 = vector.broadcast %cst_105 : f32 to vector<8x32xf32>
    %263 = arith.addf %262, %261 : vector<8x32xf32>
    %264 = arith.divf %262, %263 : vector<8x32xf32>
    %265 = vector.extract_strided_slice %255 {offsets = [0, 32], sizes = [8, 32], strides = [1, 1]} : vector<8x96xf32> to vector<8x32xf32>
    %266 = vector.extract_strided_slice %256 {offsets = [0, 32], sizes = [8, 32], strides = [1, 1]} : vector<8x96xf32> to vector<8x32xf32>
    %267 = arith.addf %265, %266 : vector<8x32xf32>
    %268 = arith.negf %267 : vector<8x32xf32>
    %269 = math.exp %268 : vector<8x32xf32>
    %cst_106 = arith.constant 1.000000e+00 : f32
    %270 = vector.broadcast %cst_106 : f32 to vector<8x32xf32>
    %271 = arith.addf %270, %269 : vector<8x32xf32>
    %272 = arith.divf %270, %271 : vector<8x32xf32>
    %273 = vector.extract_strided_slice %255 {offsets = [0, 64], sizes = [8, 32], strides = [1, 1]} : vector<8x96xf32> to vector<8x32xf32>
    %274 = vector.extract_strided_slice %256 {offsets = [0, 64], sizes = [8, 32], strides = [1, 1]} : vector<8x96xf32> to vector<8x32xf32>
    %275 = arith.addf %274, %7 : vector<8x32xf32>
    %276 = arith.mulf %264, %275 : vector<8x32xf32>
    %277 = arith.addf %273, %276 : vector<8x32xf32>
    %278 = math.tanh %277 : vector<8x32xf32>
    %cst_107 = arith.constant 1.000000e+00 : f32
    %279 = vector.broadcast %cst_107 : f32 to vector<8x32xf32>
    %280 = arith.subf %279, %272 : vector<8x32xf32>
    %281 = arith.mulf %280, %278 : vector<8x32xf32>
    %282 = arith.mulf %272, %249 : vector<8x32xf32>
    %283 = arith.addf %281, %282 : vector<8x32xf32>
    %cst_108 = arith.constant dense<0.000000e+00> : vector<8x16xf32>
    %284 = tpu.matmul %283, %8, %cst_108 {dimension_numbers = #tpu.dot_dimension_numbers<[1], [0], [0], [1], [0, 0, 1, 1], [], []>} : vector<8x32xf32>, vector<32x16xf32>, vector<8x16xf32> -> vector<8x16xf32>
    %285 = arith.addf %284, %11 : vector<8x16xf32>
    %c0_109 = arith.constant 0 : index
    %c0_110 = arith.constant 0 : index
    %c0_111 = arith.constant 0 : index
    %286 = vector.load %arg0[%c0_109, %c0_110, %c0_111] : memref<8x8x4xf32, #tpu.memory_space<vmem>>, vector<1x8x4xf32>
    %287 = vector.shape_cast %286 : vector<1x8x4xf32> to vector<8x4xf32>
    %cst_112 = arith.constant dense<0.000000e+00> : vector<8x96xf32>
    %288 = tpu.matmul %287, %0, %cst_112 {dimension_numbers = #tpu.dot_dimension_numbers<[1], [0], [0], [1], [0, 0, 1, 1], [], []>} : vector<8x4xf32>, vector<4x96xf32>, vector<8x96xf32> -> vector<8x96xf32>
    %289 = arith.addf %288, %4 : vector<8x96xf32>
    %cst_113 = arith.constant dense<0.000000e+00> : vector<8x96xf32>
    %290 = tpu.matmul %283, %1, %cst_113 {dimension_numbers = #tpu.dot_dimension_numbers<[1], [0], [0], [1], [0, 0, 1, 1], [], []>} : vector<8x32xf32>, vector<32x96xf32>, vector<8x96xf32> -> vector<8x96xf32>
    %291 = vector.extract_strided_slice %289 {offsets = [0, 0], sizes = [8, 32], strides = [1, 1]} : vector<8x96xf32> to vector<8x32xf32>
    %292 = vector.extract_strided_slice %290 {offsets = [0, 0], sizes = [8, 32], strides = [1, 1]} : vector<8x96xf32> to vector<8x32xf32>
    %293 = arith.addf %291, %292 : vector<8x32xf32>
    %294 = arith.negf %293 : vector<8x32xf32>
    %295 = math.exp %294 : vector<8x32xf32>
    %cst_114 = arith.constant 1.000000e+00 : f32
    %296 = vector.broadcast %cst_114 : f32 to vector<8x32xf32>
    %297 = arith.addf %296, %295 : vector<8x32xf32>
    %298 = arith.divf %296, %297 : vector<8x32xf32>
    %299 = vector.extract_strided_slice %289 {offsets = [0, 32], sizes = [8, 32], strides = [1, 1]} : vector<8x96xf32> to vector<8x32xf32>
    %300 = vector.extract_strided_slice %290 {offsets = [0, 32], sizes = [8, 32], strides = [1, 1]} : vector<8x96xf32> to vector<8x32xf32>
    %301 = arith.addf %299, %300 : vector<8x32xf32>
    %302 = arith.negf %301 : vector<8x32xf32>
    %303 = math.exp %302 : vector<8x32xf32>
    %cst_115 = arith.constant 1.000000e+00 : f32
    %304 = vector.broadcast %cst_115 : f32 to vector<8x32xf32>
    %305 = arith.addf %304, %303 : vector<8x32xf32>
    %306 = arith.divf %304, %305 : vector<8x32xf32>
    %307 = vector.extract_strided_slice %289 {offsets = [0, 64], sizes = [8, 32], strides = [1, 1]} : vector<8x96xf32> to vector<8x32xf32>
    %308 = vector.extract_strided_slice %290 {offsets = [0, 64], sizes = [8, 32], strides = [1, 1]} : vector<8x96xf32> to vector<8x32xf32>
    %309 = arith.addf %308, %7 : vector<8x32xf32>
    %310 = arith.mulf %298, %309 : vector<8x32xf32>
    %311 = arith.addf %307, %310 : vector<8x32xf32>
    %312 = math.tanh %311 : vector<8x32xf32>
    %cst_116 = arith.constant 1.000000e+00 : f32
    %313 = vector.broadcast %cst_116 : f32 to vector<8x32xf32>
    %314 = arith.subf %313, %306 : vector<8x32xf32>
    %315 = arith.mulf %314, %312 : vector<8x32xf32>
    %316 = arith.mulf %306, %283 : vector<8x32xf32>
    %317 = arith.addf %315, %316 : vector<8x32xf32>
    %cst_117 = arith.constant dense<0.000000e+00> : vector<8x16xf32>
    %318 = tpu.matmul %317, %8, %cst_117 {dimension_numbers = #tpu.dot_dimension_numbers<[1], [0], [0], [1], [0, 0, 1, 1], [], []>} : vector<8x32xf32>, vector<32x16xf32>, vector<8x16xf32> -> vector<8x16xf32>
    %319 = arith.addf %318, %11 : vector<8x16xf32>
    %cst_118 = arith.constant dense<0.000000e+00> : vector<8x4xf32>
    %320 = tpu.matmul %319, %12, %cst_118 {dimension_numbers = #tpu.dot_dimension_numbers<[1], [0], [0], [1], [0, 0, 1, 1], [], []>} : vector<8x16xf32>, vector<16x4xf32>, vector<8x4xf32> -> vector<8x4xf32>
    %321 = vector.broadcast %14 : vector<1x4xf32> to vector<8x4xf32>
    %322 = arith.addf %320, %321 : vector<8x4xf32>
    %cst_119 = arith.constant dense<0.000000e+00> : vector<8x4xf32>
    %323 = tpu.matmul %319, %13, %cst_119 {dimension_numbers = #tpu.dot_dimension_numbers<[1], [0], [0], [1], [0, 0, 1, 1], [], []>} : vector<8x16xf32>, vector<16x4xf32>, vector<8x4xf32> -> vector<8x4xf32>
    %324 = vector.broadcast %15 : vector<1x4xf32> to vector<8x4xf32>
    %325 = arith.addf %323, %324 : vector<8x4xf32>
    %326 = math.exp %325 : vector<8x4xf32>
    %cst_120 = arith.constant 2.000000e-01 : f32
    %327 = vector.broadcast %cst_120 : f32 to vector<8x4xf32>
    %328 = arith.mulf %327, %326 : vector<8x4xf32>
    %c0_121 = arith.constant 0 : index
    %c0_122 = arith.constant 0 : index
    %329 = vector.load %arg1[%c0_121, %c0_122] : memref<8x4xf32, #tpu.memory_space<vmem>>, vector<8x4xf32>
    %330 = arith.mulf %328, %329 : vector<8x4xf32>
    %331 = arith.addf %322, %330 : vector<8x4xf32>
    %cst_123 = arith.constant dense<0.000000e+00> : vector<8x4xf32>
    %332 = tpu.matmul %331, %41, %cst_123 {dimension_numbers = #tpu.dot_dimension_numbers<[1], [0], [0], [1], [0, 0, 1, 1], [], []>} : vector<8x4xf32>, vector<4x4xf32>, vector<8x4xf32> -> vector<8x4xf32>
    %333 = arith.addf %332, %44 : vector<8x4xf32>
    %c0_124 = arith.constant 0 : index
    %c0_125 = arith.constant 0 : index
    %c0_126 = arith.constant 0 : index
    %334 = vector.load %arg0[%c0_124, %c0_125, %c0_126] : memref<8x8x4xf32, #tpu.memory_space<vmem>>, vector<1x8x4xf32>
    %335 = vector.shape_cast %334 : vector<1x8x4xf32> to vector<8x4xf32>
    %336 = arith.subf %335, %333 : vector<8x4xf32>
    %cst_127 = arith.constant 0.00999999977 : f32
    %337 = vector.broadcast %cst_127 : f32 to vector<8x4xf32>
    %338 = arith.divf %336, %337 : vector<8x4xf32>
    %339 = arith.mulf %338, %338 : vector<8x4xf32>
    %340 = vector.shape_cast %339 : vector<8x4xf32> to vector<1x8x4xf32>
    %cst_128 = arith.constant dense<0.000000e+00> : vector<1xf32>
    %341 = vector.multi_reduction <add>, %340, %cst_128 [1, 2] : vector<1x8x4xf32> to vector<1xf32>
    %342 = vector.shape_cast %341 : vector<1xf32> to vector<1x1x1xf32>
    %343 = vector.extract %342[0, 0, 0] : f32 from vector<1x1x1xf32>
    %cst_129 = arith.constant -5.000000e-01 : f32
    %344 = arith.mulf %cst_129, %343 : f32
    %cst_130 = arith.constant -117.959412 : f32
    %345 = arith.subf %344, %cst_130 : f32
    %346 = arith.mulf %333, %333 : vector<8x4xf32>
    %cst_131 = arith.constant dense<0.000000e+00> : vector<8xf32>
    %347 = vector.multi_reduction <add>, %346, %cst_131 [1] : vector<8x4xf32> to vector<8xf32>
    %348 = vector.shape_cast %347 : vector<8xf32> to vector<8x1xf32>
    %349 = math.sqrt %348 : vector<8x1xf32>
    %350 = vector.shape_cast %349 : vector<8x1xf32> to vector<1x8x1xf32>
    %cst_132 = arith.constant dense<0.000000e+00> : vector<1xf32>
    %351 = vector.multi_reduction <add>, %350, %cst_132 [1, 2] : vector<1x8x1xf32> to vector<1xf32>
    %352 = vector.shape_cast %351 : vector<1xf32> to vector<1x1x1xf32>
    %353 = vector.extract %352[0, 0, 0] : f32 from vector<1x1x1xf32>
    %cst_133 = arith.constant dense<0.000000e+00> : vector<8x32xf32>
    %354 = tpu.matmul %331, %16, %cst_133 {dimension_numbers = #tpu.dot_dimension_numbers<[1], [0], [0], [1], [0, 0, 1, 1], [], []>} : vector<8x4xf32>, vector<4x32xf32>, vector<8x32xf32> -> vector<8x32xf32>
    %cst_134 = arith.constant dense<0.000000e+00> : vector<8x32xf32>
    %355 = tpu.matmul %285, %17, %cst_134 {dimension_numbers = #tpu.dot_dimension_numbers<[1], [0], [0], [1], [0, 0, 1, 1], [], []>} : vector<8x16xf32>, vector<16x32xf32>, vector<8x32xf32> -> vector<8x32xf32>
    %356 = arith.addf %354, %355 : vector<8x32xf32>
    %357 = arith.addf %356, %20 : vector<8x32xf32>
    %cst_135 = arith.constant 0.000000e+00 : f32
    %358 = vector.broadcast %cst_135 : f32 to vector<8x32xf32>
    %359 = arith.maximumf %357, %358 : vector<8x32xf32>
    %360 = vector.broadcast %cst_135 : f32 to vector<8x32xf32>
    %361 = arith.subf %357, %360 : vector<8x32xf32>
    %362 = arith.cmpf one, %361, %361 : vector<8x32xf32>
    %363 = vector.broadcast %cst_135 : f32 to vector<8x32xf32>
    %364 = arith.addf %357, %363 : vector<8x32xf32>
    %365 = math.absf %361 : vector<8x32xf32>
    %cst_136 = arith.constant 0.000000e+00 : f32
    %366 = vector.broadcast %cst_136 : f32 to vector<8x32xf32>
    %367 = arith.subf %366, %365 : vector<8x32xf32>
    %368 = math.exp %367 : vector<8x32xf32>
    %369 = math.log1p %368 : vector<8x32xf32>
    %370 = arith.addf %359, %369 : vector<8x32xf32>
    %371 = arith.select %362, %364, %370 : vector<8x32xi1>, vector<8x32xf32>
    %cst_137 = arith.constant dense<0.000000e+00> : vector<8x32xf32>
    %372 = tpu.matmul %371, %21, %cst_137 {dimension_numbers = #tpu.dot_dimension_numbers<[1], [0], [0], [1], [0, 0, 1, 1], [], []>} : vector<8x32xf32>, vector<32x32xf32>, vector<8x32xf32> -> vector<8x32xf32>
    %373 = arith.addf %372, %24 : vector<8x32xf32>
    %cst_138 = arith.constant 0.000000e+00 : f32
    %374 = vector.broadcast %cst_138 : f32 to vector<8x32xf32>
    %375 = arith.maximumf %373, %374 : vector<8x32xf32>
    %376 = vector.broadcast %cst_138 : f32 to vector<8x32xf32>
    %377 = arith.subf %373, %376 : vector<8x32xf32>
    %378 = arith.cmpf one, %377, %377 : vector<8x32xf32>
    %379 = vector.broadcast %cst_138 : f32 to vector<8x32xf32>
    %380 = arith.addf %373, %379 : vector<8x32xf32>
    %381 = math.absf %377 : vector<8x32xf32>
    %cst_139 = arith.constant 0.000000e+00 : f32
    %382 = vector.broadcast %cst_139 : f32 to vector<8x32xf32>
    %383 = arith.subf %382, %381 : vector<8x32xf32>
    %384 = math.exp %383 : vector<8x32xf32>
    %385 = math.log1p %384 : vector<8x32xf32>
    %386 = arith.addf %375, %385 : vector<8x32xf32>
    %387 = arith.select %378, %380, %386 : vector<8x32xi1>, vector<8x32xf32>
    %cst_140 = arith.constant dense<0.000000e+00> : vector<8x4xf32>
    %388 = tpu.matmul %387, %25, %cst_140 {dimension_numbers = #tpu.dot_dimension_numbers<[1], [0], [0], [1], [0, 0, 1, 1], [], []>} : vector<8x32xf32>, vector<32x4xf32>, vector<8x4xf32> -> vector<8x4xf32>
    %389 = arith.addf %388, %28 : vector<8x4xf32>
    %cst_141 = arith.constant dense<0.000000e+00> : vector<8x4xf32>
    %390 = tpu.matmul %331, %29, %cst_141 {dimension_numbers = #tpu.dot_dimension_numbers<[1], [0], [0], [1], [0, 0, 1, 1], [], []>} : vector<8x4xf32>, vector<4x4xf32>, vector<8x4xf32> -> vector<8x4xf32>
    %391 = arith.addf %390, %32 : vector<8x4xf32>
    %cst_142 = arith.constant dense<0.000000e+00> : vector<8x128xf32>
    %392 = tpu.matmul %331, %33, %cst_142 {dimension_numbers = #tpu.dot_dimension_numbers<[1], [0], [0], [1], [0, 0, 1, 1], [], []>} : vector<8x4xf32>, vector<4x128xf32>, vector<8x128xf32> -> vector<8x128xf32>
    %393 = arith.addf %392, %36 : vector<8x128xf32>
    %cst_143 = arith.constant 0.000000e+00 : f32
    %394 = vector.broadcast %cst_143 : f32 to vector<8x128xf32>
    %395 = arith.maximumf %393, %394 : vector<8x128xf32>
    %396 = vector.broadcast %cst_143 : f32 to vector<8x128xf32>
    %397 = arith.subf %393, %396 : vector<8x128xf32>
    %398 = arith.cmpf one, %397, %397 : vector<8x128xf32>
    %399 = vector.broadcast %cst_143 : f32 to vector<8x128xf32>
    %400 = arith.addf %393, %399 : vector<8x128xf32>
    %401 = math.absf %397 : vector<8x128xf32>
    %cst_144 = arith.constant 0.000000e+00 : f32
    %402 = vector.broadcast %cst_144 : f32 to vector<8x128xf32>
    %403 = arith.subf %402, %401 : vector<8x128xf32>
    %404 = math.exp %403 : vector<8x128xf32>
    %405 = math.log1p %404 : vector<8x128xf32>
    %406 = arith.addf %395, %405 : vector<8x128xf32>
    %407 = arith.select %398, %400, %406 : vector<8x128xi1>, vector<8x128xf32>
    %cst_145 = arith.constant dense<0.000000e+00> : vector<8x4xf32>
    %408 = tpu.matmul %407, %37, %cst_145 {dimension_numbers = #tpu.dot_dimension_numbers<[1], [0], [0], [1], [0, 0, 1, 1], [], []>} : vector<8x128xf32>, vector<128x4xf32>, vector<8x4xf32> -> vector<8x4xf32>
    %409 = arith.addf %408, %40 : vector<8x4xf32>
    %410 = arith.negf %409 : vector<8x4xf32>
    %411 = math.exp %410 : vector<8x4xf32>
    %cst_146 = arith.constant 1.000000e+00 : f32
    %412 = vector.broadcast %cst_146 : f32 to vector<8x4xf32>
    %413 = arith.addf %412, %411 : vector<8x4xf32>
    %414 = arith.divf %412, %413 : vector<8x4xf32>
    %415 = math.absf %414 : vector<8x4xf32>
    %cst_147 = arith.constant 1.000000e-07 : f32
    %416 = vector.broadcast %cst_147 : f32 to vector<8x4xf32>
    %417 = arith.cmpf ogt, %415, %416 : vector<8x4xf32>
    %cst_148 = arith.constant 1.000000e-07 : f32
    %418 = vector.broadcast %cst_148 : f32 to vector<8x4xf32>
    %419 = arith.select %417, %414, %418 : vector<8x4xi1>, vector<8x4xf32>
    %420 = arith.subf %389, %391 : vector<8x4xf32>
    %421 = arith.divf %420, %419 : vector<8x4xf32>
    %422 = arith.mulf %421, %421 : vector<8x4xf32>
    %423 = vector.shape_cast %422 : vector<8x4xf32> to vector<1x8x4xf32>
    %cst_149 = arith.constant dense<0.000000e+00> : vector<1xf32>
    %424 = vector.multi_reduction <add>, %423, %cst_149 [1, 2] : vector<1x8x4xf32> to vector<1xf32>
    %425 = vector.shape_cast %424 : vector<1xf32> to vector<1x1x1xf32>
    %426 = vector.extract %425[0, 0, 0] : f32 from vector<1x1x1xf32>
    %cst_150 = arith.constant 5.000000e-03 : f32
    %427 = arith.mulf %cst_150, %426 : f32
    %cst_151 = arith.constant 0.000000e+00 : f32
    %428 = arith.addf %cst_151, %427 : f32
    %cst_152 = arith.constant 0.00999999977 : f32
    %429 = vector.broadcast %cst_152 : f32 to vector<8x4xf32>
    %430 = arith.mulf %389, %429 : vector<8x4xf32>
    %431 = arith.addf %331, %430 : vector<8x4xf32>
    %c0_153 = arith.constant 0 : index
    %c0_154 = arith.constant 0 : index
    %c0_155 = arith.constant 0 : index
    %432 = vector.load %arg2[%c0_153, %c0_154, %c0_155] : memref<7x8x4xf32, #tpu.memory_space<vmem>>, vector<1x8x4xf32>
    %433 = vector.shape_cast %432 : vector<1x8x4xf32> to vector<8x4xf32>
    %434 = arith.mulf %414, %433 : vector<8x4xf32>
    %435 = arith.addf %431, %434 : vector<8x4xf32>
    %cst_156 = arith.constant dense<0.000000e+00> : vector<8x4xf32>
    %436 = tpu.matmul %435, %41, %cst_156 {dimension_numbers = #tpu.dot_dimension_numbers<[1], [0], [0], [1], [0, 0, 1, 1], [], []>} : vector<8x4xf32>, vector<4x4xf32>, vector<8x4xf32> -> vector<8x4xf32>
    %437 = arith.addf %436, %44 : vector<8x4xf32>
    %c1_157 = arith.constant 1 : index
    %c0_158 = arith.constant 0 : index
    %c0_159 = arith.constant 0 : index
    %438 = vector.load %arg0[%c1_157, %c0_158, %c0_159] : memref<8x8x4xf32, #tpu.memory_space<vmem>>, vector<1x8x4xf32>
    %439 = vector.shape_cast %438 : vector<1x8x4xf32> to vector<8x4xf32>
    %440 = arith.subf %439, %437 : vector<8x4xf32>
    %cst_160 = arith.constant 0.00999999977 : f32
    %441 = vector.broadcast %cst_160 : f32 to vector<8x4xf32>
    %442 = arith.divf %440, %441 : vector<8x4xf32>
    %443 = arith.mulf %442, %442 : vector<8x4xf32>
    %444 = vector.shape_cast %443 : vector<8x4xf32> to vector<1x8x4xf32>
    %cst_161 = arith.constant dense<0.000000e+00> : vector<1xf32>
    %445 = vector.multi_reduction <add>, %444, %cst_161 [1, 2] : vector<1x8x4xf32> to vector<1xf32>
    %446 = vector.shape_cast %445 : vector<1xf32> to vector<1x1x1xf32>
    %447 = vector.extract %446[0, 0, 0] : f32 from vector<1x1x1xf32>
    %cst_162 = arith.constant -5.000000e-01 : f32
    %448 = arith.mulf %cst_162, %447 : f32
    %cst_163 = arith.constant -117.959412 : f32
    %449 = arith.subf %448, %cst_163 : f32
    %450 = arith.mulf %437, %437 : vector<8x4xf32>
    %cst_164 = arith.constant dense<0.000000e+00> : vector<8xf32>
    %451 = vector.multi_reduction <add>, %450, %cst_164 [1] : vector<8x4xf32> to vector<8xf32>
    %452 = vector.shape_cast %451 : vector<8xf32> to vector<8x1xf32>
    %453 = math.sqrt %452 : vector<8x1xf32>
    %454 = vector.shape_cast %453 : vector<8x1xf32> to vector<1x8x1xf32>
    %cst_165 = arith.constant dense<0.000000e+00> : vector<1xf32>
    %455 = vector.multi_reduction <add>, %454, %cst_165 [1, 2] : vector<1x8x1xf32> to vector<1xf32>
    %456 = vector.shape_cast %455 : vector<1xf32> to vector<1x1x1xf32>
    %457 = vector.extract %456[0, 0, 0] : f32 from vector<1x1x1xf32>
    %458 = arith.addf %345, %449 : f32
    %459 = arith.addf %353, %457 : f32
    %cst_166 = arith.constant dense<0.000000e+00> : vector<8x32xf32>
    %460 = tpu.matmul %435, %16, %cst_166 {dimension_numbers = #tpu.dot_dimension_numbers<[1], [0], [0], [1], [0, 0, 1, 1], [], []>} : vector<8x4xf32>, vector<4x32xf32>, vector<8x32xf32> -> vector<8x32xf32>
    %cst_167 = arith.constant dense<0.000000e+00> : vector<8x32xf32>
    %461 = tpu.matmul %251, %17, %cst_167 {dimension_numbers = #tpu.dot_dimension_numbers<[1], [0], [0], [1], [0, 0, 1, 1], [], []>} : vector<8x16xf32>, vector<16x32xf32>, vector<8x32xf32> -> vector<8x32xf32>
    %462 = arith.addf %460, %461 : vector<8x32xf32>
    %463 = arith.addf %462, %20 : vector<8x32xf32>
    %cst_168 = arith.constant 0.000000e+00 : f32
    %464 = vector.broadcast %cst_168 : f32 to vector<8x32xf32>
    %465 = arith.maximumf %463, %464 : vector<8x32xf32>
    %466 = vector.broadcast %cst_168 : f32 to vector<8x32xf32>
    %467 = arith.subf %463, %466 : vector<8x32xf32>
    %468 = arith.cmpf one, %467, %467 : vector<8x32xf32>
    %469 = vector.broadcast %cst_168 : f32 to vector<8x32xf32>
    %470 = arith.addf %463, %469 : vector<8x32xf32>
    %471 = math.absf %467 : vector<8x32xf32>
    %cst_169 = arith.constant 0.000000e+00 : f32
    %472 = vector.broadcast %cst_169 : f32 to vector<8x32xf32>
    %473 = arith.subf %472, %471 : vector<8x32xf32>
    %474 = math.exp %473 : vector<8x32xf32>
    %475 = math.log1p %474 : vector<8x32xf32>
    %476 = arith.addf %465, %475 : vector<8x32xf32>
    %477 = arith.select %468, %470, %476 : vector<8x32xi1>, vector<8x32xf32>
    %cst_170 = arith.constant dense<0.000000e+00> : vector<8x32xf32>
    %478 = tpu.matmul %477, %21, %cst_170 {dimension_numbers = #tpu.dot_dimension_numbers<[1], [0], [0], [1], [0, 0, 1, 1], [], []>} : vector<8x32xf32>, vector<32x32xf32>, vector<8x32xf32> -> vector<8x32xf32>
    %479 = arith.addf %478, %24 : vector<8x32xf32>
    %cst_171 = arith.constant 0.000000e+00 : f32
    %480 = vector.broadcast %cst_171 : f32 to vector<8x32xf32>
    %481 = arith.maximumf %479, %480 : vector<8x32xf32>
    %482 = vector.broadcast %cst_171 : f32 to vector<8x32xf32>
    %483 = arith.subf %479, %482 : vector<8x32xf32>
    %484 = arith.cmpf one, %483, %483 : vector<8x32xf32>
    %485 = vector.broadcast %cst_171 : f32 to vector<8x32xf32>
    %486 = arith.addf %479, %485 : vector<8x32xf32>
    %487 = math.absf %483 : vector<8x32xf32>
    %cst_172 = arith.constant 0.000000e+00 : f32
    %488 = vector.broadcast %cst_172 : f32 to vector<8x32xf32>
    %489 = arith.subf %488, %487 : vector<8x32xf32>
    %490 = math.exp %489 : vector<8x32xf32>
    %491 = math.log1p %490 : vector<8x32xf32>
    %492 = arith.addf %481, %491 : vector<8x32xf32>
    %493 = arith.select %484, %486, %492 : vector<8x32xi1>, vector<8x32xf32>
    %cst_173 = arith.constant dense<0.000000e+00> : vector<8x4xf32>
    %494 = tpu.matmul %493, %25, %cst_173 {dimension_numbers = #tpu.dot_dimension_numbers<[1], [0], [0], [1], [0, 0, 1, 1], [], []>} : vector<8x32xf32>, vector<32x4xf32>, vector<8x4xf32> -> vector<8x4xf32>
    %495 = arith.addf %494, %28 : vector<8x4xf32>
    %cst_174 = arith.constant dense<0.000000e+00> : vector<8x4xf32>
    %496 = tpu.matmul %435, %29, %cst_174 {dimension_numbers = #tpu.dot_dimension_numbers<[1], [0], [0], [1], [0, 0, 1, 1], [], []>} : vector<8x4xf32>, vector<4x4xf32>, vector<8x4xf32> -> vector<8x4xf32>
    %497 = arith.addf %496, %32 : vector<8x4xf32>
    %cst_175 = arith.constant dense<0.000000e+00> : vector<8x128xf32>
    %498 = tpu.matmul %435, %33, %cst_175 {dimension_numbers = #tpu.dot_dimension_numbers<[1], [0], [0], [1], [0, 0, 1, 1], [], []>} : vector<8x4xf32>, vector<4x128xf32>, vector<8x128xf32> -> vector<8x128xf32>
    %499 = arith.addf %498, %36 : vector<8x128xf32>
    %cst_176 = arith.constant 0.000000e+00 : f32
    %500 = vector.broadcast %cst_176 : f32 to vector<8x128xf32>
    %501 = arith.maximumf %499, %500 : vector<8x128xf32>
    %502 = vector.broadcast %cst_176 : f32 to vector<8x128xf32>
    %503 = arith.subf %499, %502 : vector<8x128xf32>
    %504 = arith.cmpf one, %503, %503 : vector<8x128xf32>
    %505 = vector.broadcast %cst_176 : f32 to vector<8x128xf32>
    %506 = arith.addf %499, %505 : vector<8x128xf32>
    %507 = math.absf %503 : vector<8x128xf32>
    %cst_177 = arith.constant 0.000000e+00 : f32
    %508 = vector.broadcast %cst_177 : f32 to vector<8x128xf32>
    %509 = arith.subf %508, %507 : vector<8x128xf32>
    %510 = math.exp %509 : vector<8x128xf32>
    %511 = math.log1p %510 : vector<8x128xf32>
    %512 = arith.addf %501, %511 : vector<8x128xf32>
    %513 = arith.select %504, %506, %512 : vector<8x128xi1>, vector<8x128xf32>
    %cst_178 = arith.constant dense<0.000000e+00> : vector<8x4xf32>
    %514 = tpu.matmul %513, %37, %cst_178 {dimension_numbers = #tpu.dot_dimension_numbers<[1], [0], [0], [1], [0, 0, 1, 1], [], []>} : vector<8x128xf32>, vector<128x4xf32>, vector<8x4xf32> -> vector<8x4xf32>
    %515 = arith.addf %514, %40 : vector<8x4xf32>
    %516 = arith.negf %515 : vector<8x4xf32>
    %517 = math.exp %516 : vector<8x4xf32>
    %cst_179 = arith.constant 1.000000e+00 : f32
    %518 = vector.broadcast %cst_179 : f32 to vector<8x4xf32>
    %519 = arith.addf %518, %517 : vector<8x4xf32>
    %520 = arith.divf %518, %519 : vector<8x4xf32>
    %521 = math.absf %520 : vector<8x4xf32>
    %cst_180 = arith.constant 1.000000e-07 : f32
    %522 = vector.broadcast %cst_180 : f32 to vector<8x4xf32>
    %523 = arith.cmpf ogt, %521, %522 : vector<8x4xf32>
    %cst_181 = arith.constant 1.000000e-07 : f32
    %524 = vector.broadcast %cst_181 : f32 to vector<8x4xf32>
    %525 = arith.select %523, %520, %524 : vector<8x4xi1>, vector<8x4xf32>
    %526 = arith.subf %495, %497 : vector<8x4xf32>
    %527 = arith.divf %526, %525 : vector<8x4xf32>
    %528 = arith.mulf %527, %527 : vector<8x4xf32>
    %529 = vector.shape_cast %528 : vector<8x4xf32> to vector<1x8x4xf32>
    %cst_182 = arith.constant dense<0.000000e+00> : vector<1xf32>
    %530 = vector.multi_reduction <add>, %529, %cst_182 [1, 2] : vector<1x8x4xf32> to vector<1xf32>
    %531 = vector.shape_cast %530 : vector<1xf32> to vector<1x1x1xf32>
    %532 = vector.extract %531[0, 0, 0] : f32 from vector<1x1x1xf32>
    %cst_183 = arith.constant 5.000000e-03 : f32
    %533 = arith.mulf %cst_183, %532 : f32
    %534 = arith.addf %428, %533 : f32
    %cst_184 = arith.constant 0.00999999977 : f32
    %535 = vector.broadcast %cst_184 : f32 to vector<8x4xf32>
    %536 = arith.mulf %495, %535 : vector<8x4xf32>
    %537 = arith.addf %435, %536 : vector<8x4xf32>
    %c1_185 = arith.constant 1 : index
    %c0_186 = arith.constant 0 : index
    %c0_187 = arith.constant 0 : index
    %538 = vector.load %arg2[%c1_185, %c0_186, %c0_187] : memref<7x8x4xf32, #tpu.memory_space<vmem>>, vector<1x8x4xf32>
    %539 = vector.shape_cast %538 : vector<1x8x4xf32> to vector<8x4xf32>
    %540 = arith.mulf %520, %539 : vector<8x4xf32>
    %541 = arith.addf %537, %540 : vector<8x4xf32>
    %cst_188 = arith.constant dense<0.000000e+00> : vector<8x4xf32>
    %542 = tpu.matmul %541, %41, %cst_188 {dimension_numbers = #tpu.dot_dimension_numbers<[1], [0], [0], [1], [0, 0, 1, 1], [], []>} : vector<8x4xf32>, vector<4x4xf32>, vector<8x4xf32> -> vector<8x4xf32>
    %543 = arith.addf %542, %44 : vector<8x4xf32>
    %c2_189 = arith.constant 2 : index
    %c0_190 = arith.constant 0 : index
    %c0_191 = arith.constant 0 : index
    %544 = vector.load %arg0[%c2_189, %c0_190, %c0_191] : memref<8x8x4xf32, #tpu.memory_space<vmem>>, vector<1x8x4xf32>
    %545 = vector.shape_cast %544 : vector<1x8x4xf32> to vector<8x4xf32>
    %546 = arith.subf %545, %543 : vector<8x4xf32>
    %cst_192 = arith.constant 0.00999999977 : f32
    %547 = vector.broadcast %cst_192 : f32 to vector<8x4xf32>
    %548 = arith.divf %546, %547 : vector<8x4xf32>
    %549 = arith.mulf %548, %548 : vector<8x4xf32>
    %550 = vector.shape_cast %549 : vector<8x4xf32> to vector<1x8x4xf32>
    %cst_193 = arith.constant dense<0.000000e+00> : vector<1xf32>
    %551 = vector.multi_reduction <add>, %550, %cst_193 [1, 2] : vector<1x8x4xf32> to vector<1xf32>
    %552 = vector.shape_cast %551 : vector<1xf32> to vector<1x1x1xf32>
    %553 = vector.extract %552[0, 0, 0] : f32 from vector<1x1x1xf32>
    %cst_194 = arith.constant -5.000000e-01 : f32
    %554 = arith.mulf %cst_194, %553 : f32
    %cst_195 = arith.constant -117.959412 : f32
    %555 = arith.subf %554, %cst_195 : f32
    %556 = arith.mulf %543, %543 : vector<8x4xf32>
    %cst_196 = arith.constant dense<0.000000e+00> : vector<8xf32>
    %557 = vector.multi_reduction <add>, %556, %cst_196 [1] : vector<8x4xf32> to vector<8xf32>
    %558 = vector.shape_cast %557 : vector<8xf32> to vector<8x1xf32>
    %559 = math.sqrt %558 : vector<8x1xf32>
    %560 = vector.shape_cast %559 : vector<8x1xf32> to vector<1x8x1xf32>
    %cst_197 = arith.constant dense<0.000000e+00> : vector<1xf32>
    %561 = vector.multi_reduction <add>, %560, %cst_197 [1, 2] : vector<1x8x1xf32> to vector<1xf32>
    %562 = vector.shape_cast %561 : vector<1xf32> to vector<1x1x1xf32>
    %563 = vector.extract %562[0, 0, 0] : f32 from vector<1x1x1xf32>
    %564 = arith.addf %458, %555 : f32
    %565 = arith.addf %459, %563 : f32
    %cst_198 = arith.constant dense<0.000000e+00> : vector<8x32xf32>
    %566 = tpu.matmul %541, %16, %cst_198 {dimension_numbers = #tpu.dot_dimension_numbers<[1], [0], [0], [1], [0, 0, 1, 1], [], []>} : vector<8x4xf32>, vector<4x32xf32>, vector<8x32xf32> -> vector<8x32xf32>
    %cst_199 = arith.constant dense<0.000000e+00> : vector<8x32xf32>
    %567 = tpu.matmul %217, %17, %cst_199 {dimension_numbers = #tpu.dot_dimension_numbers<[1], [0], [0], [1], [0, 0, 1, 1], [], []>} : vector<8x16xf32>, vector<16x32xf32>, vector<8x32xf32> -> vector<8x32xf32>
    %568 = arith.addf %566, %567 : vector<8x32xf32>
    %569 = arith.addf %568, %20 : vector<8x32xf32>
    %cst_200 = arith.constant 0.000000e+00 : f32
    %570 = vector.broadcast %cst_200 : f32 to vector<8x32xf32>
    %571 = arith.maximumf %569, %570 : vector<8x32xf32>
    %572 = vector.broadcast %cst_200 : f32 to vector<8x32xf32>
    %573 = arith.subf %569, %572 : vector<8x32xf32>
    %574 = arith.cmpf one, %573, %573 : vector<8x32xf32>
    %575 = vector.broadcast %cst_200 : f32 to vector<8x32xf32>
    %576 = arith.addf %569, %575 : vector<8x32xf32>
    %577 = math.absf %573 : vector<8x32xf32>
    %cst_201 = arith.constant 0.000000e+00 : f32
    %578 = vector.broadcast %cst_201 : f32 to vector<8x32xf32>
    %579 = arith.subf %578, %577 : vector<8x32xf32>
    %580 = math.exp %579 : vector<8x32xf32>
    %581 = math.log1p %580 : vector<8x32xf32>
    %582 = arith.addf %571, %581 : vector<8x32xf32>
    %583 = arith.select %574, %576, %582 : vector<8x32xi1>, vector<8x32xf32>
    %cst_202 = arith.constant dense<0.000000e+00> : vector<8x32xf32>
    %584 = tpu.matmul %583, %21, %cst_202 {dimension_numbers = #tpu.dot_dimension_numbers<[1], [0], [0], [1], [0, 0, 1, 1], [], []>} : vector<8x32xf32>, vector<32x32xf32>, vector<8x32xf32> -> vector<8x32xf32>
    %585 = arith.addf %584, %24 : vector<8x32xf32>
    %cst_203 = arith.constant 0.000000e+00 : f32
    %586 = vector.broadcast %cst_203 : f32 to vector<8x32xf32>
    %587 = arith.maximumf %585, %586 : vector<8x32xf32>
    %588 = vector.broadcast %cst_203 : f32 to vector<8x32xf32>
    %589 = arith.subf %585, %588 : vector<8x32xf32>
    %590 = arith.cmpf one, %589, %589 : vector<8x32xf32>
    %591 = vector.broadcast %cst_203 : f32 to vector<8x32xf32>
    %592 = arith.addf %585, %591 : vector<8x32xf32>
    %593 = math.absf %589 : vector<8x32xf32>
    %cst_204 = arith.constant 0.000000e+00 : f32
    %594 = vector.broadcast %cst_204 : f32 to vector<8x32xf32>
    %595 = arith.subf %594, %593 : vector<8x32xf32>
    %596 = math.exp %595 : vector<8x32xf32>
    %597 = math.log1p %596 : vector<8x32xf32>
    %598 = arith.addf %587, %597 : vector<8x32xf32>
    %599 = arith.select %590, %592, %598 : vector<8x32xi1>, vector<8x32xf32>
    %cst_205 = arith.constant dense<0.000000e+00> : vector<8x4xf32>
    %600 = tpu.matmul %599, %25, %cst_205 {dimension_numbers = #tpu.dot_dimension_numbers<[1], [0], [0], [1], [0, 0, 1, 1], [], []>} : vector<8x32xf32>, vector<32x4xf32>, vector<8x4xf32> -> vector<8x4xf32>
    %601 = arith.addf %600, %28 : vector<8x4xf32>
    %cst_206 = arith.constant dense<0.000000e+00> : vector<8x4xf32>
    %602 = tpu.matmul %541, %29, %cst_206 {dimension_numbers = #tpu.dot_dimension_numbers<[1], [0], [0], [1], [0, 0, 1, 1], [], []>} : vector<8x4xf32>, vector<4x4xf32>, vector<8x4xf32> -> vector<8x4xf32>
    %603 = arith.addf %602, %32 : vector<8x4xf32>
    %cst_207 = arith.constant dense<0.000000e+00> : vector<8x128xf32>
    %604 = tpu.matmul %541, %33, %cst_207 {dimension_numbers = #tpu.dot_dimension_numbers<[1], [0], [0], [1], [0, 0, 1, 1], [], []>} : vector<8x4xf32>, vector<4x128xf32>, vector<8x128xf32> -> vector<8x128xf32>
    %605 = arith.addf %604, %36 : vector<8x128xf32>
    %cst_208 = arith.constant 0.000000e+00 : f32
    %606 = vector.broadcast %cst_208 : f32 to vector<8x128xf32>
    %607 = arith.maximumf %605, %606 : vector<8x128xf32>
    %608 = vector.broadcast %cst_208 : f32 to vector<8x128xf32>
    %609 = arith.subf %605, %608 : vector<8x128xf32>
    %610 = arith.cmpf one, %609, %609 : vector<8x128xf32>
    %611 = vector.broadcast %cst_208 : f32 to vector<8x128xf32>
    %612 = arith.addf %605, %611 : vector<8x128xf32>
    %613 = math.absf %609 : vector<8x128xf32>
    %cst_209 = arith.constant 0.000000e+00 : f32
    %614 = vector.broadcast %cst_209 : f32 to vector<8x128xf32>
    %615 = arith.subf %614, %613 : vector<8x128xf32>
    %616 = math.exp %615 : vector<8x128xf32>
    %617 = math.log1p %616 : vector<8x128xf32>
    %618 = arith.addf %607, %617 : vector<8x128xf32>
    %619 = arith.select %610, %612, %618 : vector<8x128xi1>, vector<8x128xf32>
    %cst_210 = arith.constant dense<0.000000e+00> : vector<8x4xf32>
    %620 = tpu.matmul %619, %37, %cst_210 {dimension_numbers = #tpu.dot_dimension_numbers<[1], [0], [0], [1], [0, 0, 1, 1], [], []>} : vector<8x128xf32>, vector<128x4xf32>, vector<8x4xf32> -> vector<8x4xf32>
    %621 = arith.addf %620, %40 : vector<8x4xf32>
    %622 = arith.negf %621 : vector<8x4xf32>
    %623 = math.exp %622 : vector<8x4xf32>
    %cst_211 = arith.constant 1.000000e+00 : f32
    %624 = vector.broadcast %cst_211 : f32 to vector<8x4xf32>
    %625 = arith.addf %624, %623 : vector<8x4xf32>
    %626 = arith.divf %624, %625 : vector<8x4xf32>
    %627 = math.absf %626 : vector<8x4xf32>
    %cst_212 = arith.constant 1.000000e-07 : f32
    %628 = vector.broadcast %cst_212 : f32 to vector<8x4xf32>
    %629 = arith.cmpf ogt, %627, %628 : vector<8x4xf32>
    %cst_213 = arith.constant 1.000000e-07 : f32
    %630 = vector.broadcast %cst_213 : f32 to vector<8x4xf32>
    %631 = arith.select %629, %626, %630 : vector<8x4xi1>, vector<8x4xf32>
    %632 = arith.subf %601, %603 : vector<8x4xf32>
    %633 = arith.divf %632, %631 : vector<8x4xf32>
    %634 = arith.mulf %633, %633 : vector<8x4xf32>
    %635 = vector.shape_cast %634 : vector<8x4xf32> to vector<1x8x4xf32>
    %cst_214 = arith.constant dense<0.000000e+00> : vector<1xf32>
    %636 = vector.multi_reduction <add>, %635, %cst_214 [1, 2] : vector<1x8x4xf32> to vector<1xf32>
    %637 = vector.shape_cast %636 : vector<1xf32> to vector<1x1x1xf32>
    %638 = vector.extract %637[0, 0, 0] : f32 from vector<1x1x1xf32>
    %cst_215 = arith.constant 5.000000e-03 : f32
    %639 = arith.mulf %cst_215, %638 : f32
    %640 = arith.addf %534, %639 : f32
    %cst_216 = arith.constant 0.00999999977 : f32
    %641 = vector.broadcast %cst_216 : f32 to vector<8x4xf32>
    %642 = arith.mulf %601, %641 : vector<8x4xf32>
    %643 = arith.addf %541, %642 : vector<8x4xf32>
    %c2_217 = arith.constant 2 : index
    %c0_218 = arith.constant 0 : index
    %c0_219 = arith.constant 0 : index
    %644 = vector.load %arg2[%c2_217, %c0_218, %c0_219] : memref<7x8x4xf32, #tpu.memory_space<vmem>>, vector<1x8x4xf32>
    %645 = vector.shape_cast %644 : vector<1x8x4xf32> to vector<8x4xf32>
    %646 = arith.mulf %626, %645 : vector<8x4xf32>
    %647 = arith.addf %643, %646 : vector<8x4xf32>
    %cst_220 = arith.constant dense<0.000000e+00> : vector<8x4xf32>
    %648 = tpu.matmul %647, %41, %cst_220 {dimension_numbers = #tpu.dot_dimension_numbers<[1], [0], [0], [1], [0, 0, 1, 1], [], []>} : vector<8x4xf32>, vector<4x4xf32>, vector<8x4xf32> -> vector<8x4xf32>
    %649 = arith.addf %648, %44 : vector<8x4xf32>
    %c3_221 = arith.constant 3 : index
    %c0_222 = arith.constant 0 : index
    %c0_223 = arith.constant 0 : index
    %650 = vector.load %arg0[%c3_221, %c0_222, %c0_223] : memref<8x8x4xf32, #tpu.memory_space<vmem>>, vector<1x8x4xf32>
    %651 = vector.shape_cast %650 : vector<1x8x4xf32> to vector<8x4xf32>
    %652 = arith.subf %651, %649 : vector<8x4xf32>
    %cst_224 = arith.constant 0.00999999977 : f32
    %653 = vector.broadcast %cst_224 : f32 to vector<8x4xf32>
    %654 = arith.divf %652, %653 : vector<8x4xf32>
    %655 = arith.mulf %654, %654 : vector<8x4xf32>
    %656 = vector.shape_cast %655 : vector<8x4xf32> to vector<1x8x4xf32>
    %cst_225 = arith.constant dense<0.000000e+00> : vector<1xf32>
    %657 = vector.multi_reduction <add>, %656, %cst_225 [1, 2] : vector<1x8x4xf32> to vector<1xf32>
    %658 = vector.shape_cast %657 : vector<1xf32> to vector<1x1x1xf32>
    %659 = vector.extract %658[0, 0, 0] : f32 from vector<1x1x1xf32>
    %cst_226 = arith.constant -5.000000e-01 : f32
    %660 = arith.mulf %cst_226, %659 : f32
    %cst_227 = arith.constant -117.959412 : f32
    %661 = arith.subf %660, %cst_227 : f32
    %662 = arith.mulf %649, %649 : vector<8x4xf32>
    %cst_228 = arith.constant dense<0.000000e+00> : vector<8xf32>
    %663 = vector.multi_reduction <add>, %662, %cst_228 [1] : vector<8x4xf32> to vector<8xf32>
    %664 = vector.shape_cast %663 : vector<8xf32> to vector<8x1xf32>
    %665 = math.sqrt %664 : vector<8x1xf32>
    %666 = vector.shape_cast %665 : vector<8x1xf32> to vector<1x8x1xf32>
    %cst_229 = arith.constant dense<0.000000e+00> : vector<1xf32>
    %667 = vector.multi_reduction <add>, %666, %cst_229 [1, 2] : vector<1x8x1xf32> to vector<1xf32>
    %668 = vector.shape_cast %667 : vector<1xf32> to vector<1x1x1xf32>
    %669 = vector.extract %668[0, 0, 0] : f32 from vector<1x1x1xf32>
    %670 = arith.addf %564, %661 : f32
    %671 = arith.addf %565, %669 : f32
    %cst_230 = arith.constant dense<0.000000e+00> : vector<8x32xf32>
    %672 = tpu.matmul %647, %16, %cst_230 {dimension_numbers = #tpu.dot_dimension_numbers<[1], [0], [0], [1], [0, 0, 1, 1], [], []>} : vector<8x4xf32>, vector<4x32xf32>, vector<8x32xf32> -> vector<8x32xf32>
    %cst_231 = arith.constant dense<0.000000e+00> : vector<8x32xf32>
    %673 = tpu.matmul %183, %17, %cst_231 {dimension_numbers = #tpu.dot_dimension_numbers<[1], [0], [0], [1], [0, 0, 1, 1], [], []>} : vector<8x16xf32>, vector<16x32xf32>, vector<8x32xf32> -> vector<8x32xf32>
    %674 = arith.addf %672, %673 : vector<8x32xf32>
    %675 = arith.addf %674, %20 : vector<8x32xf32>
    %cst_232 = arith.constant 0.000000e+00 : f32
    %676 = vector.broadcast %cst_232 : f32 to vector<8x32xf32>
    %677 = arith.maximumf %675, %676 : vector<8x32xf32>
    %678 = vector.broadcast %cst_232 : f32 to vector<8x32xf32>
    %679 = arith.subf %675, %678 : vector<8x32xf32>
    %680 = arith.cmpf one, %679, %679 : vector<8x32xf32>
    %681 = vector.broadcast %cst_232 : f32 to vector<8x32xf32>
    %682 = arith.addf %675, %681 : vector<8x32xf32>
    %683 = math.absf %679 : vector<8x32xf32>
    %cst_233 = arith.constant 0.000000e+00 : f32
    %684 = vector.broadcast %cst_233 : f32 to vector<8x32xf32>
    %685 = arith.subf %684, %683 : vector<8x32xf32>
    %686 = math.exp %685 : vector<8x32xf32>
    %687 = math.log1p %686 : vector<8x32xf32>
    %688 = arith.addf %677, %687 : vector<8x32xf32>
    %689 = arith.select %680, %682, %688 : vector<8x32xi1>, vector<8x32xf32>
    %cst_234 = arith.constant dense<0.000000e+00> : vector<8x32xf32>
    %690 = tpu.matmul %689, %21, %cst_234 {dimension_numbers = #tpu.dot_dimension_numbers<[1], [0], [0], [1], [0, 0, 1, 1], [], []>} : vector<8x32xf32>, vector<32x32xf32>, vector<8x32xf32> -> vector<8x32xf32>
    %691 = arith.addf %690, %24 : vector<8x32xf32>
    %cst_235 = arith.constant 0.000000e+00 : f32
    %692 = vector.broadcast %cst_235 : f32 to vector<8x32xf32>
    %693 = arith.maximumf %691, %692 : vector<8x32xf32>
    %694 = vector.broadcast %cst_235 : f32 to vector<8x32xf32>
    %695 = arith.subf %691, %694 : vector<8x32xf32>
    %696 = arith.cmpf one, %695, %695 : vector<8x32xf32>
    %697 = vector.broadcast %cst_235 : f32 to vector<8x32xf32>
    %698 = arith.addf %691, %697 : vector<8x32xf32>
    %699 = math.absf %695 : vector<8x32xf32>
    %cst_236 = arith.constant 0.000000e+00 : f32
    %700 = vector.broadcast %cst_236 : f32 to vector<8x32xf32>
    %701 = arith.subf %700, %699 : vector<8x32xf32>
    %702 = math.exp %701 : vector<8x32xf32>
    %703 = math.log1p %702 : vector<8x32xf32>
    %704 = arith.addf %693, %703 : vector<8x32xf32>
    %705 = arith.select %696, %698, %704 : vector<8x32xi1>, vector<8x32xf32>
    %cst_237 = arith.constant dense<0.000000e+00> : vector<8x4xf32>
    %706 = tpu.matmul %705, %25, %cst_237 {dimension_numbers = #tpu.dot_dimension_numbers<[1], [0], [0], [1], [0, 0, 1, 1], [], []>} : vector<8x32xf32>, vector<32x4xf32>, vector<8x4xf32> -> vector<8x4xf32>
    %707 = arith.addf %706, %28 : vector<8x4xf32>
    %cst_238 = arith.constant dense<0.000000e+00> : vector<8x4xf32>
    %708 = tpu.matmul %647, %29, %cst_238 {dimension_numbers = #tpu.dot_dimension_numbers<[1], [0], [0], [1], [0, 0, 1, 1], [], []>} : vector<8x4xf32>, vector<4x4xf32>, vector<8x4xf32> -> vector<8x4xf32>
    %709 = arith.addf %708, %32 : vector<8x4xf32>
    %cst_239 = arith.constant dense<0.000000e+00> : vector<8x128xf32>
    %710 = tpu.matmul %647, %33, %cst_239 {dimension_numbers = #tpu.dot_dimension_numbers<[1], [0], [0], [1], [0, 0, 1, 1], [], []>} : vector<8x4xf32>, vector<4x128xf32>, vector<8x128xf32> -> vector<8x128xf32>
    %711 = arith.addf %710, %36 : vector<8x128xf32>
    %cst_240 = arith.constant 0.000000e+00 : f32
    %712 = vector.broadcast %cst_240 : f32 to vector<8x128xf32>
    %713 = arith.maximumf %711, %712 : vector<8x128xf32>
    %714 = vector.broadcast %cst_240 : f32 to vector<8x128xf32>
    %715 = arith.subf %711, %714 : vector<8x128xf32>
    %716 = arith.cmpf one, %715, %715 : vector<8x128xf32>
    %717 = vector.broadcast %cst_240 : f32 to vector<8x128xf32>
    %718 = arith.addf %711, %717 : vector<8x128xf32>
    %719 = math.absf %715 : vector<8x128xf32>
    %cst_241 = arith.constant 0.000000e+00 : f32
    %720 = vector.broadcast %cst_241 : f32 to vector<8x128xf32>
    %721 = arith.subf %720, %719 : vector<8x128xf32>
    %722 = math.exp %721 : vector<8x128xf32>
    %723 = math.log1p %722 : vector<8x128xf32>
    %724 = arith.addf %713, %723 : vector<8x128xf32>
    %725 = arith.select %716, %718, %724 : vector<8x128xi1>, vector<8x128xf32>
    %cst_242 = arith.constant dense<0.000000e+00> : vector<8x4xf32>
    %726 = tpu.matmul %725, %37, %cst_242 {dimension_numbers = #tpu.dot_dimension_numbers<[1], [0], [0], [1], [0, 0, 1, 1], [], []>} : vector<8x128xf32>, vector<128x4xf32>, vector<8x4xf32> -> vector<8x4xf32>
    %727 = arith.addf %726, %40 : vector<8x4xf32>
    %728 = arith.negf %727 : vector<8x4xf32>
    %729 = math.exp %728 : vector<8x4xf32>
    %cst_243 = arith.constant 1.000000e+00 : f32
    %730 = vector.broadcast %cst_243 : f32 to vector<8x4xf32>
    %731 = arith.addf %730, %729 : vector<8x4xf32>
    %732 = arith.divf %730, %731 : vector<8x4xf32>
    %733 = math.absf %732 : vector<8x4xf32>
    %cst_244 = arith.constant 1.000000e-07 : f32
    %734 = vector.broadcast %cst_244 : f32 to vector<8x4xf32>
    %735 = arith.cmpf ogt, %733, %734 : vector<8x4xf32>
    %cst_245 = arith.constant 1.000000e-07 : f32
    %736 = vector.broadcast %cst_245 : f32 to vector<8x4xf32>
    %737 = arith.select %735, %732, %736 : vector<8x4xi1>, vector<8x4xf32>
    %738 = arith.subf %707, %709 : vector<8x4xf32>
    %739 = arith.divf %738, %737 : vector<8x4xf32>
    %740 = arith.mulf %739, %739 : vector<8x4xf32>
    %741 = vector.shape_cast %740 : vector<8x4xf32> to vector<1x8x4xf32>
    %cst_246 = arith.constant dense<0.000000e+00> : vector<1xf32>
    %742 = vector.multi_reduction <add>, %741, %cst_246 [1, 2] : vector<1x8x4xf32> to vector<1xf32>
    %743 = vector.shape_cast %742 : vector<1xf32> to vector<1x1x1xf32>
    %744 = vector.extract %743[0, 0, 0] : f32 from vector<1x1x1xf32>
    %cst_247 = arith.constant 5.000000e-03 : f32
    %745 = arith.mulf %cst_247, %744 : f32
    %746 = arith.addf %640, %745 : f32
    %cst_248 = arith.constant 0.00999999977 : f32
    %747 = vector.broadcast %cst_248 : f32 to vector<8x4xf32>
    %748 = arith.mulf %707, %747 : vector<8x4xf32>
    %749 = arith.addf %647, %748 : vector<8x4xf32>
    %c3_249 = arith.constant 3 : index
    %c0_250 = arith.constant 0 : index
    %c0_251 = arith.constant 0 : index
    %750 = vector.load %arg2[%c3_249, %c0_250, %c0_251] : memref<7x8x4xf32, #tpu.memory_space<vmem>>, vector<1x8x4xf32>
    %751 = vector.shape_cast %750 : vector<1x8x4xf32> to vector<8x4xf32>
    %752 = arith.mulf %732, %751 : vector<8x4xf32>
    %753 = arith.addf %749, %752 : vector<8x4xf32>
    %cst_252 = arith.constant dense<0.000000e+00> : vector<8x4xf32>
    %754 = tpu.matmul %753, %41, %cst_252 {dimension_numbers = #tpu.dot_dimension_numbers<[1], [0], [0], [1], [0, 0, 1, 1], [], []>} : vector<8x4xf32>, vector<4x4xf32>, vector<8x4xf32> -> vector<8x4xf32>
    %755 = arith.addf %754, %44 : vector<8x4xf32>
    %c4_253 = arith.constant 4 : index
    %c0_254 = arith.constant 0 : index
    %c0_255 = arith.constant 0 : index
    %756 = vector.load %arg0[%c4_253, %c0_254, %c0_255] : memref<8x8x4xf32, #tpu.memory_space<vmem>>, vector<1x8x4xf32>
    %757 = vector.shape_cast %756 : vector<1x8x4xf32> to vector<8x4xf32>
    %758 = arith.subf %757, %755 : vector<8x4xf32>
    %cst_256 = arith.constant 0.00999999977 : f32
    %759 = vector.broadcast %cst_256 : f32 to vector<8x4xf32>
    %760 = arith.divf %758, %759 : vector<8x4xf32>
    %761 = arith.mulf %760, %760 : vector<8x4xf32>
    %762 = vector.shape_cast %761 : vector<8x4xf32> to vector<1x8x4xf32>
    %cst_257 = arith.constant dense<0.000000e+00> : vector<1xf32>
    %763 = vector.multi_reduction <add>, %762, %cst_257 [1, 2] : vector<1x8x4xf32> to vector<1xf32>
    %764 = vector.shape_cast %763 : vector<1xf32> to vector<1x1x1xf32>
    %765 = vector.extract %764[0, 0, 0] : f32 from vector<1x1x1xf32>
    %cst_258 = arith.constant -5.000000e-01 : f32
    %766 = arith.mulf %cst_258, %765 : f32
    %cst_259 = arith.constant -117.959412 : f32
    %767 = arith.subf %766, %cst_259 : f32
    %768 = arith.mulf %755, %755 : vector<8x4xf32>
    %cst_260 = arith.constant dense<0.000000e+00> : vector<8xf32>
    %769 = vector.multi_reduction <add>, %768, %cst_260 [1] : vector<8x4xf32> to vector<8xf32>
    %770 = vector.shape_cast %769 : vector<8xf32> to vector<8x1xf32>
    %771 = math.sqrt %770 : vector<8x1xf32>
    %772 = vector.shape_cast %771 : vector<8x1xf32> to vector<1x8x1xf32>
    %cst_261 = arith.constant dense<0.000000e+00> : vector<1xf32>
    %773 = vector.multi_reduction <add>, %772, %cst_261 [1, 2] : vector<1x8x1xf32> to vector<1xf32>
    %774 = vector.shape_cast %773 : vector<1xf32> to vector<1x1x1xf32>
    %775 = vector.extract %774[0, 0, 0] : f32 from vector<1x1x1xf32>
    %776 = arith.addf %670, %767 : f32
    %777 = arith.addf %671, %775 : f32
    %cst_262 = arith.constant dense<0.000000e+00> : vector<8x32xf32>
    %778 = tpu.matmul %753, %16, %cst_262 {dimension_numbers = #tpu.dot_dimension_numbers<[1], [0], [0], [1], [0, 0, 1, 1], [], []>} : vector<8x4xf32>, vector<4x32xf32>, vector<8x32xf32> -> vector<8x32xf32>
    %cst_263 = arith.constant dense<0.000000e+00> : vector<8x32xf32>
    %779 = tpu.matmul %149, %17, %cst_263 {dimension_numbers = #tpu.dot_dimension_numbers<[1], [0], [0], [1], [0, 0, 1, 1], [], []>} : vector<8x16xf32>, vector<16x32xf32>, vector<8x32xf32> -> vector<8x32xf32>
    %780 = arith.addf %778, %779 : vector<8x32xf32>
    %781 = arith.addf %780, %20 : vector<8x32xf32>
    %cst_264 = arith.constant 0.000000e+00 : f32
    %782 = vector.broadcast %cst_264 : f32 to vector<8x32xf32>
    %783 = arith.maximumf %781, %782 : vector<8x32xf32>
    %784 = vector.broadcast %cst_264 : f32 to vector<8x32xf32>
    %785 = arith.subf %781, %784 : vector<8x32xf32>
    %786 = arith.cmpf one, %785, %785 : vector<8x32xf32>
    %787 = vector.broadcast %cst_264 : f32 to vector<8x32xf32>
    %788 = arith.addf %781, %787 : vector<8x32xf32>
    %789 = math.absf %785 : vector<8x32xf32>
    %cst_265 = arith.constant 0.000000e+00 : f32
    %790 = vector.broadcast %cst_265 : f32 to vector<8x32xf32>
    %791 = arith.subf %790, %789 : vector<8x32xf32>
    %792 = math.exp %791 : vector<8x32xf32>
    %793 = math.log1p %792 : vector<8x32xf32>
    %794 = arith.addf %783, %793 : vector<8x32xf32>
    %795 = arith.select %786, %788, %794 : vector<8x32xi1>, vector<8x32xf32>
    %cst_266 = arith.constant dense<0.000000e+00> : vector<8x32xf32>
    %796 = tpu.matmul %795, %21, %cst_266 {dimension_numbers = #tpu.dot_dimension_numbers<[1], [0], [0], [1], [0, 0, 1, 1], [], []>} : vector<8x32xf32>, vector<32x32xf32>, vector<8x32xf32> -> vector<8x32xf32>
    %797 = arith.addf %796, %24 : vector<8x32xf32>
    %cst_267 = arith.constant 0.000000e+00 : f32
    %798 = vector.broadcast %cst_267 : f32 to vector<8x32xf32>
    %799 = arith.maximumf %797, %798 : vector<8x32xf32>
    %800 = vector.broadcast %cst_267 : f32 to vector<8x32xf32>
    %801 = arith.subf %797, %800 : vector<8x32xf32>
    %802 = arith.cmpf one, %801, %801 : vector<8x32xf32>
    %803 = vector.broadcast %cst_267 : f32 to vector<8x32xf32>
    %804 = arith.addf %797, %803 : vector<8x32xf32>
    %805 = math.absf %801 : vector<8x32xf32>
    %cst_268 = arith.constant 0.000000e+00 : f32
    %806 = vector.broadcast %cst_268 : f32 to vector<8x32xf32>
    %807 = arith.subf %806, %805 : vector<8x32xf32>
    %808 = math.exp %807 : vector<8x32xf32>
    %809 = math.log1p %808 : vector<8x32xf32>
    %810 = arith.addf %799, %809 : vector<8x32xf32>
    %811 = arith.select %802, %804, %810 : vector<8x32xi1>, vector<8x32xf32>
    %cst_269 = arith.constant dense<0.000000e+00> : vector<8x4xf32>
    %812 = tpu.matmul %811, %25, %cst_269 {dimension_numbers = #tpu.dot_dimension_numbers<[1], [0], [0], [1], [0, 0, 1, 1], [], []>} : vector<8x32xf32>, vector<32x4xf32>, vector<8x4xf32> -> vector<8x4xf32>
    %813 = arith.addf %812, %28 : vector<8x4xf32>
    %cst_270 = arith.constant dense<0.000000e+00> : vector<8x4xf32>
    %814 = tpu.matmul %753, %29, %cst_270 {dimension_numbers = #tpu.dot_dimension_numbers<[1], [0], [0], [1], [0, 0, 1, 1], [], []>} : vector<8x4xf32>, vector<4x4xf32>, vector<8x4xf32> -> vector<8x4xf32>
    %815 = arith.addf %814, %32 : vector<8x4xf32>
    %cst_271 = arith.constant dense<0.000000e+00> : vector<8x128xf32>
    %816 = tpu.matmul %753, %33, %cst_271 {dimension_numbers = #tpu.dot_dimension_numbers<[1], [0], [0], [1], [0, 0, 1, 1], [], []>} : vector<8x4xf32>, vector<4x128xf32>, vector<8x128xf32> -> vector<8x128xf32>
    %817 = arith.addf %816, %36 : vector<8x128xf32>
    %cst_272 = arith.constant 0.000000e+00 : f32
    %818 = vector.broadcast %cst_272 : f32 to vector<8x128xf32>
    %819 = arith.maximumf %817, %818 : vector<8x128xf32>
    %820 = vector.broadcast %cst_272 : f32 to vector<8x128xf32>
    %821 = arith.subf %817, %820 : vector<8x128xf32>
    %822 = arith.cmpf one, %821, %821 : vector<8x128xf32>
    %823 = vector.broadcast %cst_272 : f32 to vector<8x128xf32>
    %824 = arith.addf %817, %823 : vector<8x128xf32>
    %825 = math.absf %821 : vector<8x128xf32>
    %cst_273 = arith.constant 0.000000e+00 : f32
    %826 = vector.broadcast %cst_273 : f32 to vector<8x128xf32>
    %827 = arith.subf %826, %825 : vector<8x128xf32>
    %828 = math.exp %827 : vector<8x128xf32>
    %829 = math.log1p %828 : vector<8x128xf32>
    %830 = arith.addf %819, %829 : vector<8x128xf32>
    %831 = arith.select %822, %824, %830 : vector<8x128xi1>, vector<8x128xf32>
    %cst_274 = arith.constant dense<0.000000e+00> : vector<8x4xf32>
    %832 = tpu.matmul %831, %37, %cst_274 {dimension_numbers = #tpu.dot_dimension_numbers<[1], [0], [0], [1], [0, 0, 1, 1], [], []>} : vector<8x128xf32>, vector<128x4xf32>, vector<8x4xf32> -> vector<8x4xf32>
    %833 = arith.addf %832, %40 : vector<8x4xf32>
    %834 = arith.negf %833 : vector<8x4xf32>
    %835 = math.exp %834 : vector<8x4xf32>
    %cst_275 = arith.constant 1.000000e+00 : f32
    %836 = vector.broadcast %cst_275 : f32 to vector<8x4xf32>
    %837 = arith.addf %836, %835 : vector<8x4xf32>
    %838 = arith.divf %836, %837 : vector<8x4xf32>
    %839 = math.absf %838 : vector<8x4xf32>
    %cst_276 = arith.constant 1.000000e-07 : f32
    %840 = vector.broadcast %cst_276 : f32 to vector<8x4xf32>
    %841 = arith.cmpf ogt, %839, %840 : vector<8x4xf32>
    %cst_277 = arith.constant 1.000000e-07 : f32
    %842 = vector.broadcast %cst_277 : f32 to vector<8x4xf32>
    %843 = arith.select %841, %838, %842 : vector<8x4xi1>, vector<8x4xf32>
    %844 = arith.subf %813, %815 : vector<8x4xf32>
    %845 = arith.divf %844, %843 : vector<8x4xf32>
    %846 = arith.mulf %845, %845 : vector<8x4xf32>
    %847 = vector.shape_cast %846 : vector<8x4xf32> to vector<1x8x4xf32>
    %cst_278 = arith.constant dense<0.000000e+00> : vector<1xf32>
    %848 = vector.multi_reduction <add>, %847, %cst_278 [1, 2] : vector<1x8x4xf32> to vector<1xf32>
    %849 = vector.shape_cast %848 : vector<1xf32> to vector<1x1x1xf32>
    %850 = vector.extract %849[0, 0, 0] : f32 from vector<1x1x1xf32>
    %cst_279 = arith.constant 5.000000e-03 : f32
    %851 = arith.mulf %cst_279, %850 : f32
    %852 = arith.addf %746, %851 : f32
    %cst_280 = arith.constant 0.00999999977 : f32
    %853 = vector.broadcast %cst_280 : f32 to vector<8x4xf32>
    %854 = arith.mulf %813, %853 : vector<8x4xf32>
    %855 = arith.addf %753, %854 : vector<8x4xf32>
    %c4_281 = arith.constant 4 : index
    %c0_282 = arith.constant 0 : index
    %c0_283 = arith.constant 0 : index
    %856 = vector.load %arg2[%c4_281, %c0_282, %c0_283] : memref<7x8x4xf32, #tpu.memory_space<vmem>>, vector<1x8x4xf32>
    %857 = vector.shape_cast %856 : vector<1x8x4xf32> to vector<8x4xf32>
    %858 = arith.mulf %838, %857 : vector<8x4xf32>
    %859 = arith.addf %855, %858 : vector<8x4xf32>
    %cst_284 = arith.constant dense<0.000000e+00> : vector<8x4xf32>
    %860 = tpu.matmul %859, %41, %cst_284 {dimension_numbers = #tpu.dot_dimension_numbers<[1], [0], [0], [1], [0, 0, 1, 1], [], []>} : vector<8x4xf32>, vector<4x4xf32>, vector<8x4xf32> -> vector<8x4xf32>
    %861 = arith.addf %860, %44 : vector<8x4xf32>
    %c5_285 = arith.constant 5 : index
    %c0_286 = arith.constant 0 : index
    %c0_287 = arith.constant 0 : index
    %862 = vector.load %arg0[%c5_285, %c0_286, %c0_287] : memref<8x8x4xf32, #tpu.memory_space<vmem>>, vector<1x8x4xf32>
    %863 = vector.shape_cast %862 : vector<1x8x4xf32> to vector<8x4xf32>
    %864 = arith.subf %863, %861 : vector<8x4xf32>
    %cst_288 = arith.constant 0.00999999977 : f32
    %865 = vector.broadcast %cst_288 : f32 to vector<8x4xf32>
    %866 = arith.divf %864, %865 : vector<8x4xf32>
    %867 = arith.mulf %866, %866 : vector<8x4xf32>
    %868 = vector.shape_cast %867 : vector<8x4xf32> to vector<1x8x4xf32>
    %cst_289 = arith.constant dense<0.000000e+00> : vector<1xf32>
    %869 = vector.multi_reduction <add>, %868, %cst_289 [1, 2] : vector<1x8x4xf32> to vector<1xf32>
    %870 = vector.shape_cast %869 : vector<1xf32> to vector<1x1x1xf32>
    %871 = vector.extract %870[0, 0, 0] : f32 from vector<1x1x1xf32>
    %cst_290 = arith.constant -5.000000e-01 : f32
    %872 = arith.mulf %cst_290, %871 : f32
    %cst_291 = arith.constant -117.959412 : f32
    %873 = arith.subf %872, %cst_291 : f32
    %874 = arith.mulf %861, %861 : vector<8x4xf32>
    %cst_292 = arith.constant dense<0.000000e+00> : vector<8xf32>
    %875 = vector.multi_reduction <add>, %874, %cst_292 [1] : vector<8x4xf32> to vector<8xf32>
    %876 = vector.shape_cast %875 : vector<8xf32> to vector<8x1xf32>
    %877 = math.sqrt %876 : vector<8x1xf32>
    %878 = vector.shape_cast %877 : vector<8x1xf32> to vector<1x8x1xf32>
    %cst_293 = arith.constant dense<0.000000e+00> : vector<1xf32>
    %879 = vector.multi_reduction <add>, %878, %cst_293 [1, 2] : vector<1x8x1xf32> to vector<1xf32>
    %880 = vector.shape_cast %879 : vector<1xf32> to vector<1x1x1xf32>
    %881 = vector.extract %880[0, 0, 0] : f32 from vector<1x1x1xf32>
    %882 = arith.addf %776, %873 : f32
    %883 = arith.addf %777, %881 : f32
    %cst_294 = arith.constant dense<0.000000e+00> : vector<8x32xf32>
    %884 = tpu.matmul %859, %16, %cst_294 {dimension_numbers = #tpu.dot_dimension_numbers<[1], [0], [0], [1], [0, 0, 1, 1], [], []>} : vector<8x4xf32>, vector<4x32xf32>, vector<8x32xf32> -> vector<8x32xf32>
    %cst_295 = arith.constant dense<0.000000e+00> : vector<8x32xf32>
    %885 = tpu.matmul %115, %17, %cst_295 {dimension_numbers = #tpu.dot_dimension_numbers<[1], [0], [0], [1], [0, 0, 1, 1], [], []>} : vector<8x16xf32>, vector<16x32xf32>, vector<8x32xf32> -> vector<8x32xf32>
    %886 = arith.addf %884, %885 : vector<8x32xf32>
    %887 = arith.addf %886, %20 : vector<8x32xf32>
    %cst_296 = arith.constant 0.000000e+00 : f32
    %888 = vector.broadcast %cst_296 : f32 to vector<8x32xf32>
    %889 = arith.maximumf %887, %888 : vector<8x32xf32>
    %890 = vector.broadcast %cst_296 : f32 to vector<8x32xf32>
    %891 = arith.subf %887, %890 : vector<8x32xf32>
    %892 = arith.cmpf one, %891, %891 : vector<8x32xf32>
    %893 = vector.broadcast %cst_296 : f32 to vector<8x32xf32>
    %894 = arith.addf %887, %893 : vector<8x32xf32>
    %895 = math.absf %891 : vector<8x32xf32>
    %cst_297 = arith.constant 0.000000e+00 : f32
    %896 = vector.broadcast %cst_297 : f32 to vector<8x32xf32>
    %897 = arith.subf %896, %895 : vector<8x32xf32>
    %898 = math.exp %897 : vector<8x32xf32>
    %899 = math.log1p %898 : vector<8x32xf32>
    %900 = arith.addf %889, %899 : vector<8x32xf32>
    %901 = arith.select %892, %894, %900 : vector<8x32xi1>, vector<8x32xf32>
    %cst_298 = arith.constant dense<0.000000e+00> : vector<8x32xf32>
    %902 = tpu.matmul %901, %21, %cst_298 {dimension_numbers = #tpu.dot_dimension_numbers<[1], [0], [0], [1], [0, 0, 1, 1], [], []>} : vector<8x32xf32>, vector<32x32xf32>, vector<8x32xf32> -> vector<8x32xf32>
    %903 = arith.addf %902, %24 : vector<8x32xf32>
    %cst_299 = arith.constant 0.000000e+00 : f32
    %904 = vector.broadcast %cst_299 : f32 to vector<8x32xf32>
    %905 = arith.maximumf %903, %904 : vector<8x32xf32>
    %906 = vector.broadcast %cst_299 : f32 to vector<8x32xf32>
    %907 = arith.subf %903, %906 : vector<8x32xf32>
    %908 = arith.cmpf one, %907, %907 : vector<8x32xf32>
    %909 = vector.broadcast %cst_299 : f32 to vector<8x32xf32>
    %910 = arith.addf %903, %909 : vector<8x32xf32>
    %911 = math.absf %907 : vector<8x32xf32>
    %cst_300 = arith.constant 0.000000e+00 : f32
    %912 = vector.broadcast %cst_300 : f32 to vector<8x32xf32>
    %913 = arith.subf %912, %911 : vector<8x32xf32>
    %914 = math.exp %913 : vector<8x32xf32>
    %915 = math.log1p %914 : vector<8x32xf32>
    %916 = arith.addf %905, %915 : vector<8x32xf32>
    %917 = arith.select %908, %910, %916 : vector<8x32xi1>, vector<8x32xf32>
    %cst_301 = arith.constant dense<0.000000e+00> : vector<8x4xf32>
    %918 = tpu.matmul %917, %25, %cst_301 {dimension_numbers = #tpu.dot_dimension_numbers<[1], [0], [0], [1], [0, 0, 1, 1], [], []>} : vector<8x32xf32>, vector<32x4xf32>, vector<8x4xf32> -> vector<8x4xf32>
    %919 = arith.addf %918, %28 : vector<8x4xf32>
    %cst_302 = arith.constant dense<0.000000e+00> : vector<8x4xf32>
    %920 = tpu.matmul %859, %29, %cst_302 {dimension_numbers = #tpu.dot_dimension_numbers<[1], [0], [0], [1], [0, 0, 1, 1], [], []>} : vector<8x4xf32>, vector<4x4xf32>, vector<8x4xf32> -> vector<8x4xf32>
    %921 = arith.addf %920, %32 : vector<8x4xf32>
    %cst_303 = arith.constant dense<0.000000e+00> : vector<8x128xf32>
    %922 = tpu.matmul %859, %33, %cst_303 {dimension_numbers = #tpu.dot_dimension_numbers<[1], [0], [0], [1], [0, 0, 1, 1], [], []>} : vector<8x4xf32>, vector<4x128xf32>, vector<8x128xf32> -> vector<8x128xf32>
    %923 = arith.addf %922, %36 : vector<8x128xf32>
    %cst_304 = arith.constant 0.000000e+00 : f32
    %924 = vector.broadcast %cst_304 : f32 to vector<8x128xf32>
    %925 = arith.maximumf %923, %924 : vector<8x128xf32>
    %926 = vector.broadcast %cst_304 : f32 to vector<8x128xf32>
    %927 = arith.subf %923, %926 : vector<8x128xf32>
    %928 = arith.cmpf one, %927, %927 : vector<8x128xf32>
    %929 = vector.broadcast %cst_304 : f32 to vector<8x128xf32>
    %930 = arith.addf %923, %929 : vector<8x128xf32>
    %931 = math.absf %927 : vector<8x128xf32>
    %cst_305 = arith.constant 0.000000e+00 : f32
    %932 = vector.broadcast %cst_305 : f32 to vector<8x128xf32>
    %933 = arith.subf %932, %931 : vector<8x128xf32>
    %934 = math.exp %933 : vector<8x128xf32>
    %935 = math.log1p %934 : vector<8x128xf32>
    %936 = arith.addf %925, %935 : vector<8x128xf32>
    %937 = arith.select %928, %930, %936 : vector<8x128xi1>, vector<8x128xf32>
    %cst_306 = arith.constant dense<0.000000e+00> : vector<8x4xf32>
    %938 = tpu.matmul %937, %37, %cst_306 {dimension_numbers = #tpu.dot_dimension_numbers<[1], [0], [0], [1], [0, 0, 1, 1], [], []>} : vector<8x128xf32>, vector<128x4xf32>, vector<8x4xf32> -> vector<8x4xf32>
    %939 = arith.addf %938, %40 : vector<8x4xf32>
    %940 = arith.negf %939 : vector<8x4xf32>
    %941 = math.exp %940 : vector<8x4xf32>
    %cst_307 = arith.constant 1.000000e+00 : f32
    %942 = vector.broadcast %cst_307 : f32 to vector<8x4xf32>
    %943 = arith.addf %942, %941 : vector<8x4xf32>
    %944 = arith.divf %942, %943 : vector<8x4xf32>
    %945 = math.absf %944 : vector<8x4xf32>
    %cst_308 = arith.constant 1.000000e-07 : f32
    %946 = vector.broadcast %cst_308 : f32 to vector<8x4xf32>
    %947 = arith.cmpf ogt, %945, %946 : vector<8x4xf32>
    %cst_309 = arith.constant 1.000000e-07 : f32
    %948 = vector.broadcast %cst_309 : f32 to vector<8x4xf32>
    %949 = arith.select %947, %944, %948 : vector<8x4xi1>, vector<8x4xf32>
    %950 = arith.subf %919, %921 : vector<8x4xf32>
    %951 = arith.divf %950, %949 : vector<8x4xf32>
    %952 = arith.mulf %951, %951 : vector<8x4xf32>
    %953 = vector.shape_cast %952 : vector<8x4xf32> to vector<1x8x4xf32>
    %cst_310 = arith.constant dense<0.000000e+00> : vector<1xf32>
    %954 = vector.multi_reduction <add>, %953, %cst_310 [1, 2] : vector<1x8x4xf32> to vector<1xf32>
    %955 = vector.shape_cast %954 : vector<1xf32> to vector<1x1x1xf32>
    %956 = vector.extract %955[0, 0, 0] : f32 from vector<1x1x1xf32>
    %cst_311 = arith.constant 5.000000e-03 : f32
    %957 = arith.mulf %cst_311, %956 : f32
    %958 = arith.addf %852, %957 : f32
    %cst_312 = arith.constant 0.00999999977 : f32
    %959 = vector.broadcast %cst_312 : f32 to vector<8x4xf32>
    %960 = arith.mulf %919, %959 : vector<8x4xf32>
    %961 = arith.addf %859, %960 : vector<8x4xf32>
    %c5_313 = arith.constant 5 : index
    %c0_314 = arith.constant 0 : index
    %c0_315 = arith.constant 0 : index
    %962 = vector.load %arg2[%c5_313, %c0_314, %c0_315] : memref<7x8x4xf32, #tpu.memory_space<vmem>>, vector<1x8x4xf32>
    %963 = vector.shape_cast %962 : vector<1x8x4xf32> to vector<8x4xf32>
    %964 = arith.mulf %944, %963 : vector<8x4xf32>
    %965 = arith.addf %961, %964 : vector<8x4xf32>
    %cst_316 = arith.constant dense<0.000000e+00> : vector<8x4xf32>
    %966 = tpu.matmul %965, %41, %cst_316 {dimension_numbers = #tpu.dot_dimension_numbers<[1], [0], [0], [1], [0, 0, 1, 1], [], []>} : vector<8x4xf32>, vector<4x4xf32>, vector<8x4xf32> -> vector<8x4xf32>
    %967 = arith.addf %966, %44 : vector<8x4xf32>
    %c6_317 = arith.constant 6 : index
    %c0_318 = arith.constant 0 : index
    %c0_319 = arith.constant 0 : index
    %968 = vector.load %arg0[%c6_317, %c0_318, %c0_319] : memref<8x8x4xf32, #tpu.memory_space<vmem>>, vector<1x8x4xf32>
    %969 = vector.shape_cast %968 : vector<1x8x4xf32> to vector<8x4xf32>
    %970 = arith.subf %969, %967 : vector<8x4xf32>
    %cst_320 = arith.constant 0.00999999977 : f32
    %971 = vector.broadcast %cst_320 : f32 to vector<8x4xf32>
    %972 = arith.divf %970, %971 : vector<8x4xf32>
    %973 = arith.mulf %972, %972 : vector<8x4xf32>
    %974 = vector.shape_cast %973 : vector<8x4xf32> to vector<1x8x4xf32>
    %cst_321 = arith.constant dense<0.000000e+00> : vector<1xf32>
    %975 = vector.multi_reduction <add>, %974, %cst_321 [1, 2] : vector<1x8x4xf32> to vector<1xf32>
    %976 = vector.shape_cast %975 : vector<1xf32> to vector<1x1x1xf32>
    %977 = vector.extract %976[0, 0, 0] : f32 from vector<1x1x1xf32>
    %cst_322 = arith.constant -5.000000e-01 : f32
    %978 = arith.mulf %cst_322, %977 : f32
    %cst_323 = arith.constant -117.959412 : f32
    %979 = arith.subf %978, %cst_323 : f32
    %980 = arith.mulf %967, %967 : vector<8x4xf32>
    %cst_324 = arith.constant dense<0.000000e+00> : vector<8xf32>
    %981 = vector.multi_reduction <add>, %980, %cst_324 [1] : vector<8x4xf32> to vector<8xf32>
    %982 = vector.shape_cast %981 : vector<8xf32> to vector<8x1xf32>
    %983 = math.sqrt %982 : vector<8x1xf32>
    %984 = vector.shape_cast %983 : vector<8x1xf32> to vector<1x8x1xf32>
    %cst_325 = arith.constant dense<0.000000e+00> : vector<1xf32>
    %985 = vector.multi_reduction <add>, %984, %cst_325 [1, 2] : vector<1x8x1xf32> to vector<1xf32>
    %986 = vector.shape_cast %985 : vector<1xf32> to vector<1x1x1xf32>
    %987 = vector.extract %986[0, 0, 0] : f32 from vector<1x1x1xf32>
    %988 = arith.addf %882, %979 : f32
    %989 = arith.addf %883, %987 : f32
    %cst_326 = arith.constant dense<0.000000e+00> : vector<8x32xf32>
    %990 = tpu.matmul %965, %16, %cst_326 {dimension_numbers = #tpu.dot_dimension_numbers<[1], [0], [0], [1], [0, 0, 1, 1], [], []>} : vector<8x4xf32>, vector<4x32xf32>, vector<8x32xf32> -> vector<8x32xf32>
    %cst_327 = arith.constant dense<0.000000e+00> : vector<8x32xf32>
    %991 = tpu.matmul %81, %17, %cst_327 {dimension_numbers = #tpu.dot_dimension_numbers<[1], [0], [0], [1], [0, 0, 1, 1], [], []>} : vector<8x16xf32>, vector<16x32xf32>, vector<8x32xf32> -> vector<8x32xf32>
    %992 = arith.addf %990, %991 : vector<8x32xf32>
    %993 = arith.addf %992, %20 : vector<8x32xf32>
    %cst_328 = arith.constant 0.000000e+00 : f32
    %994 = vector.broadcast %cst_328 : f32 to vector<8x32xf32>
    %995 = arith.maximumf %993, %994 : vector<8x32xf32>
    %996 = vector.broadcast %cst_328 : f32 to vector<8x32xf32>
    %997 = arith.subf %993, %996 : vector<8x32xf32>
    %998 = arith.cmpf one, %997, %997 : vector<8x32xf32>
    %999 = vector.broadcast %cst_328 : f32 to vector<8x32xf32>
    %1000 = arith.addf %993, %999 : vector<8x32xf32>
    %1001 = math.absf %997 : vector<8x32xf32>
    %cst_329 = arith.constant 0.000000e+00 : f32
    %1002 = vector.broadcast %cst_329 : f32 to vector<8x32xf32>
    %1003 = arith.subf %1002, %1001 : vector<8x32xf32>
    %1004 = math.exp %1003 : vector<8x32xf32>
    %1005 = math.log1p %1004 : vector<8x32xf32>
    %1006 = arith.addf %995, %1005 : vector<8x32xf32>
    %1007 = arith.select %998, %1000, %1006 : vector<8x32xi1>, vector<8x32xf32>
    %cst_330 = arith.constant dense<0.000000e+00> : vector<8x32xf32>
    %1008 = tpu.matmul %1007, %21, %cst_330 {dimension_numbers = #tpu.dot_dimension_numbers<[1], [0], [0], [1], [0, 0, 1, 1], [], []>} : vector<8x32xf32>, vector<32x32xf32>, vector<8x32xf32> -> vector<8x32xf32>
    %1009 = arith.addf %1008, %24 : vector<8x32xf32>
    %cst_331 = arith.constant 0.000000e+00 : f32
    %1010 = vector.broadcast %cst_331 : f32 to vector<8x32xf32>
    %1011 = arith.maximumf %1009, %1010 : vector<8x32xf32>
    %1012 = vector.broadcast %cst_331 : f32 to vector<8x32xf32>
    %1013 = arith.subf %1009, %1012 : vector<8x32xf32>
    %1014 = arith.cmpf one, %1013, %1013 : vector<8x32xf32>
    %1015 = vector.broadcast %cst_331 : f32 to vector<8x32xf32>
    %1016 = arith.addf %1009, %1015 : vector<8x32xf32>
    %1017 = math.absf %1013 : vector<8x32xf32>
    %cst_332 = arith.constant 0.000000e+00 : f32
    %1018 = vector.broadcast %cst_332 : f32 to vector<8x32xf32>
    %1019 = arith.subf %1018, %1017 : vector<8x32xf32>
    %1020 = math.exp %1019 : vector<8x32xf32>
    %1021 = math.log1p %1020 : vector<8x32xf32>
    %1022 = arith.addf %1011, %1021 : vector<8x32xf32>
    %1023 = arith.select %1014, %1016, %1022 : vector<8x32xi1>, vector<8x32xf32>
    %cst_333 = arith.constant dense<0.000000e+00> : vector<8x4xf32>
    %1024 = tpu.matmul %1023, %25, %cst_333 {dimension_numbers = #tpu.dot_dimension_numbers<[1], [0], [0], [1], [0, 0, 1, 1], [], []>} : vector<8x32xf32>, vector<32x4xf32>, vector<8x4xf32> -> vector<8x4xf32>
    %1025 = arith.addf %1024, %28 : vector<8x4xf32>
    %cst_334 = arith.constant dense<0.000000e+00> : vector<8x4xf32>
    %1026 = tpu.matmul %965, %29, %cst_334 {dimension_numbers = #tpu.dot_dimension_numbers<[1], [0], [0], [1], [0, 0, 1, 1], [], []>} : vector<8x4xf32>, vector<4x4xf32>, vector<8x4xf32> -> vector<8x4xf32>
    %1027 = arith.addf %1026, %32 : vector<8x4xf32>
    %cst_335 = arith.constant dense<0.000000e+00> : vector<8x128xf32>
    %1028 = tpu.matmul %965, %33, %cst_335 {dimension_numbers = #tpu.dot_dimension_numbers<[1], [0], [0], [1], [0, 0, 1, 1], [], []>} : vector<8x4xf32>, vector<4x128xf32>, vector<8x128xf32> -> vector<8x128xf32>
    %1029 = arith.addf %1028, %36 : vector<8x128xf32>
    %cst_336 = arith.constant 0.000000e+00 : f32
    %1030 = vector.broadcast %cst_336 : f32 to vector<8x128xf32>
    %1031 = arith.maximumf %1029, %1030 : vector<8x128xf32>
    %1032 = vector.broadcast %cst_336 : f32 to vector<8x128xf32>
    %1033 = arith.subf %1029, %1032 : vector<8x128xf32>
    %1034 = arith.cmpf one, %1033, %1033 : vector<8x128xf32>
    %1035 = vector.broadcast %cst_336 : f32 to vector<8x128xf32>
    %1036 = arith.addf %1029, %1035 : vector<8x128xf32>
    %1037 = math.absf %1033 : vector<8x128xf32>
    %cst_337 = arith.constant 0.000000e+00 : f32
    %1038 = vector.broadcast %cst_337 : f32 to vector<8x128xf32>
    %1039 = arith.subf %1038, %1037 : vector<8x128xf32>
    %1040 = math.exp %1039 : vector<8x128xf32>
    %1041 = math.log1p %1040 : vector<8x128xf32>
    %1042 = arith.addf %1031, %1041 : vector<8x128xf32>
    %1043 = arith.select %1034, %1036, %1042 : vector<8x128xi1>, vector<8x128xf32>
    %cst_338 = arith.constant dense<0.000000e+00> : vector<8x4xf32>
    %1044 = tpu.matmul %1043, %37, %cst_338 {dimension_numbers = #tpu.dot_dimension_numbers<[1], [0], [0], [1], [0, 0, 1, 1], [], []>} : vector<8x128xf32>, vector<128x4xf32>, vector<8x4xf32> -> vector<8x4xf32>
    %1045 = arith.addf %1044, %40 : vector<8x4xf32>
    %1046 = arith.negf %1045 : vector<8x4xf32>
    %1047 = math.exp %1046 : vector<8x4xf32>
    %cst_339 = arith.constant 1.000000e+00 : f32
    %1048 = vector.broadcast %cst_339 : f32 to vector<8x4xf32>
    %1049 = arith.addf %1048, %1047 : vector<8x4xf32>
    %1050 = arith.divf %1048, %1049 : vector<8x4xf32>
    %1051 = math.absf %1050 : vector<8x4xf32>
    %cst_340 = arith.constant 1.000000e-07 : f32
    %1052 = vector.broadcast %cst_340 : f32 to vector<8x4xf32>
    %1053 = arith.cmpf ogt, %1051, %1052 : vector<8x4xf32>
    %cst_341 = arith.constant 1.000000e-07 : f32
    %1054 = vector.broadcast %cst_341 : f32 to vector<8x4xf32>
    %1055 = arith.select %1053, %1050, %1054 : vector<8x4xi1>, vector<8x4xf32>
    %1056 = arith.subf %1025, %1027 : vector<8x4xf32>
    %1057 = arith.divf %1056, %1055 : vector<8x4xf32>
    %1058 = arith.mulf %1057, %1057 : vector<8x4xf32>
    %1059 = vector.shape_cast %1058 : vector<8x4xf32> to vector<1x8x4xf32>
    %cst_342 = arith.constant dense<0.000000e+00> : vector<1xf32>
    %1060 = vector.multi_reduction <add>, %1059, %cst_342 [1, 2] : vector<1x8x4xf32> to vector<1xf32>
    %1061 = vector.shape_cast %1060 : vector<1xf32> to vector<1x1x1xf32>
    %1062 = vector.extract %1061[0, 0, 0] : f32 from vector<1x1x1xf32>
    %cst_343 = arith.constant 5.000000e-03 : f32
    %1063 = arith.mulf %cst_343, %1062 : f32
    %1064 = arith.addf %958, %1063 : f32
    %cst_344 = arith.constant 0.00999999977 : f32
    %1065 = vector.broadcast %cst_344 : f32 to vector<8x4xf32>
    %1066 = arith.mulf %1025, %1065 : vector<8x4xf32>
    %1067 = arith.addf %965, %1066 : vector<8x4xf32>
    %c6_345 = arith.constant 6 : index
    %c0_346 = arith.constant 0 : index
    %c0_347 = arith.constant 0 : index
    %1068 = vector.load %arg2[%c6_345, %c0_346, %c0_347] : memref<7x8x4xf32, #tpu.memory_space<vmem>>, vector<1x8x4xf32>
    %1069 = vector.shape_cast %1068 : vector<1x8x4xf32> to vector<8x4xf32>
    %1070 = arith.mulf %1050, %1069 : vector<8x4xf32>
    %1071 = arith.addf %1067, %1070 : vector<8x4xf32>
    %cst_348 = arith.constant dense<0.000000e+00> : vector<8x4xf32>
    %1072 = tpu.matmul %1071, %41, %cst_348 {dimension_numbers = #tpu.dot_dimension_numbers<[1], [0], [0], [1], [0, 0, 1, 1], [], []>} : vector<8x4xf32>, vector<4x4xf32>, vector<8x4xf32> -> vector<8x4xf32>
    %1073 = arith.addf %1072, %44 : vector<8x4xf32>
    %c7_349 = arith.constant 7 : index
    %c0_350 = arith.constant 0 : index
    %c0_351 = arith.constant 0 : index
    %1074 = vector.load %arg0[%c7_349, %c0_350, %c0_351] : memref<8x8x4xf32, #tpu.memory_space<vmem>>, vector<1x8x4xf32>
    %1075 = vector.shape_cast %1074 : vector<1x8x4xf32> to vector<8x4xf32>
    %1076 = arith.subf %1075, %1073 : vector<8x4xf32>
    %cst_352 = arith.constant 0.00999999977 : f32
    %1077 = vector.broadcast %cst_352 : f32 to vector<8x4xf32>
    %1078 = arith.divf %1076, %1077 : vector<8x4xf32>
    %1079 = arith.mulf %1078, %1078 : vector<8x4xf32>
    %1080 = vector.shape_cast %1079 : vector<8x4xf32> to vector<1x8x4xf32>
    %cst_353 = arith.constant dense<0.000000e+00> : vector<1xf32>
    %1081 = vector.multi_reduction <add>, %1080, %cst_353 [1, 2] : vector<1x8x4xf32> to vector<1xf32>
    %1082 = vector.shape_cast %1081 : vector<1xf32> to vector<1x1x1xf32>
    %1083 = vector.extract %1082[0, 0, 0] : f32 from vector<1x1x1xf32>
    %cst_354 = arith.constant -5.000000e-01 : f32
    %1084 = arith.mulf %cst_354, %1083 : f32
    %cst_355 = arith.constant -117.959412 : f32
    %1085 = arith.subf %1084, %cst_355 : f32
    %1086 = arith.mulf %1073, %1073 : vector<8x4xf32>
    %cst_356 = arith.constant dense<0.000000e+00> : vector<8xf32>
    %1087 = vector.multi_reduction <add>, %1086, %cst_356 [1] : vector<8x4xf32> to vector<8xf32>
    %1088 = vector.shape_cast %1087 : vector<8xf32> to vector<8x1xf32>
    %1089 = math.sqrt %1088 : vector<8x1xf32>
    %1090 = vector.shape_cast %1089 : vector<8x1xf32> to vector<1x8x1xf32>
    %cst_357 = arith.constant dense<0.000000e+00> : vector<1xf32>
    %1091 = vector.multi_reduction <add>, %1090, %cst_357 [1, 2] : vector<1x8x1xf32> to vector<1xf32>
    %1092 = vector.shape_cast %1091 : vector<1xf32> to vector<1x1x1xf32>
    %1093 = vector.extract %1092[0, 0, 0] : f32 from vector<1x1x1xf32>
    %1094 = arith.addf %988, %1085 : f32
    %1095 = arith.addf %989, %1093 : f32
    %1096 = math.exp %46 : vector<1x4xf32>
    %1097 = math.exp %325 : vector<8x4xf32>
    %1098 = vector.broadcast %1096 : vector<1x4xf32> to vector<8x4xf32>
    %1099 = arith.divf %1097, %1098 : vector<8x4xf32>
    %1100 = arith.mulf %1099, %1099 : vector<8x4xf32>
    %1101 = vector.broadcast %45 : vector<1x4xf32> to vector<8x4xf32>
    %1102 = arith.subf %322, %1101 : vector<8x4xf32>
    %1103 = vector.broadcast %1096 : vector<1x4xf32> to vector<8x4xf32>
    %1104 = arith.divf %1102, %1103 : vector<8x4xf32>
    %1105 = arith.mulf %1104, %1104 : vector<8x4xf32>
    %1106 = arith.addf %1100, %1105 : vector<8x4xf32>
    %cst_358 = arith.constant 1.000000e+00 : f32
    %1107 = vector.broadcast %cst_358 : f32 to vector<8x4xf32>
    %1108 = arith.subf %1106, %1107 : vector<8x4xf32>
    %1109 = math.log %1100 : vector<8x4xf32>
    %1110 = arith.subf %1108, %1109 : vector<8x4xf32>
    %cst_359 = arith.constant 5.000000e-01 : f32
    %1111 = vector.broadcast %cst_359 : f32 to vector<8x4xf32>
    %1112 = arith.mulf %1111, %1110 : vector<8x4xf32>
    %1113 = vector.shape_cast %1112 : vector<8x4xf32> to vector<1x8x4xf32>
    %cst_360 = arith.constant dense<0.000000e+00> : vector<1xf32>
    %1114 = vector.multi_reduction <add>, %1113, %cst_360 [1, 2] : vector<1x8x4xf32> to vector<1xf32>
    %1115 = vector.shape_cast %1114 : vector<1xf32> to vector<1x1x1xf32>
    %1116 = vector.extract %1115[0, 0, 0] : f32 from vector<1x1x1xf32>
    %cst_361 = arith.constant 1.250000e-01 : f32
    %1117 = arith.mulf %1094, %cst_361 : f32
    %c0_362 = arith.constant 0 : index
    %c0_363 = arith.constant 0 : index
    %1118 = memref.load %arg30[%c0_362, %c0_363] : memref<1x1xf32, #tpu.memory_space<smem>>
    memref.store %1117, %arg30[%c0_362, %c0_363] : memref<1x1xf32, #tpu.memory_space<smem>>
    %cst_364 = arith.constant 3.500000e+01 : f32
    %1119 = arith.mulf %cst_364, %1064 : f32
    %1120 = arith.addf %1116, %1119 : f32
    %cst_365 = arith.constant 1.250000e-01 : f32
    %1121 = arith.mulf %1120, %cst_365 : f32
    %c0_366 = arith.constant 0 : index
    %c0_367 = arith.constant 0 : index
    %1122 = memref.load %arg31[%c0_366, %c0_367] : memref<1x1xf32, #tpu.memory_space<smem>>
    memref.store %1121, %arg31[%c0_366, %c0_367] : memref<1x1xf32, #tpu.memory_space<smem>>
    %cst_368 = arith.constant 1.250000e-01 : f32
    %1123 = arith.mulf %1095, %cst_368 : f32
    %c0_369 = arith.constant 0 : index
    %c0_370 = arith.constant 0 : index
    %1124 = memref.load %arg32[%c0_369, %c0_370] : memref<1x1xf32, #tpu.memory_space<smem>>
    memref.store %1123, %arg32[%c0_369, %c0_370] : memref<1x1xf32, #tpu.memory_space<smem>>
    return
  }
}

</mosaic_0001>

<bundles_post_ra>
// kernel: tpu_custom_call.1
= control target key start
LH: loop header
LB: loop body
LE: loop exit
PB: predicated region body
PF: predicated region fallthrough
CT: control target
= control target key end

     0   :  { %s9257_s6 = smov 1   ;;  %s9258_s10 = smov 2   ;;  %s10996_s0 = inlined_call_operand.smem [shape: u32[33], index: -1, kind: input, shape index: {}] }
   0x1   :  { %s9304_s5 = sld [smem:[%s10996_s0]]   ;;  %s9259_s14 = smov 3  }
   0x2   :  { %s9309_s9 = sld [smem:[%s10996_s0 + %s9257_s6]]   ;;  %s9260_s18 = smov 4  }
   0x3   :  { %s9314_s13 = sld [smem:[%s10996_s0 + %s9258_s10]]   ;;  %s9261_s22 = smov 5  }
   0x4   :  { %s9319_s17 = sld [smem:[%s10996_s0 + %s9259_s14]]   ;;  %s9262_s26 = smov 6  }
   0x5   :  { %s9324_s21 = sld [smem:[%s10996_s0 + %s9260_s18]]   ;;  %s9263_s30 = smov 7  }
   0x6   :  { %s9329_s25 = sld [smem:[%s10996_s0 + %s9261_s22]]   ;;  %s9264_s4 = smov 8  }
   0x7   :  { %s9334_s29 = sld [smem:[%s10996_s0 + %s9262_s26]]   ;;  %s9265_s10 = smov 9  }
   0x8   :  { %11017 = sst [smem:[#allocation9_spill]] %s9309_s9  ;;  %s9266_s15 = smov 10  }
   0x9   :  { %11018 = sst [smem:[#allocation10_spill]] %s9314_s13  ;;  %s9267_s20 = smov 11  }
   0xa   :  { %s9339_s3 = sld [smem:[%s10996_s0 + %s9263_s30]]   ;;  %s9268_s26 = smov 12  }
   0xb   :  { %s9344_s8 = sld [smem:[%s10996_s0 + %s9264_s4]]   ;;  %s9269_s1 = smov 13  }
   0xc   :  { %s9349_s14 = sld [smem:[%s10996_s0 + %s9265_s10]]   ;;  %s9270_s7 = smov 14  }
   0xd   :  { %s9354_s19 = sld [smem:[%s10996_s0 + %s9266_s15]]   ;;  %s9271_s15 = smov 15  }
   0xe   :  { %s9359_s24 = sld [smem:[%s10996_s0 + %s9267_s20]]   ;;  %s9272_s22 = smov 16  }
   0xf   :  { %s9364_s30 = sld [smem:[%s10996_s0 + %s9268_s26]]   ;;  %s9273_s28 = smov 17  }
  0x10   :  { %s9369_s6 = sld [smem:[%s10996_s0 + %s9269_s1]]  }
  0x11   :  { %s9374_s12 = sld [smem:[%s10996_s0 + %s9270_s7]]   ;;  %s9274_s7 = smov 18  }
  0x12   :  { %s9379_s20 = sld [smem:[%s10996_s0 + %s9271_s15]]   ;;  %s9275_s15 = smov 19  }
  0x13   :  { %s9384_s27 = sld [smem:[%s10996_s0 + %s9272_s22]]   ;;  %s9276_s22 = smov 20  }
  0x14   :  { %s9389_s4 = sld [smem:[%s10996_s0 + %s9273_s28]]   ;;  %s9277_s28 = smov 21  }
  0x15   :  { %s9394_s13 = sld [smem:[%s10996_s0 + %s9274_s7]]   ;;  %s9278_s7 = smov 22  }
  0x16   :  { %11019 = sst [smem:[#allocation11_spill]] %s9369_s6 }
  0x18   :  { %11020 = sst [smem:[#allocation12_spill]] %s9379_s20 }
  0x19   :  { %11021 = sst [smem:[#allocation13_spill]] %s9384_s27 }
  0x1a   :  { %11022 = sst [smem:[#allocation14_spill]] %s9389_s4 }
  0x1b   :  { %11023 = sst [smem:[#allocation15_spill]] %s9394_s13 }
  0x1c   :  { %s9399_s20 = sld [smem:[%s10996_s0 + %s9275_s15]]   ;;  %s9279_s15 = smov 23  }
  0x1d   :  { %s9404_s27 = sld [smem:[%s10996_s0 + %s9276_s22]]   ;;  %s9280_s22 = smov 24  }
  0x1e   :  { %s9409_s4 = sld [smem:[%s10996_s0 + %s9277_s28]]   ;;  %s9281_s28 = smov 25  }
  0x1f   :  { %s9414_s13 = sld [smem:[%s10996_s0 + %s9278_s7]]   ;;  %s9282_s7 = smov 26  }
  0x22   :  { %11024 = sst [smem:[#allocation16_spill]] %s9399_s20 }
  0x23   :  { %11025 = sst [smem:[#allocation17_spill]] %s9404_s27 }
  0x24   :  { %11026 = sst [smem:[#allocation18_spill]] %s9409_s4 }
  0x25   :  { %11027 = sst [smem:[#allocation19_spill]] %s9414_s13 }
  0x26   :  { %s9419_s20 = sld [smem:[%s10996_s0 + %s9279_s15]]   ;;  %s9283_s15 = smov 27  }
  0x27   :  { %s9424_s27 = sld [smem:[%s10996_s0 + %s9280_s22]]   ;;  %s9284_s22 = smov 28  }
  0x28   :  { %s9429_s4 = sld [smem:[%s10996_s0 + %s9281_s28]]   ;;  %s9285_s28 = smov 29  }
  0x29   :  { %s9434_s13 = sld [smem:[%s10996_s0 + %s9282_s7]]   ;;  %s9286_s7 = smov 30  }
  0x2a   :  { %s9454_s6 = sld [smem:[%s10996_s0 + %s9286_s7]]  }
  0x2c   :  { %11028 = sst [smem:[#allocation20_spill]] %s9419_s20 }
  0x2d   :  { %11029 = sst [smem:[#allocation21_spill]] %s9424_s27 }
  0x2e   :  { %11030 = sst [smem:[#allocation22_spill]] %s9429_s4 }
  0x2f   :  { %s9439_s20 = sld [smem:[%s10996_s0 + %s9283_s15]]   ;;  %s9287_s15 = smov 31  }
  0x30   :  { %s9444_s27 = sld [smem:[%s10996_s0 + %s9284_s22]]   ;;  %s9288_s22 = smov 32  }
  0x31   :  { %s9449_s4 = sld [smem:[%s10996_s0 + %s9285_s28]]  }
  0x32   :  { %s9464_s9 = sld [smem:[%s10996_s0 + %s9288_s22]]  }
  0x35   :  { %11031 = sst [smem:[#allocation23_spill]] %s9439_s20 }
  0x36   :  { %s9459_s20 = sld [smem:[%s10996_s0 + %s9287_s15]]  }
  0x37   :  { %71 = vsyncpa [#allocation3], 0  ;;  %v9467_v0 = vld [vmem:[%s9319_s17] sm:$0xf]  ;;  %vm255_vm0 = vcmask 1043456   ;;  %v7517_v1 = vld [vmem:[%s9304_s5 + $0x38] sm:$0xff] }
  0x38   :  { %v11011_v2 = vmov 0.0   ;;  %vm9290_vm1 = vmmov 0   ;;  %vm251_vm2 = vcmask 31744   ;;  %v9474_v3 = vld [vmem:[%s9324_s21 + $0x18] sm:$0xff]  ;;  %v7508_v4 = vld [vmem:[%s9334_s29] ss:$0 sm:$0xff] }
  0x39   :  { %8039 = vmatprep.subr.mxu0 %v11011_v2  ;;  %8041 = vmatprep.mubr.msk.f32.mxu0 %vm9290_vm1, %v11011_v2  ;;  %v9483_v5 = vld [vmem:[%s9324_s21 + $0x10] sm:$0xff] }
  0x3a   :  { %8040 = vmatpush3.msk.msra.mxu0 %vm255_vm0, %v9467_v0  ;;  %8066 = vmatprep.subr.mxu1 %v11011_v2 }
  0x3b   :  { %8042 = vmatmul.mubr.msk.f32.vlgmr.msra.gmra.mxu0 %vm251_vm2, %v7517_v1  ;;  %8044 = vmatprep.subr.mxu0 %v11011_v2 }
  0x3c   :  { %72 = vsyncpa [#allocation5], 0  ;;  %8045 = vmatpush3.msra.mxu0 %v9474_v3  ;;  %8052 = vmatprep.mubr.msk.f32.mxu0 %vm9290_vm1, %v11011_v2  ;;  %v9490_v6 = vld [vmem:[%s9324_s21 + $0x8] sm:$0xff]  ;;  %s9291_s0 = smov 64   ;;  %v9498_v7 = vld [vmem:[%s9324_s21] sm:$0xff]  ;;  %s9292_s17 = smov 96  }
  0x3d   :  { %8046 = vmatprep.subr.mxu0 %v11011_v2  ;;  %410 = vrot.lane.b32.xlu0 %v7508_v4, %s9291_s0  ;;  %v9515_v14 = vld [vmem:[%s9329_s25] ss:$0 sm:$0xff]  ;;  %v9520_v25 = vld [vmem:[%s9339_s3 + $0x18] sm:$0xff]  ;;  %v9523_v26 = vld [vmem:[%s9339_s3 + $0x10] sm:$0xff]  ;;  %vm329_vm3 = vcmask 261120   ;;  %vm2242_vm4 = vcmask 130048  }
  0x3e   :  { %8047 = vmatpush3.msra.mxu0 %v9483_v5  ;;  %8067 = vmatpush3.msk.msra.mxu1 %vm255_vm0, %v9467_v0  ;;  %v9528_v27 = vld [vmem:[%s9339_s3 + $0x8] sm:$0xff]  ;;  %v9533_v28 = vld [vmem:[%s9339_s3] sm:$0xff]  ;;  %v7522_v30 = vld [vmem:[%s9304_s5 + $0x30] sm:$0xff]  ;;  %s11032_s21 = sld [smem:[#allocation9_spill]] }
  0x3f   :  { %8048 = vmatprep.subr.mxu0 %v11011_v2  ;;  %8068 = vmatprep.mubr.msk.f32.mxu1 %vm9290_vm1, %v11011_v2  ;;  %v7528_v55 = vld [vmem:[%s9304_s5 + $0x28] sm:$0xff]  ;;  %s11033_s25 = sld [smem:[#allocation11_spill]] }
  0x40   :  { %8049 = vmatpush3.msra.mxu0 %v9490_v6  ;;  %8082 = vmatprep.subr.mxu1 %v11011_v2  ;;  %s11034_s29 = sld [smem:[#allocation13_spill]] }
  0x41   :  { %8050 = vmatprep.subr.mxu0 %v11011_v2  ;;  %8069 = vmatmul.mubr.msk.f32.vlgmr.msra.gmra.mxu1 %vm251_vm2, %v7522_v30  ;;  %s11035_s3 = sld [smem:[#allocation23_spill]] }
  0x42   :  { %8051 = vmatpush3.msra.mxu0 %v9498_v7  ;;  %8083 = vmatpush3.msra.mxu1 %v9520_v25  ;;  %s11045_s28 = sld [smem:[#allocation18_spill]] }
  0x43   :  { %8053 = vmatmul.mubr.f32.vlgmr.msra.gmra.mxu0 %v11011_v2  ;;  %8055 = vmatprep.subr.mxu0 %v11011_v2  ;;  %s11046_s1 = sld [smem:[#allocation16_spill]] }
  0x44   :  { %8063 = vmatprep.mubr.msk.f32.mxu0 %vm9290_vm1, %v11011_v2  ;;  %8056 = vmatpush3.msra.mxu0 %v9520_v25  ;;  %s11047_s2 = sld [smem:[#allocation20_spill]] }
  0x45   :  { %8057 = vmatprep.subr.mxu0 %v11011_v2  ;;  %8090 = vmatprep.mubr.msk.f32.mxu1 %vm9290_vm1, %v11011_v2  ;;  %s11048_s7 = sld [smem:[#allocation22_spill]] }
  0x46   :  { %8058 = vmatpush3.msra.mxu0 %v9523_v26  ;;  %8084 = vmatprep.subr.mxu1 %v11011_v2  ;;  %s11049_s10 = sld [smem:[#allocation10_spill]] }
  0x47   :  { %8059 = vmatprep.subr.mxu0 %v11011_v2  ;;  %8085 = vmatpush3.msra.mxu1 %v9523_v26 }
  0x48   :  { %8060 = vmatpush3.msra.mxu0 %v9528_v27  ;;  %8086 = vmatprep.subr.mxu1 %v11011_v2 }
  0x49   :  { %8061 = vmatprep.subr.mxu0 %v11011_v2  ;;  %8087 = vmatpush3.msra.mxu1 %v9528_v27 }
  0x4a   :  { %8062 = vmatpush3.msra.mxu0 %v9533_v28  ;;  %8088 = vmatprep.subr.mxu1 %v11011_v2 }
  0x4b   :  { %8071 = vmatprep.subr.mxu0 %v11011_v2  ;;  %8089 = vmatpush3.msra.mxu1 %v9533_v28 }
  0x4c   :  { %8098 = vmatprep.subr.mxu1 %v11011_v2 }
  0xaf   :  { %v9510_v10 = vpop.permute.xlu0 %410 }
  0xfb   :  { %v325_v8 = vpop.f32.mrf.mxu0 }
  0xfc   :  { %v326_v15 = vadd.f32 %v9515_v14, %v325_v8 }
  0xfd   :  { %v8043_v9 = vpop.f32.mrf.mxu0 }
 0x101   :  { %v579_v37 = vpop.f32.mrf.mxu1 }
 0x102   :  { %v580_v44 = vadd.f32 %v9515_v14, %v579_v37 }
 0x103   :  { %v399_v11 = vpop.f32.mrf.mxu0  ;;  %v8070_v38 = vpop.f32.mrf.mxu1 }
 0x104   :  { %v413_v12 = vadd.f32 %v9510_v10, %v399_v11  ;;  %v403_v16 = vadd.f32 %v399_v11, %v326_v15 }
 0x105   :  { %v8054_v13 = vpop.f32.mrf.mxu0 }
 0x106   :  { %415 = vrot.lane.b32.xlu0 %v413_v12, %s9291_s0  ;;  %v7520_v17 = vmul.f32 -1.442695, %v403_v16 }
 0x108   :  { %8949 = vpow2.f32 %v7520_v17 }
 0x115   :  { %v8950_v18 = vpop.eup %8949 }
 0x116   :  { %v407_v19 = vadd.f32 1.0, %v8950_v18 }
 0x118   :  { %8951 = vrcp.f32 %v407_v19 }
 0x125   :  { %v8952_v20 = vpop.eup %8951 }
 0x126   :  { %v425_v31 = vsub.f32 1.0, %v8952_v20  ;;  %v431_v33 = vmul.f32 0.0, %v8952_v20 }
 0x178   :  { %v416_v21 = vpop.permute.xlu0 %415 }
 0x179   :  { %v418_v22 = vmul.f32 %v8952_v20, %v416_v21 }
 0x17b   :  { %420 = vrot.lane.b32.xlu1 %v418_v22, %s9291_s0 }
 0x1ed   :  { %v421_v23 = vpop.permute.xlu1 %420 }
 0x1ee   :  { %v423_v24 = vadd.f32 %v421_v23, %v326_v15 }
 0x1f0   :  { %8953 = vtanh.f32 %v423_v24 }
 0x1fd   :  { %v8954_v29 = vpop.eup %8953 }
 0x1fe   :  { %427 = vrot.lane.b32.xlu1 %v8954_v29, %s9292_s17 }
 0x270   :  { %v428_v32 = vpop.permute.xlu1 %427 }
 0x271   :  { %v430_v34 = vmul.f32 %v428_v32, %v425_v31 }
 0x273   :  { %v432_v35 = vadd.f32 %v431_v33, %v430_v34  ;;  %v7534_v34 = vld [vmem:[%s9304_s5 + $0x20] sm:$0xff] }
 0x275   :  { %434 = vrot.lane.b32.xlu0 %v432_v35, %s9292_s17 }
 0x2e7   :  { %v435_v36 = vpop.permute.xlu0 %434 }
 0x2e8   :  { %8064 = vmatmul.mubr.msk.f32.vlgmr.msra.gmra.mxu0 %vm329_vm3, %v435_v36 }
 0x2e9   :  { %8072 = vmatpush3.msra.mxu0 %v9474_v3  ;;  %8079 = vmatprep.mubr.msk.f32.mxu0 %vm9290_vm1, %v11011_v2 }
 0x2ea   :  { %8073 = vmatprep.subr.mxu0 %v11011_v2 }
 0x2eb   :  { %8074 = vmatpush3.msra.mxu0 %v9483_v5 }
 0x2ec   :  { %8075 = vmatprep.subr.mxu0 %v11011_v2 }
 0x2ed   :  { %8076 = vmatpush3.msra.mxu0 %v9490_v6 }
 0x2ee   :  { %8077 = vmatprep.subr.mxu0 %v11011_v2 }
 0x2ef   :  { %8078 = vmatpush3.msra.mxu0 %v9498_v7 }
 0x2f0   :  { %8080 = vmatmul.mubr.msk.f32.vlgmr.msra.gmra.mxu0 %vm329_vm3, %v435_v36  ;;  %8093 = vmatprep.subr.mxu0 %v11011_v2 }
 0x2f1   :  { %8094 = vmatpush3.msk.msra.mxu0 %vm255_vm0, %v9467_v0  ;;  %8095 = vmatprep.mubr.msk.f32.mxu0 %vm9290_vm1, %v11011_v2 }
 0x2f2   :  { %8109 = vmatprep.subr.mxu0 %v11011_v2 }
 0x2f4   :  { %8096 = vmatmul.mubr.msk.f32.vlgmr.msra.gmra.mxu0 %vm251_vm2, %v7528_v55 }
 0x2f5   :  { %8110 = vmatpush3.msra.mxu0 %v9520_v25  ;;  %8117 = vmatprep.mubr.msk.f32.mxu0 %vm9290_vm1, %v11011_v2 }
 0x2f6   :  { %8111 = vmatprep.subr.mxu0 %v11011_v2 }
 0x2f7   :  { %8112 = vmatpush3.msra.mxu0 %v9523_v26 }
 0x2f8   :  { %8113 = vmatprep.subr.mxu0 %v11011_v2 }
 0x2f9   :  { %8114 = vmatpush3.msra.mxu0 %v9528_v27 }
 0x2fa   :  { %8115 = vmatprep.subr.mxu0 %v11011_v2 }
 0x2fb   :  { %8116 = vmatpush3.msra.mxu0 %v9533_v28 }
 0x2fc   :  { %8120 = vmatprep.subr.mxu0 %v11011_v2 }
 0x3a8   :  { %v9570_v39 = vpop.f32.mrf.mxu0 }
 0x3aa   :  { %v8065_v40 = vpop.f32.mrf.mxu0 }
 0x3b0   :  { %v649_v41 = vpop.f32.mrf.mxu0 }
 0x3b1   :  { %v660_v42 = vadd.f32 %v649_v41, %v9510_v10  ;;  %v653_v45 = vadd.f32 %v649_v41, %v580_v44 }
 0x3b2   :  { %v8081_v43 = vpop.f32.mrf.mxu0 }
 0x3b3   :  { %662 = vrot.lane.b32.xlu1 %v660_v42, %s9291_s0  ;;  %v7526_v46 = vmul.f32 -1.442695, %v653_v45 }
 0x3b4   :  { %v826_v62 = vpop.f32.mrf.mxu0 }
 0x3b5   :  { %8955 = vpow2.f32 %v7526_v46  ;;  %v827_v12 = vadd.f32 %v9515_v14, %v826_v62 }
 0x3b6   :  { %v8097_v63 = vpop.f32.mrf.mxu0 }
 0x3c2   :  { %v8956_v47 = vpop.eup %8955 }
 0x3c3   :  { %v657_v48 = vadd.f32 1.0, %v8956_v47 }
 0x3c5   :  { %8957 = vrcp.f32 %v657_v48 }
 0x3d2   :  { %v8958_v49 = vpop.eup %8957 }
 0x3d3   :  { %v672_v56 = vsub.f32 1.0, %v8958_v49  ;;  %v678_v58 = vmul.f32 %v8958_v49, %v432_v35 }
 0x425   :  { %v663_v50 = vpop.permute.xlu1 %662 }
 0x426   :  { %v665_v51 = vmul.f32 %v8958_v49, %v663_v50 }
 0x428   :  { %667 = vrot.lane.b32.xlu0 %v665_v51, %s9291_s0 }
 0x49a   :  { %v668_v52 = vpop.permute.xlu0 %667 }
 0x49b   :  { %v670_v53 = vadd.f32 %v668_v52, %v580_v44 }
 0x49d   :  { %8959 = vtanh.f32 %v670_v53 }
 0x4aa   :  { %v8960_v54 = vpop.eup %8959 }
 0x4ab   :  { %674 = vrot.lane.b32.xlu1 %v8960_v54, %s9292_s17  ;;  %v7540_v54 = vld [vmem:[%s9304_s5 + $0x18] sm:$0xff] }
 0x51d   :  { %v675_v57 = vpop.permute.xlu1 %674 }
 0x51e   :  { %v677_v59 = vmul.f32 %v675_v57, %v672_v56 }
 0x520   :  { %v679_v60 = vadd.f32 %v678_v58, %v677_v59 }
 0x522   :  { %681 = vrot.lane.b32.xlu0 %v679_v60, %s9292_s17 }
 0x594   :  { %v682_v61 = vpop.permute.xlu0 %681 }
 0x595   :  { %8091 = vmatmul.mubr.msk.f32.vlgmr.msra.gmra.mxu1 %vm329_vm3, %v682_v61 }
 0x596   :  { %8099 = vmatpush3.msra.mxu1 %v9474_v3  ;;  %8106 = vmatprep.mubr.msk.f32.mxu1 %vm9290_vm1, %v11011_v2 }
 0x597   :  { %8100 = vmatprep.subr.mxu1 %v11011_v2 }
 0x598   :  { %8101 = vmatpush3.msra.mxu1 %v9483_v5 }
 0x599   :  { %8102 = vmatprep.subr.mxu1 %v11011_v2 }
 0x59a   :  { %8103 = vmatpush3.msra.mxu1 %v9490_v6 }
 0x59b   :  { %8104 = vmatprep.subr.mxu1 %v11011_v2 }
 0x59c   :  { %8105 = vmatpush3.msra.mxu1 %v9498_v7 }
 0x59d   :  { %8107 = vmatmul.mubr.msk.f32.vlgmr.msra.gmra.mxu1 %vm329_vm3, %v682_v61  ;;  %8136 = vmatprep.subr.mxu1 %v11011_v2 }
 0x59e   :  { %8137 = vmatpush3.msra.mxu1 %v9520_v25  ;;  %8144 = vmatprep.mubr.msk.f32.mxu1 %vm9290_vm1, %v11011_v2 }
 0x59f   :  { %8138 = vmatprep.subr.mxu1 %v11011_v2 }
 0x5a0   :  { %8139 = vmatpush3.msra.mxu1 %v9523_v26 }
 0x5a1   :  { %8140 = vmatprep.subr.mxu1 %v11011_v2 }
 0x5a2   :  { %8141 = vmatpush3.msra.mxu1 %v9528_v27 }
 0x5a3   :  { %8142 = vmatprep.subr.mxu1 %v11011_v2 }
 0x5a4   :  { %8143 = vmatpush3.msra.mxu1 %v9533_v28 }
 0x5a5   :  { %8152 = vmatprep.subr.mxu1 %v11011_v2 }
 0x655   :  { %v9612_v1 = vpop.f32.mrf.mxu1 }
 0x657   :  { %v8092_v4 = vpop.f32.mrf.mxu1 }
 0x65d   :  { %v896_v8 = vpop.f32.mrf.mxu1 }
 0x65e   :  { %v907_v9 = vadd.f32 %v896_v8, %v9510_v10  ;;  %v900_v13 = vadd.f32 %v896_v8, %v827_v12 }
 0x65f   :  { %v8108_v11 = vpop.f32.mrf.mxu1 }
 0x660   :  { %909 = vrot.lane.b32.xlu1 %v907_v9, %s9291_s0  ;;  %v7532_v15 = vmul.f32 -1.442695, %v900_v13 }
 0x662   :  { %8961 = vpow2.f32 %v7532_v15 }
 0x66f   :  { %v8962_v16 = vpop.eup %8961 }
 0x670   :  { %v904_v17 = vadd.f32 1.0, %v8962_v16 }
 0x672   :  { %8963 = vrcp.f32 %v904_v17 }
 0x67f   :  { %v8964_v18 = vpop.eup %8963 }
 0x680   :  { %v919_v24 = vsub.f32 1.0, %v8964_v18  ;;  %v925_v30 = vmul.f32 %v8964_v18, %v679_v60 }
 0x6d2   :  { %v910_v19 = vpop.permute.xlu1 %909 }
 0x6d3   :  { %v912_v20 = vmul.f32 %v8964_v18, %v910_v19 }
 0x6d5   :  { %914 = vrot.lane.b32.xlu0 %v912_v20, %s9291_s0 }
 0x747   :  { %v915_v21 = vpop.permute.xlu0 %914 }
 0x748   :  { %v917_v22 = vadd.f32 %v915_v21, %v827_v12 }
 0x74a   :  { %8965 = vtanh.f32 %v917_v22 }
 0x757   :  { %v8966_v23 = vpop.eup %8965 }
 0x758   :  { %921 = vrot.lane.b32.xlu1 %v8966_v23, %s9292_s17 }
 0x7ca   :  { %v922_v29 = vpop.permute.xlu1 %921 }
 0x7cb   :  { %v924_v31 = vmul.f32 %v922_v29, %v919_v24  ;;  %v7546_v24 = vld [vmem:[%s9304_s5 + $0x10] sm:$0xff] }
 0x7cd   :  { %v926_v32 = vadd.f32 %v925_v30, %v924_v31 }
 0x7cf   :  { %928 = vrot.lane.b32.xlu0 %v926_v32, %s9292_s17 }
 0x841   :  { %v929_v33 = vpop.permute.xlu0 %928 }
 0x842   :  { %8118 = vmatmul.mubr.msk.f32.vlgmr.msra.gmra.mxu0 %vm329_vm3, %v929_v33 }
 0x843   :  { %8121 = vmatpush3.msk.msra.mxu0 %vm255_vm0, %v9467_v0  ;;  %8122 = vmatprep.mubr.msk.f32.mxu0 %vm9290_vm1, %v11011_v2 }
 0x844   :  { %8125 = vmatprep.subr.mxu0 %v11011_v2 }
 0x846   :  { %8123 = vmatmul.mubr.msk.f32.vlgmr.msra.gmra.mxu0 %vm251_vm2, %v7534_v34 }
 0x847   :  { %8126 = vmatpush3.msra.mxu0 %v9474_v3  ;;  %8133 = vmatprep.mubr.msk.f32.mxu0 %vm9290_vm1, %v11011_v2 }
 0x848   :  { %8127 = vmatprep.subr.mxu0 %v11011_v2 }
 0x849   :  { %8128 = vmatpush3.msra.mxu0 %v9483_v5 }
 0x84a   :  { %8129 = vmatprep.subr.mxu0 %v11011_v2 }
 0x84b   :  { %8130 = vmatpush3.msra.mxu0 %v9490_v6 }
 0x84c   :  { %8131 = vmatprep.subr.mxu0 %v11011_v2 }
 0x84d   :  { %8132 = vmatpush3.msra.mxu0 %v9498_v7 }
 0x84e   :  { %8134 = vmatmul.mubr.msk.f32.vlgmr.msra.gmra.mxu0 %vm329_vm3, %v929_v33  ;;  %8147 = vmatprep.subr.mxu0 %v11011_v2 }
 0x84f   :  { %8148 = vmatpush3.msk.msra.mxu0 %vm255_vm0, %v9467_v0  ;;  %8149 = vmatprep.mubr.msk.f32.mxu0 %vm9290_vm1, %v11011_v2 }
 0x850   :  { %8163 = vmatprep.subr.mxu0 %v11011_v2 }
 0x852   :  { %8150 = vmatmul.mubr.msk.f32.vlgmr.msra.gmra.mxu0 %vm251_vm2, %v7540_v54 }
 0x853   :  { %8164 = vmatpush3.msra.mxu0 %v9520_v25  ;;  %8171 = vmatprep.mubr.msk.f32.mxu0 %vm9290_vm1, %v11011_v2 }
 0x854   :  { %8165 = vmatprep.subr.mxu0 %v11011_v2 }
 0x855   :  { %8166 = vmatpush3.msra.mxu0 %v9523_v26 }
 0x856   :  { %8167 = vmatprep.subr.mxu0 %v11011_v2 }
 0x857   :  { %8168 = vmatpush3.msra.mxu0 %v9528_v27 }
 0x858   :  { %8169 = vmatprep.subr.mxu0 %v11011_v2 }
 0x859   :  { %8170 = vmatpush3.msra.mxu0 %v9533_v28 }
 0x85a   :  { %8179 = vmatprep.subr.mxu0 %v11011_v2 }
 0x902   :  { %v9644_v35 = vpop.f32.mrf.mxu0 }
 0x904   :  { %v8119_v36 = vpop.f32.mrf.mxu0 }
 0x906   :  { %v1073_v37 = vpop.f32.mrf.mxu0 }
 0x907   :  { %v1074_v43 = vadd.f32 %v9515_v14, %v1073_v37 }
 0x908   :  { %v8124_v38 = vpop.f32.mrf.mxu0 }
 0x90e   :  { %v1143_v40 = vpop.f32.mrf.mxu0 }
 0x90f   :  { %v1154_v41 = vadd.f32 %v1143_v40, %v9510_v10  ;;  %v1147_v44 = vadd.f32 %v1143_v40, %v1074_v43 }
 0x910   :  { %v8135_v42 = vpop.f32.mrf.mxu0 }
 0x911   :  { %1156 = vrot.lane.b32.xlu1 %v1154_v41, %s9291_s0  ;;  %v7538_v45 = vmul.f32 -1.442695, %v1147_v44 }
 0x912   :  { %v1320_v61 = vpop.f32.mrf.mxu0 }
 0x913   :  { %8967 = vpow2.f32 %v7538_v45  ;;  %v1321_v12 = vadd.f32 %v9515_v14, %v1320_v61 }
 0x914   :  { %v8151_v62 = vpop.f32.mrf.mxu0 }
 0x920   :  { %v8968_v46 = vpop.eup %8967 }
 0x921   :  { %v1151_v47 = vadd.f32 1.0, %v8968_v46 }
 0x923   :  { %8969 = vrcp.f32 %v1151_v47 }
 0x930   :  { %v8970_v48 = vpop.eup %8969 }
 0x931   :  { %v1166_v55 = vsub.f32 1.0, %v8970_v48  ;;  %v1172_v57 = vmul.f32 %v8970_v48, %v926_v32 }
 0x983   :  { %v1157_v49 = vpop.permute.xlu1 %1156 }
 0x984   :  { %v1159_v50 = vmul.f32 %v8970_v48, %v1157_v49 }
 0x986   :  { %1161 = vrot.lane.b32.xlu0 %v1159_v50, %s9291_s0 }
 0x9f8   :  { %v1162_v51 = vpop.permute.xlu0 %1161 }
 0x9f9   :  { %v1164_v52 = vadd.f32 %v1162_v51, %v1074_v43 }
 0x9fb   :  { %8971 = vtanh.f32 %v1164_v52 }
 0xa08   :  { %v8972_v53 = vpop.eup %8971 }
 0xa09   :  { %1168 = vrot.lane.b32.xlu1 %v8972_v53, %s9292_s17 }
 0xa7b   :  { %v1169_v56 = vpop.permute.xlu1 %1168 }
 0xa7c   :  { %v1171_v58 = vmul.f32 %v1169_v56, %v1166_v55  ;;  %v7552_v55 = vld [vmem:[%s9304_s5 + $0x8] sm:$0xff] }
 0xa7e   :  { %v1173_v59 = vadd.f32 %v1172_v57, %v1171_v58 }
 0xa80   :  { %1175 = vrot.lane.b32.xlu0 %v1173_v59, %s9292_s17 }
 0xaf2   :  { %v1176_v60 = vpop.permute.xlu0 %1175 }
 0xaf3   :  { %8145 = vmatmul.mubr.msk.f32.vlgmr.msra.gmra.mxu1 %vm329_vm3, %v1176_v60 }
 0xaf4   :  { %8153 = vmatpush3.msra.mxu1 %v9474_v3  ;;  %8160 = vmatprep.mubr.msk.f32.mxu1 %vm9290_vm1, %v11011_v2 }
 0xaf5   :  { %8154 = vmatprep.subr.mxu1 %v11011_v2 }
 0xaf6   :  { %8155 = vmatpush3.msra.mxu1 %v9483_v5 }
 0xaf7   :  { %8156 = vmatprep.subr.mxu1 %v11011_v2 }
 0xaf8   :  { %8157 = vmatpush3.msra.mxu1 %v9490_v6 }
 0xaf9   :  { %8158 = vmatprep.subr.mxu1 %v11011_v2 }
 0xafa   :  { %8159 = vmatpush3.msra.mxu1 %v9498_v7 }
 0xafb   :  { %8161 = vmatmul.mubr.msk.f32.vlgmr.msra.gmra.mxu1 %vm329_vm3, %v1176_v60  ;;  %8174 = vmatprep.subr.mxu1 %v11011_v2 }
 0xafc   :  { %8175 = vmatpush3.msk.msra.mxu1 %vm255_vm0, %v9467_v0  ;;  %8176 = vmatprep.mubr.msk.f32.mxu1 %vm9290_vm1, %v11011_v2 }
 0xafd   :  { %8190 = vmatprep.subr.mxu1 %v11011_v2 }
 0xaff   :  { %8177 = vmatmul.mubr.msk.f32.vlgmr.msra.gmra.mxu1 %vm251_vm2, %v7546_v24 }
 0xb00   :  { %8191 = vmatpush3.msra.mxu1 %v9520_v25  ;;  %8198 = vmatprep.mubr.msk.f32.mxu1 %vm9290_vm1, %v11011_v2 }
 0xb01   :  { %8192 = vmatprep.subr.mxu1 %v11011_v2 }
 0xb02   :  { %8193 = vmatpush3.msra.mxu1 %v9523_v26 }
 0xb03   :  { %8194 = vmatprep.subr.mxu1 %v11011_v2 }
 0xb04   :  { %8195 = vmatpush3.msra.mxu1 %v9528_v27 }
 0xb05   :  { %8196 = vmatprep.subr.mxu1 %v11011_v2 }
 0xb06   :  { %8197 = vmatpush3.msra.mxu1 %v9533_v28 }
 0xb07   :  { %8206 = vmatprep.subr.mxu1 %v11011_v2 }
 0xbb3   :  { %v9681_v63 = vpop.f32.mrf.mxu1 }
 0xbb5   :  { %v8146_v4 = vpop.f32.mrf.mxu1 }
 0xbbb   :  { %v1390_v8 = vpop.f32.mrf.mxu1 }
 0xbbc   :  { %v1401_v9 = vadd.f32 %v1390_v8, %v9510_v10  ;;  %v1394_v13 = vadd.f32 %v1390_v8, %v1321_v12 }
 0xbbd   :  { %v8162_v11 = vpop.f32.mrf.mxu1 }
 0xbbe   :  { %1403 = vrot.lane.b32.xlu1 %v1401_v9, %s9291_s0  ;;  %v7544_v15 = vmul.f32 -1.442695, %v1394_v13 }
 0xbbf   :  { %v1567_v36 = vpop.f32.mrf.mxu1 }
 0xbc0   :  { %8973 = vpow2.f32 %v7544_v15  ;;  %v1568_v44 = vadd.f32 %v9515_v14, %v1567_v36 }
 0xbc1   :  { %v8178_v37 = vpop.f32.mrf.mxu1 }
 0xbcd   :  { %v8974_v16 = vpop.eup %8973 }
 0xbce   :  { %v1398_v17 = vadd.f32 1.0, %v8974_v16 }
 0xbd0   :  { %8975 = vrcp.f32 %v1398_v17 }
 0xbdd   :  { %v8976_v18 = vpop.eup %8975 }
 0xbde   :  { %v1413_v29 = vsub.f32 1.0, %v8976_v18  ;;  %v1419_v31 = vmul.f32 %v8976_v18, %v1173_v59 }
 0xc30   :  { %v1404_v19 = vpop.permute.xlu1 %1403 }
 0xc31   :  { %v1406_v20 = vmul.f32 %v8976_v18, %v1404_v19 }
 0xc33   :  { %1408 = vrot.lane.b32.xlu0 %v1406_v20, %s9291_s0 }
 0xca5   :  { %v1409_v21 = vpop.permute.xlu0 %1408 }
 0xca6   :  { %v1411_v22 = vadd.f32 %v1409_v21, %v1321_v12 }
 0xca8   :  { %8977 = vtanh.f32 %v1411_v22 }
 0xcb5   :  { %v8978_v23 = vpop.eup %8977 }
 0xcb6   :  { %1415 = vrot.lane.b32.xlu1 %v8978_v23, %s9292_s17 }
 0xd28   :  { %v1416_v30 = vpop.permute.xlu1 %1415 }
 0xd29   :  { %v1418_v32 = vmul.f32 %v1416_v30, %v1413_v29  ;;  %v1990_v29 = vld [vmem:[%s9304_s5] sm:$0xff] }
 0xd2b   :  { %v1420_v33 = vadd.f32 %v1419_v31, %v1418_v32 }
 0xd2d   :  { %1422 = vrot.lane.b32.xlu0 %v1420_v33, %s9292_s17 }
 0xd9f   :  { %v1423_v34 = vpop.permute.xlu0 %1422 }
 0xda0   :  { %8172 = vmatmul.mubr.msk.f32.vlgmr.msra.gmra.mxu0 %vm329_vm3, %v1423_v34 }
 0xda1   :  { %8180 = vmatpush3.msra.mxu0 %v9474_v3  ;;  %8187 = vmatprep.mubr.msk.f32.mxu0 %vm9290_vm1, %v11011_v2 }
 0xda2   :  { %8181 = vmatprep.subr.mxu0 %v11011_v2 }
 0xda3   :  { %8182 = vmatpush3.msra.mxu0 %v9483_v5 }
 0xda4   :  { %8183 = vmatprep.subr.mxu0 %v11011_v2 }
 0xda5   :  { %8184 = vmatpush3.msra.mxu0 %v9490_v6 }
 0xda6   :  { %8185 = vmatprep.subr.mxu0 %v11011_v2 }
 0xda7   :  { %8186 = vmatpush3.msra.mxu0 %v9498_v7 }
 0xda8   :  { %8188 = vmatmul.mubr.msk.f32.vlgmr.msra.gmra.mxu0 %vm329_vm3, %v1423_v34  ;;  %8201 = vmatprep.subr.mxu0 %v11011_v2 }
 0xda9   :  { %8202 = vmatpush3.msk.msra.mxu0 %vm255_vm0, %v9467_v0  ;;  %8203 = vmatprep.mubr.msk.f32.mxu0 %vm9290_vm1, %v11011_v2 }
 0xdaa   :  { %8217 = vmatprep.subr.mxu0 %v11011_v2 }
 0xdac   :  { %8204 = vmatmul.mubr.msk.f32.vlgmr.msra.gmra.mxu0 %vm251_vm2, %v7552_v55  ;;  %v164_v55 = vld [vmem:[%s9354_s19] sm:$0xff] }
 0xdad   :  { %8218 = vmatpush3.msra.mxu0 %v9520_v25  ;;  %8225 = vmatprep.mubr.msk.f32.mxu0 %vm9290_vm1, %v11011_v2 }
 0xdae   :  { %8219 = vmatprep.subr.mxu0 %v11011_v2 }
 0xdaf   :  { %8220 = vmatpush3.msra.mxu0 %v9523_v26 }
 0xdb0   :  { %8221 = vmatprep.subr.mxu0 %v11011_v2 }
 0xdb1   :  { %8222 = vmatpush3.msra.mxu0 %v9528_v27 }
 0xdb2   :  { %8223 = vmatprep.subr.mxu0 %v11011_v2 }
 0xdb3   :  { %8224 = vmatpush3.msra.mxu0 %v9533_v28 }
 0xdb4   :  { %8233 = vmatprep.subr.mxu0 %v11011_v2 }
 0xe60   :  { %v9718_v38 = vpop.f32.mrf.mxu0 }
 0xe62   :  { %v8173_v40 = vpop.f32.mrf.mxu0 }
 0xe68   :  { %v1637_v41 = vpop.f32.mrf.mxu0 }
 0xe69   :  { %v1648_v42 = vadd.f32 %v1637_v41, %v9510_v10  ;;  %v1641_v45 = vadd.f32 %v1637_v41, %v1568_v44 }
 0xe6a   :  { %v8189_v43 = vpop.f32.mrf.mxu0 }
 0xe6b   :  { %1650 = vrot.lane.b32.xlu1 %v1648_v42, %s9291_s0  ;;  %v7550_v46 = vmul.f32 -1.442695, %v1641_v45 }
 0xe6c   :  { %v1814_v62 = vpop.f32.mrf.mxu0 }
 0xe6d   :  { %8979 = vpow2.f32 %v7550_v46  ;;  %v1815_v15 = vadd.f32 %v9515_v14, %v1814_v62  ;;  %v9816_v62 = vld [vmem:[%s9374_s12] sm:$0xff] }
 0xe6e   :  { %v8205_v4 = vpop.f32.mrf.mxu0 }
 0xe7a   :  { %v8980_v47 = vpop.eup %8979 }
 0xe7b   :  { %v1645_v48 = vadd.f32 1.0, %v8980_v47 }
 0xe7d   :  { %8981 = vrcp.f32 %v1645_v48 }
 0xe8a   :  { %v8982_v49 = vpop.eup %8981 }
 0xe8b   :  { %v1660_v56 = vsub.f32 1.0, %v8982_v49  ;;  %v1666_v58 = vmul.f32 %v8982_v49, %v1420_v33 }
 0xedd   :  { %v1651_v50 = vpop.permute.xlu1 %1650 }
 0xede   :  { %v1653_v51 = vmul.f32 %v8982_v49, %v1651_v50 }
 0xee0   :  { %1655 = vrot.lane.b32.xlu0 %v1653_v51, %s9291_s0 }
 0xf52   :  { %v1656_v52 = vpop.permute.xlu0 %1655 }
 0xf53   :  { %v1658_v53 = vadd.f32 %v1656_v52, %v1568_v44  ;;  %v165_v52 = vld [vmem:[%s9354_s19 + $0x8] sm:$0xff]  ;;  %s11040_s19 = sld [smem:[#allocation17_spill]] }
 0xf55   :  { %8983 = vtanh.f32 %v1658_v53 }
 0xf62   :  { %v8984_v54 = vpop.eup %8983 }
 0xf63   :  { %1662 = vrot.lane.b32.xlu1 %v8984_v54, %s9292_s17  ;;  %v163_v54 = vld [vmem:[%s9349_s14 + $0x8] sm:$0xff] }
 0xfd5   :  { %v1663_v57 = vpop.permute.xlu1 %1662 }
 0xfd6   :  { %v1665_v59 = vmul.f32 %v1663_v57, %v1660_v56  ;;  %v162_v56 = vld [vmem:[%s9349_s14] sm:$0xff]  ;;  %s11038_s14 = sld [smem:[#allocation12_spill]] }
 0xfd7   :  { %v9807_v57 = vld [vmem:[%s9344_s8] ss:$0 sm:$0xff] }
 0xfd8   :  { %v1667_v60 = vadd.f32 %v1666_v58, %v1665_v59 }
 0xfda   :  { %1669 = vrot.lane.b32.xlu0 %v1667_v60, %s9292_s17 }
0x104c   :  { %v1670_v61 = vpop.permute.xlu0 %1669 }
0x104d   :  { %8199 = vmatmul.mubr.msk.f32.vlgmr.msra.gmra.mxu1 %vm329_vm3, %v1670_v61 }
0x104e   :  { %8207 = vmatpush3.msra.mxu1 %v9474_v3  ;;  %8214 = vmatprep.mubr.msk.f32.mxu1 %vm9290_vm1, %v11011_v2 }
0x104f   :  { %8208 = vmatprep.subr.mxu1 %v11011_v2 }
0x1050   :  { %8209 = vmatpush3.msra.mxu1 %v9483_v5 }
0x1051   :  { %8210 = vmatprep.subr.mxu1 %v11011_v2 }
0x1052   :  { %8211 = vmatpush3.msra.mxu1 %v9490_v6 }
0x1053   :  { %8212 = vmatprep.subr.mxu1 %v11011_v2 }
0x1054   :  { %8213 = vmatpush3.msra.mxu1 %v9498_v7 }
0x1055   :  { %8215 = vmatmul.mubr.msk.f32.vlgmr.msra.gmra.mxu1 %vm329_vm3, %v1670_v61  ;;  %8228 = vmatprep.subr.mxu1 %v11011_v2 }
0x1056   :  { %8229 = vmatpush3.msk.msra.mxu1 %vm255_vm0, %v9467_v0  ;;  %8230 = vmatprep.mubr.msk.f32.mxu1 %vm9290_vm1, %v11011_v2 }
0x1057   :  { %8244 = vmatprep.subr.mxu1 %v11011_v2 }
0x1059   :  { %8231 = vmatmul.mubr.msk.f32.vlgmr.msra.gmra.mxu1 %vm251_vm2, %v1990_v29 }
0x105a   :  { %8245 = vmatpush3.msra.mxu1 %v9520_v25  ;;  %8252 = vmatprep.mubr.msk.f32.mxu1 %vm9290_vm1, %v11011_v2 }
0x105b   :  { %8246 = vmatprep.subr.mxu1 %v11011_v2 }
0x105c   :  { %8247 = vmatpush3.msra.mxu1 %v9523_v26 }
0x105d   :  { %8248 = vmatprep.subr.mxu1 %v11011_v2 }
0x105e   :  { %8249 = vmatpush3.msra.mxu1 %v9528_v27 }
0x105f   :  { %8250 = vmatprep.subr.mxu1 %v11011_v2 }
0x1060   :  { %8251 = vmatpush3.msra.mxu1 %v9533_v28 }
0x1061   :  { %8262 = vmatprep.subr.mxu1 %v11011_v2 }
0x110d   :  { %v9755_v8 = vpop.f32.mrf.mxu1 }
0x110f   :  { %v8200_v9 = vpop.f32.mrf.mxu1 }
0x1110   :  { %v9831_v9 = vld [vmem:[%s9434_s13] sm:$0xf] }
0x1115   :  { %v1884_v11 = vpop.f32.mrf.mxu1 }
0x1116   :  { %v1895_v12 = vadd.f32 %v1884_v11, %v9510_v10  ;;  %v1888_v0 = vadd.f32 %v1884_v11, %v1815_v15  ;;  %v248_v11 = vld [vmem:[%s9449_s4] sm:$0x1]  ;;  %s11044_s4 = sld [smem:[#allocation21_spill]] }
0x1117   :  { %v8216_v13 = vpop.f32.mrf.mxu1 }
0x1118   :  { %1897 = vrot.lane.b32.xlu1 %v1895_v12, %s9291_s0  ;;  %v7556_v16 = vmul.f32 -1.442695, %v1888_v0  ;;  %v7392_v12 = vmul.f32 1.442695, %v248_v11  ;;  %v7395_v13 = vlaneseq }
0x111a   :  { %8985 = vpow2.f32 %v7556_v16 }
0x1127   :  { %v8986_v17 = vpop.eup %8985 }
0x1128   :  { %v1892_v18 = vadd.f32 1.0, %v8986_v17 }
0x112a   :  { %8987 = vrcp.f32 %v1892_v18  ;;  %v7565_v18 = vld [vmem:[%s9364_s30] ss:$0 sm:$0xff]  ;;  %s11042_s30 = sld [smem:[#allocation14_spill]] }
0x1137   :  { %v8988_v19 = vpop.eup %8987 }
0x1138   :  { %v1907_v30 = vsub.f32 1.0, %v8988_v19  ;;  %v1913_v32 = vmul.f32 %v8988_v19, %v1667_v60  ;;  %v9811_v60 = vld [vmem:[%s9374_s12 + $0x8] sm:$0xff] }
0x118a   :  { %v1898_v20 = vpop.permute.xlu1 %1897 }
0x118b   :  { %v1900_v21 = vmul.f32 %v8988_v19, %v1898_v20 }
0x118d   :  { %1902 = vrot.lane.b32.xlu0 %v1900_v21, %s9291_s0 }
0x11ff   :  { %v1903_v22 = vpop.permute.xlu0 %1902 }
0x1200   :  { %v1905_v23 = vadd.f32 %v1903_v22, %v1815_v15  ;;  %v7396_v15 = vshrl.u32 %v7395_v13, 7 }
0x1202   :  { %8989 = vtanh.f32 %v1905_v23  ;;  %v7397_v0 = vsub.s32 0, %v7396_v15 }
0x120f   :  { %v8990_v24 = vpop.eup %8989 }
0x1210   :  { %1909 = vrot.lane.b32.xlu1 %v8990_v24, %s9292_s17 }
0x1282   :  { %v1910_v31 = vpop.permute.xlu1 %1909 }
0x1283   :  { %v1912_v33 = vmul.f32 %v1910_v31, %v1907_v30  ;;  %v7563_v30 = vld [vmem:[%s9359_s24] ss:$0 sm:$0xff]  ;;  %s11041_s24 = sld [smem:[#allocation15_spill]] }
0x1285   :  { %v1914_v34 = vadd.f32 %v1913_v32, %v1912_v33  ;;  %v7667_v33 = vld [vmem:[%s9444_s27] ss:$0 sm:$0xff]  ;;  %s11043_s27 = sld [smem:[#allocation19_spill]] }
0x1287   :  { %1916 = vrot.lane.b32.xlu0 %v1914_v34, %s9292_s17 }
0x12f9   :  { %v1917_v25 = vpop.permute.xlu0 %1916 }
0x12fa   :  { %8226 = vmatmul.mubr.msk.f32.vlgmr.msra.gmra.mxu0 %vm329_vm3, %v1917_v25 }
0x12fb   :  { %8234 = vmatpush3.msra.mxu0 %v9474_v3  ;;  %8241 = vmatprep.mubr.msk.f32.mxu0 %vm9290_vm1, %v11011_v2  ;;  %v2060_v3 = vpop.f32.mrf.mxu1 }
0x12fc   :  { %8235 = vmatprep.subr.mxu0 %v11011_v2 }
0x12fd   :  { %8236 = vmatpush3.msra.mxu0 %v9483_v5  ;;  %v8232_v26 = vpop.f32.mrf.mxu1 }
0x12fe   :  { %8237 = vmatprep.subr.mxu0 %v11011_v2 }
0x12ff   :  { %8238 = vmatpush3.msra.mxu0 %v9490_v6  ;;  %v2061_v6 = vadd.f32 %v9515_v14, %v2060_v3 }
0x1300   :  { %8239 = vmatprep.subr.mxu0 %v11011_v2 }
0x1301   :  { %8240 = vmatpush3.msra.mxu0 %v9498_v7 }
0x1302   :  { %8242 = vmatmul.mubr.msk.f32.vlgmr.msra.gmra.mxu0 %vm329_vm3, %v1917_v25  ;;  %8255 = vmatprep.subr.mxu0 %v11011_v2 }
0x1303   :  { %8259 = vmatprep.mubr.msk.f32.mxu0 %vm9290_vm1, %v11011_v2  ;;  %8256 = vmatpush3.msra.mxu0 %v163_v54 }
0x1304   :  { %8257 = vmatprep.subr.mxu0 %v11011_v2 }
0x1305   :  { %8258 = vmatpush3.msra.mxu0 %v162_v56 }
0x1306   :  { %8269 = vmatprep.subr.mxu0 %v11011_v2 }
0x13ba   :  { %v1986_v27 = vpop.f32.mrf.mxu0 }
0x13bb   :  { %v1987_v4 = vadd.f32 %v9807_v57, %v1986_v27  ;;  %v2395_v27 = vld [vmem:[%s11032_s21] sm:$0xff] }
0x13bc   :  { %v8227_v28 = vpop.f32.mrf.mxu0 }
0x13c2   :  { %v2130_v5 = vpop.f32.mrf.mxu0 }
0x13c3   :  { %v2141_v36 = vadd.f32 %v2130_v5, %v9510_v10  ;;  %v2134_v7 = vadd.f32 %v2130_v5, %v2061_v6 }
0x13c4   :  { %v8243_v37 = vpop.f32.mrf.mxu0 }
0x13c5   :  { %2143 = vrot.lane.b32.xlu1 %v2141_v36, %s9291_s0  ;;  %v7561_v40 = vmul.f32 -1.442695, %v2134_v7 }
0x13c7   :  { %8991 = vpow2.f32 %v7561_v40  ;;  %v9844_v40 = vld [vmem:[%s11033_s25] sm:$0xf] }
0x13d4   :  { %v8992_v41 = vpop.eup %8991 }
0x13d5   :  { %v2138_v42 = vadd.f32 1.0, %v8992_v41 }
0x13d7   :  { %8993 = vrcp.f32 %v2138_v42 }
0x13e4   :  { %v8994_v43 = vpop.eup %8993 }
0x13e5   :  { %v2153_v14 = vsub.f32 1.0, %v8994_v43  ;;  %v2159_v49 = vmul.f32 %v8994_v43, %v1914_v34 }
0x1437   :  { %v2144_v44 = vpop.permute.xlu1 %2143 }
0x1438   :  { %v2146_v45 = vmul.f32 %v8994_v43, %v2144_v44 }
0x143a   :  { %2148 = vrot.lane.b32.xlu0 %v2146_v45, %s9291_s0 }
0x14ac   :  { %v2149_v46 = vpop.permute.xlu0 %2148 }
0x14ad   :  { %v2151_v47 = vadd.f32 %v2149_v46, %v2061_v6  ;;  %v9864_v46 = vld [vmem:[%s11034_s29 + $0x18] sm:$0xff] }
0x14af   :  { %8995 = vtanh.f32 %v2151_v47  ;;  %v9867_v47 = vld [vmem:[%s11034_s29 + $0x10] sm:$0xff] }
0x14b0   :  { %8997 = vpow2.f32 %v7392_v12 }
0x14bc   :  { %v8996_v10 = vpop.eup %8995 }
0x14bd   :  { %2155 = vrot.lane.b32.xlu1 %v8996_v10, %s9292_s17  ;;  %v8998_v16 = vpop.eup %8997  ;;  %v9872_v10 = vld [vmem:[%s11034_s29 + $0x8] sm:$0xff] }
0x14be   :  { %v7398_v17 = vrot.slane %v8998_v16, %v7397_v0 }
0x14c0   :  { %8999 = vrcp.f32 %v7398_v17 }
0x14cd   :  { %v9000_v25 = vpop.eup %8999 }
0x152f   :  { %v2156_v48 = vpop.permute.xlu1 %2155 }
0x1530   :  { %v2158_v50 = vmul.f32 %v2156_v48, %v2153_v14  ;;  %v9877_v14 = vld [vmem:[%s11034_s29] sm:$0xff] }
0x1531   :  { %v9884_v48 = vld [vmem:[%s11035_s3] ss:$0 sm:$0xff] }
0x1532   :  { %v2160_v51 = vadd.f32 %v2159_v49, %v2158_v50 }
0x1534   :  { %2162 = vrot.lane.b32.xlu0 %v2160_v51, %s9292_s17 }
0x15a6   :  { %v2163_v53 = vpop.permute.xlu0 %2162 }
0x15a7   :  { %8253 = vmatmul.mubr.msk.f32.vlgmr.msra.gmra.mxu1 %vm329_vm3, %v2163_v53  ;;  %v9892_v53 = vld [vmem:[%s11038_s14] ss:$0 sm:$0xff] }
0x15a8   :  { %8263 = vmatpush3.msra.mxu1 %v165_v52  ;;  %8266 = vmatprep.mubr.msk.f32.mxu1 %vm9290_vm1, %v11011_v2 }
0x15a9   :  { %8264 = vmatprep.subr.mxu1 %v11011_v2 }
0x15aa   :  { %8265 = vmatpush3.msra.mxu1 %v164_v55 }
0x15ab   :  { %8274 = vmatprep.subr.mxu1 %v11011_v2 }
0x1667   :  { %v2232_v58 = vpop.f32.mrf.mxu1 }
0x1668   :  { %v2233_v59 = vadd.f32 %v9807_v57, %v2232_v58 }
0x1669   :  { %v8254_v61 = vpop.f32.mrf.mxu1 }
0x166a   :  { %8260 = vmatmul.mubr.msk.f32.vlgmr.msra.gmra.mxu0 %vm2242_vm4, %v2233_v59  ;;  %8267 = vmatmul.mubr.msk.f32.vlgmr.msra.gmra.mxu1 %vm2242_vm4, %v2233_v59 }
0x166b   :  { %8275 = vmatpush3.msra.mxu1 %v9811_v60  ;;  %8278 = vmatprep.mubr.msk.f32.mxu1 %vm9290_vm1, %v11011_v2 }
0x166c   :  { %8276 = vmatprep.subr.mxu1 %v11011_v2  ;;  %8271 = vmatprep.mubr.msk.f32.mxu0 %vm9290_vm1, %v11011_v2 }
0x166d   :  { %8277 = vmatpush3.msra.mxu1 %v9816_v62  ;;  %8270 = vmatpush3.msk.msra.mxu0 %vm255_vm0, %v9831_v9 }
0x166e   :  { %8279 = vmatmul.mubr.msk.f32.vlgmr.msra.gmra.mxu1 %vm2242_vm4, %v1987_v4  ;;  %8286 = vmatprep.subr.mxu1 %v11011_v2 }
0x166f   :  { %8294 = vmatprep.mubr.msk.f32.mxu1 %vm9290_vm1, %v11011_v2  ;;  %8281 = vmatprep.subr.mxu0 %v11011_v2 }
0x1670   :  { %8287 = vmatpush3.msra.mxu1 %v9864_v46 }
0x1671   :  { %8288 = vmatprep.subr.mxu1 %v11011_v2 }
0x1672   :  { %8289 = vmatpush3.msra.mxu1 %v9867_v47 }
0x1673   :  { %8290 = vmatprep.subr.mxu1 %v11011_v2 }
0x1674   :  { %8291 = vmatpush3.msra.mxu1 %v9872_v10 }
0x1675   :  { %8292 = vmatprep.subr.mxu1 %v11011_v2 }
0x1676   :  { %8293 = vmatpush3.msra.mxu1 %v9877_v14 }
0x1677   :  { %8308 = vmatprep.subr.mxu1 %v11011_v2 }
0x172a   :  { %v2312_v19 = vpop.f32.mrf.mxu0  ;;  %v2388_v20 = vpop.f32.mrf.mxu1 }
0x172b   :  { %v2389_v21 = vadd.f32 %v7565_v18, %v2388_v20  ;;  %v2313_v32 = vadd.f32 %v7563_v30, %v2312_v19  ;;  %v9913_v30 = vld [vmem:[%s11041_s24 + $0x10] sm:$0xff] }
0x172c   :  { %v8261_v22 = vpop.f32.mrf.mxu0  ;;  %v8268_v23 = vpop.f32.mrf.mxu1 }
0x172d   :  { %v2392_v24 = vmul.f32 1.442695, %v2389_v21  ;;  %v7409_v34 = vsub.f32 %v2313_v32, %v7667_v33  ;;  %v9897_v23 = vld [vmem:[%s11040_s19] sm:$0xf] }
0x172e   :  { %v2581_v29 = vpop.f32.mrf.mxu1  ;;  %v9930_v33 = vld [vmem:[%s11042_s30] ss:$0 sm:$0xff] }
0x172f   :  { %9001 = vpow2.f32 %v2392_v24  ;;  %v7410_v3 = vmul.f32 %v9000_v25, %v7409_v34 }
0x1730   :  { %v8280_v31 = vpop.f32.mrf.mxu1 }
0x1731   :  { %v7411_v36 = vmul.f32 %v7410_v3, %v7410_v3  ;;  %v9918_v31 = vld [vmem:[%s11041_s24 + $0x8] sm:$0xff] }
0x173c   :  { %v9002_v26 = vpop.eup %9001 }
0x173d   :  { %v2394_v28 = vmul.f32 0.2, %v9002_v26  ;;  %v7401_v5 = vmul.f32 %v9002_v26, %v9000_v25 }
0x173f   :  { %v2396_v37 = vmul.f32 %v2395_v27, %v2394_v28  ;;  %v7402_v6 = vmul.f32 %v7401_v5, %v7401_v5 }
0x1741   :  { %v9841_v7 = vadd.f32 %v2396_v37, %v2313_v32  ;;  %v7412_v41 = vadd.f32 %v7411_v36, %v7402_v6  ;;  %9003 = vlog2.f32 %v7402_v6  ;;  %v9923_v32 = vld [vmem:[%s11041_s24] sm:$0xff] }
0x1743   :  { %8272 = vmatmul.mubr.msk.f32.vlgmr.msra.gmra.mxu0 %vm251_vm2, %v9841_v7  ;;  %v9857_v43 = vadd.f32 -1.0, %v7412_v41 }
0x1744   :  { %8282 = vmatpush3.msk.msra.mxu0 %vm255_vm0, %v9844_v40  ;;  %8283 = vmatprep.mubr.msk.f32.mxu0 %vm9290_vm1, %v11011_v2 }
0x1745   :  { %8297 = vmatprep.subr.mxu0 %v11011_v2  ;;  %11036 = vst [vmem:[#allocation24_spill] sm:$0xff] %v9857_v43 }
0x1747   :  { %8284 = vmatmul.mubr.msk.f32.vlgmr.msra.gmra.mxu0 %vm251_vm2, %v9841_v7 }
0x1748   :  { %8305 = vmatprep.mubr.msk.f32.mxu0 %vm9290_vm1, %v11011_v2 }
0x174e   :  { %v9004_v42 = vpop.eup %9003 }
0x174f   :  { %v9859_v44 = vmul.f32 0.6931472, %v9004_v42 }
0x1751   :  { %11037 = vst [vmem:[#allocation25_spill] sm:$0xff] %v9859_v44 }
0x1803   :  { %v2470_v49 = vpop.f32.mrf.mxu0 }
0x1804   :  { %v9887_v50 = vadd.f32 %v9884_v48, %v2470_v49 }
0x1805   :  { %v8273_v51 = vpop.f32.mrf.mxu0 }
0x1806   :  { %11039 = vst [vmem:[#allocation26_spill] sm:$0xff] %v9887_v50  ;;  %v2490_v52 = vmul.f32 %v9887_v50, %v9887_v50 }
0x1807   :  { %v2654_v54 = vpop.f32.mrf.mxu0 }
0x1808   :  { %v2655_v55 = vadd.f32 %v2654_v54, %v2581_v29  ;;  %v2491_v56 = vsel %vm251_vm2, %v2490_v52, 0.0  ;;  %v9910_v29 = vld [vmem:[%s11041_s24 + $0x18] sm:$0xff] }
0x1809   :  { %2492 = vadd.xlane.f32.xlu1 %v2491_v56  ;;  %v8285_v58 = vpop.f32.mrf.mxu0  ;;  %8298 = vmatpush3.msra.mxu0 %v9910_v29 }
0x180a   :  { %v2658_v59 = vadd.f32 %v9892_v53, %v2655_v55  ;;  %8299 = vmatprep.subr.mxu0 %v11011_v2 }
0x180b   :  { %8300 = vmatpush3.msra.mxu0 %v9913_v30 }
0x180c   :  { %v2662_v61 = vand.u32 2147483647, %v2658_v59  ;;  %v2659_v20 = vmax.f32 %v2658_v59, 0.0  ;;  %vm2660_vm6 = vcmp.ne.f32.partialorder %v2658_v59, %v2658_v59  ;;  %8301 = vmatprep.subr.mxu0 %v11011_v2 }
0x180d   :  { %8302 = vmatpush3.msra.mxu0 %v9918_v31 }
0x180e   :  { %v2663_v4 = vsub.f32 0.0, %v2662_v61  ;;  %8303 = vmatprep.subr.mxu0 %v11011_v2 }
0x180f   :  { %8304 = vmatpush3.msra.mxu0 %v9923_v32 }
0x1810   :  { %v2664_v11 = vmul.f32 1.442695, %v2663_v4  ;;  %8313 = vmatprep.subr.mxu0 %v11011_v2  ;;  %v9952_v4 = vld [vmem:[%s11044_s4 + $0x78] sm:$0xff] }
0x1812   :  { %9005 = vpow2.f32 %v2664_v11  ;;  %v9955_v11 = vld [vmem:[%s11044_s4 + $0x70] sm:$0xff] }
0x181f   :  { %v9006_v12 = vpop.eup %9005 }
0x1820   :  { %v2666_v13 = vadd.f32 1.0, %v9006_v12  ;;  %v2669_v15 = vmul.f32 -0.5, %v9006_v12  ;;  %v2672_v16 = vand.u32 2147483647, %v9006_v12 }
0x1822   :  { %9007 = vlog2.f32 %v2666_v13  ;;  %v2670_v0 = vadd.f32 1.0, %v2669_v15  ;;  %vm2673_vm5 = vcmp.lt.f32.partialorder %v2672_v16, 0.0004427343  ;;  %v9965_v13 = vld [vmem:[%s11044_s4 + $0x60] sm:$0xff]  ;;  %v9970_v15 = vld [vmem:[%s11044_s4 + $0x58] sm:$0xff]  ;;  %v9980_v16 = vld [vmem:[%s11044_s4 + $0x48] sm:$0xff] }
0x1824   :  { %v2671_v19 = vmul.f32 %v9006_v12, %v2670_v0  ;;  %v9960_v12 = vld [vmem:[%s11044_s4 + $0x68] sm:$0xff]  ;;  %v9975_v0 = vld [vmem:[%s11044_s4 + $0x50] sm:$0xff] }
0x182f   :  { %v9008_v17 = vpop.eup %9007 }
0x1830   :  { %v2668_v18 = vmul.f32 0.6931472, %v9008_v17  ;;  %v9985_v17 = vld [vmem:[%s11044_s4 + $0x40] sm:$0xff] }
0x1832   :  { %v2674_v21 = vsel %vm2673_vm5, %v2671_v19, %v2668_v18  ;;  %v9990_v18 = vld [vmem:[%s11044_s4 + $0x38] sm:$0xff]  ;;  %v9995_v19 = vld [vmem:[%s11044_s4 + $0x30] sm:$0xff] }
0x1833   :  { %v2675_v22 = vadd.f32 %v2674_v21, %v2659_v20  ;;  %v10000_v20 = vld [vmem:[%s11044_s4 + $0x28] sm:$0xff]  ;;  %v10005_v21 = vld [vmem:[%s11044_s4 + $0x20] sm:$0xff] }
0x1835   :  { %v2676_v24 = vsel %vm2660_vm6, %v2658_v59, %v2675_v22  ;;  %v9936_v59 = vld [vmem:[%s11043_s27] sm:$0xf]  ;;  %v10010_v22 = vld [vmem:[%s11044_s4 + $0x18] sm:$0xff] }
0x1836   :  { %8295 = vmatmul.mubr.msk.f32.vlgmr.msra.gmra.mxu1 %vm329_vm3, %v2676_v24  ;;  %v10015_v24 = vld [vmem:[%s11044_s4 + $0x10] sm:$0xff] }
0x1837   :  { %8309 = vmatpush3.msk.msra.mxu1 %vm255_vm0, %v9897_v23  ;;  %8310 = vmatprep.mubr.msk.f32.mxu1 %vm9290_vm1, %v11011_v2 }
0x1838   :  { %8318 = vmatprep.subr.mxu1 %v11011_v2 }
0x183a   :  { %8311 = vmatmul.mubr.msk.f32.vlgmr.msra.gmra.mxu1 %vm251_vm2, %v9841_v7 }
0x183b   :  { %8350 = vmatprep.mubr.msk.f32.mxu1 %vm9290_vm1, %v11011_v2  ;;  %8319 = vmatpush3.msra.mxu1 %v9952_v4 }
0x183c   :  { %8320 = vmatprep.subr.mxu1 %v11011_v2 }
0x183d   :  { %8321 = vmatpush3.msra.mxu1 %v9955_v11 }
0x183e   :  { %8322 = vmatprep.subr.mxu1 %v11011_v2 }
0x183f   :  { %8323 = vmatpush3.msra.mxu1 %v9960_v12 }
0x1840   :  { %8324 = vmatprep.subr.mxu1 %v11011_v2 }
0x1841   :  { %8325 = vmatpush3.msra.mxu1 %v9965_v13 }
0x1842   :  { %8326 = vmatprep.subr.mxu1 %v11011_v2 }
0x1843   :  { %8327 = vmatpush3.msra.mxu1 %v9970_v15 }
0x1844   :  { %8328 = vmatprep.subr.mxu1 %v11011_v2 }
0x1845   :  { %8329 = vmatpush3.msra.mxu1 %v9975_v0 }
0x1846   :  { %8330 = vmatprep.subr.mxu1 %v11011_v2 }
0x1847   :  { %8331 = vmatpush3.msra.mxu1 %v9980_v16 }
0x1848   :  { %8332 = vmatprep.subr.mxu1 %v11011_v2 }
0x1849   :  { %8333 = vmatpush3.msra.mxu1 %v9985_v17 }
0x184a   :  { %8334 = vmatprep.subr.mxu1 %v11011_v2 }
0x184b   :  { %8335 = vmatpush3.msra.mxu1 %v9990_v18 }
0x184c   :  { %8336 = vmatprep.subr.mxu1 %v11011_v2 }
0x184d   :  { %8337 = vmatpush3.msra.mxu1 %v9995_v19 }
0x184e   :  { %8338 = vmatprep.subr.mxu1 %v11011_v2 }
0x184f   :  { %8339 = vmatpush3.msra.mxu1 %v10000_v20 }
0x1850   :  { %8340 = vmatprep.subr.mxu1 %v11011_v2 }
0x1851   :  { %8341 = vmatpush3.msra.mxu1 %v10005_v21 }
0x1852   :  { %8342 = vmatprep.subr.mxu1 %v11011_v2 }
0x1853   :  { %8343 = vmatpush3.msra.mxu1 %v10010_v22 }
0x1854   :  { %8344 = vmatprep.subr.mxu1 %v11011_v2 }
0x1855   :  { %8345 = vmatpush3.msra.mxu1 %v10015_v24 }
0x1856   :  { %8346 = vmatprep.subr.mxu1 %v11011_v2 }
0x18f6   :  { %v2746_v34 = vpop.f32.mrf.mxu1 }
0x18f7   :  { %v2747_v25 = vadd.f32 %v9930_v33, %v2746_v34  ;;  %v10020_v34 = vld [vmem:[%s11044_s4 + $0x8] sm:$0xff] }
0x18f8   :  { %v8296_v3 = vpop.f32.mrf.mxu1  ;;  %8347 = vmatpush3.msra.mxu1 %v10020_v34 }
0x18f9   :  { %v2753_v26 = vand.u32 2147483647, %v2747_v25  ;;  %v2750_v55 = vmax.f32 %v2747_v25, 0.0  ;;  %vm2751_vm8 = vcmp.ne.f32.partialorder %v2747_v25, %v2747_v25  ;;  %8348 = vmatprep.subr.mxu1 %v11011_v2  ;;  %v10032_v3 = vld [vmem:[%s11045_s28] ss:$0 sm:$0xff] }
0x18fa   :  { %v9933_v27 = vpop.f32.mrf.mxu1 }
0x18fb   :  { %v2754_v28 = vsub.f32 0.0, %v2753_v26  ;;  %v10035_v26 = vld [vmem:[%s11046_s1] ss:$0 sm:$0xff] }
0x18fc   :  { %v8312_v5 = vpop.f32.mrf.mxu1 }
0x18fd   :  { %v2755_v36 = vmul.f32 1.442695, %v2754_v28  ;;  %v10039_v5 = vadd.f32 %v10032_v3, %v9933_v27 }
0x18ff   :  { %9009 = vpow2.f32 %v2755_v36 }
0x190c   :  { %v9010_v37 = vpop.eup %9009 }
0x190d   :  { %v2757_v6 = vadd.f32 1.0, %v9010_v37  ;;  %v2760_v41 = vmul.f32 -0.5, %v9010_v37  ;;  %v2763_v49 = vand.u32 2147483647, %v9010_v37 }
0x190f   :  { %9011 = vlog2.f32 %v2757_v6  ;;  %v2761_v42 = vadd.f32 1.0, %v2760_v41  ;;  %vm2764_vm7 = vcmp.lt.f32.partialorder %v2763_v49, 0.0004427343  ;;  %v10045_v6 = vld [vmem:[%s11047_s2] ss:$0 sm:$0xff] }
0x1911   :  { %v2762_v54 = vmul.f32 %v9010_v37, %v2761_v42 }
0x191c   :  { %v9012_v51 = vpop.eup %9011 }
0x191d   :  { %v2759_v52 = vmul.f32 0.6931472, %v9012_v51 }
0x191f   :  { %v2765_v56 = vsel %vm2764_vm7, %v2762_v54, %v2759_v52 }
0x1920   :  { %v2766_v58 = vadd.f32 %v2765_v56, %v2750_v55 }
0x1922   :  { %v2767_v61 = vsel %vm2751_vm8, %v2747_v25, %v2766_v58  ;;  %v10025_v25 = vld [vmem:[%s11044_s4] sm:$0xff] }
0x1923   :  { %8306 = vmatmul.mubr.msk.f32.vlgmr.msra.gmra.mxu0 %vm329_vm3, %v2767_v61  ;;  %8349 = vmatpush3.msra.mxu1 %v10025_v25 }
0x1924   :  { %8314 = vmatpush3.msk.msra.mxu0 %vm255_vm0, %v9936_v59  ;;  %8315 = vmatprep.mubr.msk.f32.mxu0 %vm9290_vm1, %v11011_v2 }
0x1925   :  { %8353 = vmatprep.subr.mxu0 %v11011_v2  ;;  %8397 = vmatprep.subr.mxu1 %v11011_v2 }
0x1927   :  { %8316 = vmatmul.mubr.msk.f32.vlgmr.msra.gmra.mxu0 %vm251_vm2, %v9841_v7 }
0x1928   :  { %8354 = vmatpush3.msk.msra.mxu0 %vm255_vm0, %v9831_v9  ;;  %8355 = vmatprep.mubr.msk.f32.mxu0 %vm9290_vm1, %v11011_v2 }
0x1929   :  { %8358 = vmatprep.subr.mxu0 %v11011_v2 }
0x19e3   :  { %v2837_v28 = vpop.f32.mrf.mxu0 }
0x19e4   :  { %v10042_v36 = vadd.f32 %v10035_v26, %v2837_v28 }
0x19e5   :  { %v8307_v37 = vpop.f32.mrf.mxu0 }
0x19e7   :  { %v2983_v42 = vpop.f32.mrf.mxu0 }
0x19e8   :  { %v2984_v49 = vadd.f32 %v10045_v6, %v2983_v42 }
0x19e9   :  { %v8317_v51 = vpop.f32.mrf.mxu0 }
0x19ea   :  { %v2990_v52 = vand.u32 2147483647, %v2984_v49  ;;  %v2987_v44 = vmax.f32 %v2984_v49, 0.0  ;;  %vm2988_vm10 = vcmp.ne.f32.partialorder %v2984_v49, %v2984_v49  ;;  %v11050_v51 = vmov 0.0  }
0x19ec   :  { %v2991_v54 = vsub.f32 0.0, %v2990_v52  ;;  %v10056_v52 = vld [vmem:[%s11048_s7] ss:$0 sm:$0xff] }
0x19ee   :  { %v2992_v55 = vmul.f32 1.442695, %v2991_v54 }
0x19f0   :  { %9013 = vpow2.f32 %v2992_v55 }
0x19fd   :  { %v9014_v56 = vpop.eup %9013 }
0x19fe   :  { %v2994_v27 = vadd.f32 1.0, %v9014_v56  ;;  %v2997_v58 = vmul.f32 -0.5, %v9014_v56  ;;  %v3000_v28 = vand.u32 2147483647, %v9014_v56 }
0x1a00   :  { %9015 = vlog2.f32 %v2994_v27  ;;  %v2998_v61 = vadd.f32 1.0, %v2997_v58  ;;  %vm3001_vm9 = vcmp.lt.f32.partialorder %v3000_v28, 0.0004427343 }
0x1a02   :  { %v2999_v2 = vmul.f32 %v9014_v56, %v2998_v61 }
0x1a0d   :  { %v9016_v37 = vpop.eup %9015 }
0x1a0e   :  { %v2996_v45 = vmul.f32 0.6931472, %v9016_v37 }
0x1a10   :  { %v3002_v41 = vsel %vm3001_vm9, %v2999_v2, %v2996_v45 }
0x1a11   :  { %v3003_v43 = vadd.f32 %v3002_v41, %v2987_v44  ;;  %v3102_v41 = vld [vmem:[%s11049_s10] sm:$0xff] }
0x1a13   :  { %v3004_v42 = vsel %vm2988_vm10, %v2984_v49, %v3003_v43  ;;  %v3100_v43 = vmul.f32 0.01, %v10042_v36 }
0x1a14   :  { %8351 = vmatmul.mubr.f32.vlgmr.msra.gmra.mxu1 %v3004_v42  ;;  %v11051_v42 = vsub.f32 %v10042_v36, %v10039_v5 }
0x1a15   :  { %8398 = vmatpush3.msk.msra.mxu1 %vm255_vm0, %v9936_v59  ;;  %8399 = vmatprep.mubr.msk.f32.mxu1 %vm9290_vm1, %v11050_v51  ;;  %v3101_v27 = vadd.f32 %v3100_v43, %v9841_v7  ;;  %v1740_v7 = vadd.f32 %v9807_v57, %v9755_v8 }
0x1a16   :  { %8437 = vmatprep.subr.mxu1 %v11050_v51 }
0x1ad4   :  { %v3071_v54 = vpop.f32.mrf.mxu1 }
0x1ad5   :  { %v3072_v55 = vadd.f32 %v10056_v52, %v3071_v54 }
0x1ad6   :  { %v8352_v56 = vpop.f32.mrf.mxu1 }
0x1ad7   :  { %v7579_v2 = vmul.f32 -1.442695, %v3072_v55 }
0x1ad9   :  { %9017 = vpow2.f32 %v7579_v2 }
0x1ae6   :  { %v9018_v44 = vpop.eup %9017 }
0x1ae7   :  { %v3078_v45 = vadd.f32 1.0, %v9018_v44 }
0x1ae9   :  { %9019 = vrcp.f32 %v3078_v45 }
0x1af6   :  { %v9020_v49 = vpop.eup %9019 }
0x1af7   :  { %v3103_v58 = vmul.f32 %v9020_v49, %v3102_v41  ;;  %v3081_v61 = vand.u32 2147483647, %v9020_v49 }
0x1af9   :  { %v10062_v28 = vadd.f32 %v3103_v58, %v3101_v27  ;;  %vm3082_vm11 = vcmp.gt.f32.partialorder %v3081_v61, 1e-07 }
0x1afa   :  { %v3083_v37 = vsel %vm3082_vm11, %v9020_v49, 1e-07 }
0x1afb   :  { %8356 = vmatmul.mubr.msk.f32.vlgmr.msra.gmra.mxu0 %vm251_vm2, %v10062_v28  ;;  %8400 = vmatmul.mubr.msk.f32.vlgmr.msra.gmra.mxu1 %vm251_vm2, %v10062_v28  ;;  %9021 = vrcp.f32 %v3083_v37 }
0x1afc   :  { %8359 = vmatpush3.msra.mxu0 %v9811_v60  ;;  %8362 = vmatprep.mubr.msk.f32.mxu0 %vm9290_vm1, %v11050_v51 }
0x1afd   :  { %8360 = vmatprep.subr.mxu0 %v11050_v51  ;;  %8438 = vmatpush3.msk.msra.mxu1 %vm255_vm0, %v9831_v9 }
0x1afe   :  { %8361 = vmatpush3.msra.mxu0 %v9816_v62  ;;  %8439 = vmatprep.mubr.msk.f32.mxu1 %vm9290_vm1, %v11050_v51 }
0x1aff   :  { %8365 = vmatprep.subr.mxu0 %v11050_v51  ;;  %8363 = vmatmul.mubr.msk.f32.vlgmr.msra.gmra.mxu0 %vm2242_vm4, %v1740_v7 }
0x1b00   :  { %8366 = vmatpush3.msk.msra.mxu0 %vm255_vm0, %v9844_v40  ;;  %8367 = vmatprep.mubr.msk.f32.mxu0 %vm9290_vm1, %v11050_v51 }
0x1b01   :  { %8370 = vmatprep.subr.mxu0 %v11050_v51  ;;  %8442 = vmatprep.subr.mxu1 %v11050_v51 }
0x1b03   :  { %8368 = vmatmul.mubr.msk.f32.vlgmr.msra.gmra.mxu0 %vm251_vm2, %v10062_v28 }
0x1b04   :  { %8371 = vmatpush3.msra.mxu0 %v9864_v46  ;;  %8378 = vmatprep.mubr.msk.f32.mxu0 %vm9290_vm1, %v11050_v51 }
0x1b05   :  { %8372 = vmatprep.subr.mxu0 %v11050_v51 }
0x1b06   :  { %8373 = vmatpush3.msra.mxu0 %v9867_v47 }
0x1b07   :  { %8374 = vmatprep.subr.mxu0 %v11050_v51 }
0x1b08   :  { %v9022_v8 = vpop.eup %9021  ;;  %8375 = vmatpush3.msra.mxu0 %v9872_v10 }
0x1b09   :  { %8376 = vmatprep.subr.mxu0 %v11050_v51  ;;  %v10100_v54 = vmul.f32 %v9022_v8, %v11051_v42 }
0x1b0a   :  { %8377 = vmatpush3.msra.mxu0 %v9877_v14 }
0x1b0b   :  { %11052 = vst [vmem:[#allocation27_spill] sm:$0xff] %v10100_v54  ;;  %8381 = vmatprep.subr.mxu0 %v11050_v51 }
0x1bbb   :  { %v3174_v55 = vpop.f32.mrf.mxu0  ;;  %v3678_v56 = vpop.f32.mrf.mxu1 }
0x1bbc   :  { %v10105_v2 = vadd.f32 %v9884_v48, %v3174_v55 }
0x1bbd   :  { %v8357_v44 = vpop.f32.mrf.mxu0  ;;  %v8401_v45 = vpop.f32.mrf.mxu1 }
0x1bbe   :  { %11053 = vst [vmem:[#allocation28_spill] sm:$0xff] %v10105_v2  ;;  %v3193_v43 = vmul.f32 %v10105_v2, %v10105_v2 }
0x1bbf   :  { %v3285_v41 = vpop.f32.mrf.mxu0 }
0x1bc0   :  { %v3194_v49 = vsel %vm251_vm2, %v3193_v43, 0.0 }
0x1bc1   :  { %3195 = vadd.xlane.f32.xlu0 %v3194_v49  ;;  %v8364_v5 = vpop.f32.mrf.mxu0 }
0x1bc3   :  { %v3355_v36 = vpop.f32.mrf.mxu0 }
0x1bc4   :  { %v3356_v27 = vadd.f32 %v3355_v36, %v3285_v41 }
0x1bc5   :  { %v8369_v58 = vpop.f32.mrf.mxu0 }
0x1bc6   :  { %v3359_v61 = vadd.f32 %v9892_v53, %v3356_v27 }
0x1bc8   :  { %v3363_v37 = vand.u32 2147483647, %v3359_v61  ;;  %v3360_v49 = vmax.f32 %v3359_v61, 0.0  ;;  %vm3361_vm13 = vcmp.ne.f32.partialorder %v3359_v61, %v3359_v61 }
0x1bca   :  { %v3364_v7 = vsub.f32 0.0, %v3363_v37  ;;  %v10124_v37 = vadd.f32 %v10045_v6, %v3678_v56 }
0x1bcc   :  { %v3365_v8 = vmul.f32 1.442695, %v3364_v7  ;;  %v3685_v7 = vand.u32 2147483647, %v10124_v37  ;;  %vm3683_vm6 = vcmp.ne.f32.partialorder %v10124_v37, %v10124_v37 }
0x1bce   :  { %9023 = vpow2.f32 %v3365_v8 }
0x1bdb   :  { %v9024_v42 = vpop.eup %9023 }
0x1bdc   :  { %v3367_v55 = vadd.f32 1.0, %v9024_v42  ;;  %v3370_v44 = vmul.f32 -0.5, %v9024_v42  ;;  %v3373_v2 = vand.u32 2147483647, %v9024_v42 }
0x1bde   :  { %9025 = vlog2.f32 %v3367_v55  ;;  %v3371_v45 = vadd.f32 1.0, %v3370_v44  ;;  %vm3374_vm12 = vcmp.lt.f32.partialorder %v3373_v2, 0.0004427343  ;;  %v3686_v55 = vsub.f32 0.0, %v3685_v7 }
0x1be0   :  { %v3372_v43 = vmul.f32 %v9024_v42, %v3371_v45  ;;  %v3687_v44 = vmul.f32 1.442695, %v3686_v55 }
0x1beb   :  { %v9026_v54 = vpop.eup %9025 }
0x1bec   :  { %v3369_v50 = vmul.f32 0.6931472, %v9026_v54 }
0x1bee   :  { %v3375_v5 = vsel %vm3374_vm12, %v3372_v43, %v3369_v50 }
0x1bef   :  { %v3376_v41 = vadd.f32 %v3375_v5, %v3360_v49 }
0x1bf1   :  { %v3377_v36 = vsel %vm3361_vm13, %v3359_v61, %v3376_v41 }
0x1bf2   :  { %8379 = vmatmul.mubr.msk.f32.vlgmr.msra.gmra.mxu0 %vm329_vm3, %v3377_v36 }
0x1bf3   :  { %8382 = vmatpush3.msra.mxu0 %v9910_v29  ;;  %8389 = vmatprep.mubr.msk.f32.mxu0 %vm9290_vm1, %v11050_v51 }
0x1bf4   :  { %8383 = vmatprep.subr.mxu0 %v11050_v51 }
0x1bf5   :  { %8384 = vmatpush3.msra.mxu0 %v9913_v30 }
0x1bf6   :  { %8385 = vmatprep.subr.mxu0 %v11050_v51 }
0x1bf7   :  { %8386 = vmatpush3.msra.mxu0 %v9918_v31 }
0x1bf8   :  { %8387 = vmatprep.subr.mxu0 %v11050_v51 }
0x1bf9   :  { %8388 = vmatpush3.msra.mxu0 %v9923_v32 }
0x1bfa   :  { %8392 = vmatprep.subr.mxu0 %v11050_v51 }
0x1cb2   :  { %v3447_v50 = vpop.f32.mrf.mxu0 }
0x1cb3   :  { %v3448_v54 = vadd.f32 %v9930_v33, %v3447_v50 }
0x1cb4   :  { %v8380_v2 = vpop.f32.mrf.mxu0 }
0x1cb5   :  { %v3454_v27 = vand.u32 2147483647, %v3448_v54  ;;  %v3451_v50 = vmax.f32 %v3448_v54, 0.0  ;;  %vm3452_vm15 = vcmp.ne.f32.partialorder %v3448_v54, %v3448_v54 }
0x1cb7   :  { %v3455_v58 = vsub.f32 0.0, %v3454_v27 }
0x1cb9   :  { %v3456_v61 = vmul.f32 1.442695, %v3455_v58 }
0x1cbb   :  { %9027 = vpow2.f32 %v3456_v61 }
0x1cc8   :  { %v9028_v8 = vpop.eup %9027 }
0x1cc9   :  { %v3458_v42 = vadd.f32 1.0, %v9028_v8  ;;  %v3461_v45 = vmul.f32 -0.5, %v9028_v8  ;;  %v3464_v49 = vand.u32 2147483647, %v9028_v8 }
0x1ccb   :  { %9029 = vlog2.f32 %v3458_v42  ;;  %v3462_v43 = vadd.f32 1.0, %v3461_v45  ;;  %vm3465_vm14 = vcmp.lt.f32.partialorder %v3464_v49, 0.0004427343 }
0x1ccc   :  { %9031 = vpow2.f32 %v3687_v44 }
0x1ccd   :  { %v3463_v36 = vmul.f32 %v9028_v8, %v3462_v43  ;;  %v3682_v43 = vmax.f32 %v10124_v37, 0.0 }
0x1cd8   :  { %v9030_v5 = vpop.eup %9029 }
0x1cd9   :  { %v3460_v41 = vmul.f32 0.6931472, %v9030_v5  ;;  %v9032_v58 = vpop.eup %9031 }
0x1cda   :  { %v3689_v61 = vadd.f32 1.0, %v9032_v58  ;;  %v3695_v42 = vand.u32 2147483647, %v9032_v58 }
0x1cdb   :  { %v3466_v2 = vsel %vm3465_vm14, %v3463_v36, %v3460_v41 }
0x1cdc   :  { %v3467_v27 = vadd.f32 %v3466_v2, %v3451_v50  ;;  %9033 = vlog2.f32 %v3689_v61  ;;  %vm3696_vm5 = vcmp.lt.f32.partialorder %v3695_v42, 0.0004427343 }
0x1cde   :  { %v3468_v56 = vsel %vm3452_vm15, %v3448_v54, %v3467_v27  ;;  %v3692_v54 = vmul.f32 -0.5, %v9032_v58 }
0x1cdf   :  { %8390 = vmatmul.mubr.msk.f32.vlgmr.msra.gmra.mxu0 %vm329_vm3, %v3468_v56 }
0x1ce0   :  { %8393 = vmatpush3.msk.msra.mxu0 %vm255_vm0, %v9897_v23  ;;  %8394 = vmatprep.mubr.msk.f32.mxu0 %vm9290_vm1, %v11050_v51  ;;  %v3693_v8 = vadd.f32 1.0, %v3692_v54 }
0x1ce1   :  { %8402 = vmatprep.subr.mxu0 %v11050_v51 }
0x1ce2   :  { %v3694_v44 = vmul.f32 %v9032_v58, %v3693_v8 }
0x1ce3   :  { %8395 = vmatmul.mubr.msk.f32.vlgmr.msra.gmra.mxu0 %vm251_vm2, %v10062_v28 }
0x1ce4   :  { %8403 = vmatpush3.msra.mxu0 %v9952_v4  ;;  %8434 = vmatprep.mubr.msk.f32.mxu0 %vm9290_vm1, %v11050_v51 }
0x1ce5   :  { %8404 = vmatprep.subr.mxu0 %v11050_v51 }
0x1ce6   :  { %8405 = vmatpush3.msra.mxu0 %v9955_v11 }
0x1ce7   :  { %8406 = vmatprep.subr.mxu0 %v11050_v51 }
0x1ce8   :  { %8407 = vmatpush3.msra.mxu0 %v9960_v12 }
0x1ce9   :  { %8408 = vmatprep.subr.mxu0 %v11050_v51  ;;  %v9034_v7 = vpop.eup %9033 }
0x1cea   :  { %8409 = vmatpush3.msra.mxu0 %v9965_v13  ;;  %v3691_v55 = vmul.f32 0.6931472, %v9034_v7 }
0x1ceb   :  { %8410 = vmatprep.subr.mxu0 %v11050_v51 }
0x1cec   :  { %8411 = vmatpush3.msra.mxu0 %v9970_v15  ;;  %v3697_v45 = vsel %vm3696_vm5, %v3694_v44, %v3691_v55  ;;  %v7593_v44 = vld [vmem:[%s11049_s10 + $0x8] sm:$0xff] }
0x1ced   :  { %8412 = vmatprep.subr.mxu0 %v11050_v51  ;;  %v3698_v49 = vadd.f32 %v3697_v45, %v3682_v43 }
0x1cee   :  { %8413 = vmatpush3.msra.mxu0 %v9975_v0 }
0x1cef   :  { %8414 = vmatprep.subr.mxu0 %v11050_v51  ;;  %v3699_v5 = vsel %vm3683_vm6, %v10124_v37, %v3698_v49 }
0x1cf0   :  { %8415 = vmatpush3.msra.mxu0 %v9980_v16 }
0x1cf1   :  { %8416 = vmatprep.subr.mxu0 %v11050_v51 }
0x1cf2   :  { %8417 = vmatpush3.msra.mxu0 %v9985_v17 }
0x1cf3   :  { %8418 = vmatprep.subr.mxu0 %v11050_v51 }
0x1cf4   :  { %8419 = vmatpush3.msra.mxu0 %v9990_v18 }
0x1cf5   :  { %8420 = vmatprep.subr.mxu0 %v11050_v51 }
0x1cf6   :  { %8421 = vmatpush3.msra.mxu0 %v9995_v19 }
0x1cf7   :  { %8422 = vmatprep.subr.mxu0 %v11050_v51 }
0x1cf8   :  { %8423 = vmatpush3.msra.mxu0 %v10000_v20 }
0x1cf9   :  { %8424 = vmatprep.subr.mxu0 %v11050_v51 }
0x1cfa   :  { %8425 = vmatpush3.msra.mxu0 %v10005_v21 }
0x1cfb   :  { %8426 = vmatprep.subr.mxu0 %v11050_v51 }
0x1cfc   :  { %8427 = vmatpush3.msra.mxu0 %v10010_v22 }
0x1cfd   :  { %8428 = vmatprep.subr.mxu0 %v11050_v51 }
0x1cfe   :  { %8429 = vmatpush3.msra.mxu0 %v10015_v24 }
0x1cff   :  { %8430 = vmatprep.subr.mxu0 %v11050_v51 }
0x1d00   :  { %8431 = vmatpush3.msra.mxu0 %v10020_v34 }
0x1d01   :  { %8432 = vmatprep.subr.mxu0 %v11050_v51 }
0x1d02   :  { %8433 = vmatpush3.msra.mxu0 %v10025_v25 }
0x1d03   :  { %8435 = vmatmul.mubr.f32.vlgmr.msra.gmra.mxu0 %v3699_v5  ;;  %8481 = vmatprep.subr.mxu0 %v11050_v51 }
0x1d04   :  { %8482 = vmatpush3.msk.msra.mxu0 %vm255_vm0, %v9936_v59  ;;  %8483 = vmatprep.mubr.msk.f32.mxu0 %vm9290_vm1, %v11050_v51 }
0x1d05   :  { %8521 = vmatprep.subr.mxu0 %v11050_v51 }
0x1d9f   :  { %v3538_v41 = vpop.f32.mrf.mxu0 }
0x1da0   :  { %v3539_v2 = vadd.f32 %v10035_v26, %v3538_v41 }
0x1da1   :  { %v8391_v36 = vpop.f32.mrf.mxu0 }
0x1da2   :  { %v3795_v55 = vmul.f32 0.01, %v3539_v2 }
0x1da3   :  { %v3608_v50 = vpop.f32.mrf.mxu0 }
0x1da4   :  { %v3609_v27 = vadd.f32 %v10032_v3, %v3608_v50  ;;  %v3796_v43 = vadd.f32 %v3795_v55, %v10062_v28  ;;  %v1493_v28 = vadd.f32 %v9807_v57, %v9718_v38 }
0x1da5   :  { %v8396_v37 = vpop.f32.mrf.mxu0 }
0x1da6   :  { %v3779_v56 = vsub.f32 %v3539_v2, %v3609_v27 }
0x1dc3   :  { %v3766_v58 = vpop.f32.mrf.mxu0 }
0x1dc4   :  { %v3767_v61 = vadd.f32 %v10056_v52, %v3766_v58 }
0x1dc5   :  { %v8436_v54 = vpop.f32.mrf.mxu0 }
0x1dc6   :  { %v7592_v7 = vmul.f32 -1.442695, %v3767_v61 }
0x1dc8   :  { %9035 = vpow2.f32 %v7592_v7 }
0x1dd5   :  { %v9036_v8 = vpop.eup %9035 }
0x1dd6   :  { %v3773_v42 = vadd.f32 1.0, %v9036_v8 }
0x1dd8   :  { %9037 = vrcp.f32 %v3773_v42 }
0x1de5   :  { %v9038_v45 = vpop.eup %9037 }
0x1de6   :  { %v3799_v49 = vmul.f32 %v9038_v45, %v7593_v44  ;;  %v3776_v5 = vand.u32 2147483647, %v9038_v45 }
0x1de8   :  { %v10183_v41 = vadd.f32 %v3799_v49, %v3796_v43  ;;  %vm3777_vm7 = vcmp.gt.f32.partialorder %v3776_v5, 1e-07 }
0x1de9   :  { %v3778_v36 = vsel %vm3777_vm7, %v9038_v45, 1e-07 }
0x1dea   :  { %8440 = vmatmul.mubr.msk.f32.vlgmr.msra.gmra.mxu1 %vm251_vm2, %v10183_v41  ;;  %8484 = vmatmul.mubr.msk.f32.vlgmr.msra.gmra.mxu0 %vm251_vm2, %v10183_v41  ;;  %9039 = vrcp.f32 %v3778_v36 }
0x1deb   :  { %8443 = vmatpush3.msra.mxu1 %v9811_v60  ;;  %8446 = vmatprep.mubr.msk.f32.mxu1 %vm9290_vm1, %v11050_v51 }
0x1dec   :  { %8444 = vmatprep.subr.mxu1 %v11050_v51  ;;  %8522 = vmatpush3.msk.msra.mxu0 %vm255_vm0, %v9831_v9 }
0x1ded   :  { %8445 = vmatpush3.msra.mxu1 %v9816_v62  ;;  %8523 = vmatprep.mubr.msk.f32.mxu0 %vm9290_vm1, %v11050_v51 }
0x1dee   :  { %8449 = vmatprep.subr.mxu1 %v11050_v51  ;;  %8447 = vmatmul.mubr.msk.f32.vlgmr.msra.gmra.mxu1 %vm2242_vm4, %v1493_v28 }
0x1def   :  { %8450 = vmatpush3.msk.msra.mxu1 %vm255_vm0, %v9844_v40  ;;  %8451 = vmatprep.mubr.msk.f32.mxu1 %vm9290_vm1, %v11050_v51 }
0x1df0   :  { %8454 = vmatprep.subr.mxu1 %v11050_v51  ;;  %8526 = vmatprep.subr.mxu0 %v11050_v51 }
0x1df2   :  { %8452 = vmatmul.mubr.msk.f32.vlgmr.msra.gmra.mxu1 %vm251_vm2, %v10183_v41 }
0x1df3   :  { %8455 = vmatpush3.msra.mxu1 %v9864_v46  ;;  %8462 = vmatprep.mubr.msk.f32.mxu1 %vm9290_vm1, %v11050_v51 }
0x1df4   :  { %8456 = vmatprep.subr.mxu1 %v11050_v51 }
0x1df5   :  { %8457 = vmatpush3.msra.mxu1 %v9867_v47 }
0x1df6   :  { %8458 = vmatprep.subr.mxu1 %v11050_v51 }
0x1df7   :  { %v9040_v38 = vpop.eup %9039  ;;  %8459 = vmatpush3.msra.mxu1 %v9872_v10 }
0x1df8   :  { %8460 = vmatprep.subr.mxu1 %v11050_v51  ;;  %v10218_v57 = vmul.f32 %v9040_v38, %v3779_v56 }
0x1df9   :  { %8461 = vmatpush3.msra.mxu1 %v9877_v14 }
0x1dfa   :  { %11054 = vst [vmem:[#allocation29_spill] sm:$0xff] %v10218_v57  ;;  %8465 = vmatprep.subr.mxu1 %v11050_v51 }
0x1eaa   :  { %v3870_v60 = vpop.f32.mrf.mxu1  ;;  %v4374_v62 = vpop.f32.mrf.mxu0 }
0x1eab   :  { %v10223_v9 = vadd.f32 %v9884_v48, %v3870_v60 }
0x1eac   :  { %v8441_v40 = vpop.f32.mrf.mxu1  ;;  %v8485_v46 = vpop.f32.mrf.mxu0 }
0x1ead   :  { %v3889_v47 = vmul.f32 %v10223_v9, %v10223_v9 }
0x1eae   :  { %v3981_v50 = vpop.f32.mrf.mxu1 }
0x1eaf   :  { %v3890_v10 = vsel %vm251_vm2, %v3889_v47, 0.0 }
0x1eb0   :  { %3891 = vadd.xlane.f32.xlu0 %v3890_v10  ;;  %v8448_v2 = vpop.f32.mrf.mxu1 }
0x1eb2   :  { %v4051_v27 = vpop.f32.mrf.mxu1 }
0x1eb3   :  { %v4052_v37 = vadd.f32 %v4051_v27, %v3981_v50 }
0x1eb4   :  { %v8453_v14 = vpop.f32.mrf.mxu1 }
0x1eb5   :  { %v4055_v56 = vadd.f32 %v9892_v53, %v4052_v37 }
0x1eb7   :  { %v4059_v58 = vand.u32 2147483647, %v4055_v56  ;;  %v4056_v49 = vmax.f32 %v4055_v56, 0.0  ;;  %vm4057_vm9 = vcmp.ne.f32.partialorder %v4055_v56, %v4055_v56 }
0x1eb9   :  { %v4060_v61 = vsub.f32 0.0, %v4059_v58 }
0x1ebb   :  { %v4061_v54 = vmul.f32 1.442695, %v4060_v61 }
0x1ebd   :  { %9041 = vpow2.f32 %v4061_v54 }
0x1eca   :  { %v9042_v48 = vpop.eup %9041 }
0x1ecb   :  { %v4063_v7 = vadd.f32 1.0, %v9042_v48  ;;  %v4066_v8 = vmul.f32 -0.5, %v9042_v48  ;;  %v4069_v55 = vand.u32 2147483647, %v9042_v48 }
0x1ecd   :  { %9043 = vlog2.f32 %v4063_v7  ;;  %v4067_v42 = vadd.f32 1.0, %v4066_v8  ;;  %vm4070_vm8 = vcmp.lt.f32.partialorder %v4069_v55, 0.0004427343 }
0x1ecf   :  { %v4068_v43 = vmul.f32 %v9042_v48, %v4067_v42 }
0x1eda   :  { %v9044_v44 = vpop.eup %9043 }
0x1edb   :  { %v4065_v45 = vmul.f32 0.6931472, %v9044_v44 }
0x1edd   :  { %v4071_v5 = vsel %vm4070_vm8, %v4068_v43, %v4065_v45 }
0x1ede   :  { %v4072_v36 = vadd.f32 %v4071_v5, %v4056_v49  ;;  %v7607_v49 = vld [vmem:[%s11049_s10 + $0x10] sm:$0xff] }
0x1ee0   :  { %v4073_v28 = vsel %vm4057_vm9, %v4055_v56, %v4072_v36 }
0x1ee1   :  { %8463 = vmatmul.mubr.msk.f32.vlgmr.msra.gmra.mxu1 %vm329_vm3, %v4073_v28 }
0x1ee2   :  { %8466 = vmatpush3.msra.mxu1 %v9910_v29  ;;  %8473 = vmatprep.mubr.msk.f32.mxu1 %vm9290_vm1, %v11050_v51 }
0x1ee3   :  { %8467 = vmatprep.subr.mxu1 %v11050_v51 }
0x1ee4   :  { %8468 = vmatpush3.msra.mxu1 %v9913_v30  ;;  %v10242_v30 = vadd.f32 %v10045_v6, %v4374_v62 }
0x1ee5   :  { %8469 = vmatprep.subr.mxu1 %v11050_v51 }
0x1ee6   :  { %8470 = vmatpush3.msra.mxu1 %v9918_v31  ;;  %v4381_v47 = vand.u32 2147483647, %v10242_v30  ;;  %vm4379_vm13 = vcmp.ne.f32.partialorder %v10242_v30, %v10242_v30 }
0x1ee7   :  { %8471 = vmatprep.subr.mxu1 %v11050_v51 }
0x1ee8   :  { %8472 = vmatpush3.msra.mxu1 %v9923_v32  ;;  %v4382_v10 = vsub.f32 0.0, %v4381_v47  ;;  %v10356_v47 = vld [vmem:[%s11034_s29 + $0x8] sm:$0xff] }
0x1ee9   :  { %8476 = vmatprep.subr.mxu1 %v11050_v51 }
0x1eea   :  { %v4383_v32 = vmul.f32 1.442695, %v4382_v10 }
0x1fa1   :  { %v4143_v53 = vpop.f32.mrf.mxu1 }
0x1fa2   :  { %v4144_v29 = vadd.f32 %v9930_v33, %v4143_v53  ;;  %v10308_v53 = vld [vmem:[%s9374_s12 + $0x8] sm:$0xff] }
0x1fa3   :  { %v8464_v38 = vpop.f32.mrf.mxu1 }
0x1fa4   :  { %v4150_v60 = vand.u32 2147483647, %v4144_v29  ;;  %v4147_v58 = vmax.f32 %v4144_v29, 0.0  ;;  %vm4148_vm11 = vcmp.ne.f32.partialorder %v4144_v29, %v4144_v29  ;;  %v10320_v38 = vld [vmem:[%s9434_s13] sm:$0xf] }
0x1fa6   :  { %v4151_v40 = vsub.f32 0.0, %v4150_v60  ;;  %v10325_v60 = vld [vmem:[%s9374_s12] sm:$0xff] }
0x1fa8   :  { %v4152_v46 = vmul.f32 1.442695, %v4151_v40  ;;  %v10344_v40 = vld [vmem:[%s11034_s29 + $0x18] sm:$0xff] }
0x1faa   :  { %9045 = vpow2.f32 %v4152_v46  ;;  %v10351_v46 = vld [vmem:[%s11034_s29 + $0x10] sm:$0xff] }
0x1fb7   :  { %v9046_v31 = vpop.eup %9045 }
0x1fb8   :  { %v4154_v50 = vadd.f32 1.0, %v9046_v31  ;;  %v4157_v2 = vmul.f32 -0.5, %v9046_v31  ;;  %v4160_v37 = vand.u32 2147483647, %v9046_v31 }
0x1fba   :  { %9047 = vlog2.f32 %v4154_v50  ;;  %v4158_v27 = vadd.f32 1.0, %v4157_v2  ;;  %vm4161_vm10 = vcmp.lt.f32.partialorder %v4160_v37, 0.0004427343  ;;  %v10363_v50 = vld [vmem:[%s11034_s29] sm:$0xff] }
0x1fbb   :  { %9049 = vpow2.f32 %v4383_v32  ;;  %v10368_v2 = vld [vmem:[%s11035_s3] ss:$0 sm:$0xff] }
0x1fbc   :  { %v4159_v56 = vmul.f32 %v9046_v31, %v4158_v27 }
0x1fc7   :  { %v9048_v33 = vpop.eup %9047 }
0x1fc8   :  { %v4156_v14 = vmul.f32 0.6931472, %v9048_v33  ;;  %v9050_v48 = vpop.eup %9049 }
0x1fc9   :  { %v4385_v7 = vadd.f32 1.0, %v9050_v48 }
0x1fca   :  { %v4162_v61 = vsel %vm4161_vm10, %v4159_v56, %v4156_v14 }
0x1fcb   :  { %v4163_v54 = vadd.f32 %v4162_v61, %v4147_v58  ;;  %9051 = vlog2.f32 %v4385_v7  ;;  %v10377_v7 = vld [vmem:[%s11038_s14] ss:$0 sm:$0xff] }
0x1fcd   :  { %v4164_v62 = vsel %vm4148_vm11, %v4144_v29, %v4163_v54 }
0x1fce   :  { %8474 = vmatmul.mubr.msk.f32.vlgmr.msra.gmra.mxu1 %vm329_vm3, %v4164_v62 }
0x1fcf   :  { %8477 = vmatpush3.msk.msra.mxu1 %vm255_vm0, %v9897_v23  ;;  %8478 = vmatprep.mubr.msk.f32.mxu1 %vm9290_vm1, %v11050_v51  ;;  %v4388_v23 = vmul.f32 -0.5, %v9050_v48 }
0x1fd0   :  { %8486 = vmatprep.subr.mxu1 %v11050_v51 }
0x1fd2   :  { %8479 = vmatmul.mubr.msk.f32.vlgmr.msra.gmra.mxu1 %vm251_vm2, %v10183_v41 }
0x1fd3   :  { %8487 = vmatpush3.msra.mxu1 %v9952_v4  ;;  %8518 = vmatprep.mubr.msk.f32.mxu1 %vm9290_vm1, %v11050_v51 }
0x1fd4   :  { %8488 = vmatprep.subr.mxu1 %v11050_v51 }
0x1fd5   :  { %8489 = vmatpush3.msra.mxu1 %v9955_v11  ;;  %v4389_v11 = vadd.f32 1.0, %v4388_v23 }
0x1fd6   :  { %8490 = vmatprep.subr.mxu1 %v11050_v51 }
0x1fd7   :  { %8491 = vmatpush3.msra.mxu1 %v9960_v12  ;;  %v4391_v12 = vand.u32 2147483647, %v9050_v48 }
0x1fd8   :  { %8492 = vmatprep.subr.mxu1 %v11050_v51  ;;  %v9052_v4 = vpop.eup %9051 }
0x1fd9   :  { %8493 = vmatpush3.msra.mxu1 %v9965_v13  ;;  %v4387_v13 = vmul.f32 0.6931472, %v9052_v4  ;;  %vm4392_vm12 = vcmp.lt.f32.partialorder %v4391_v12, 0.0004427343 }
0x1fda   :  { %8494 = vmatprep.subr.mxu1 %v11050_v51 }
0x1fdb   :  { %8495 = vmatpush3.msra.mxu1 %v9970_v15  ;;  %v4390_v15 = vmul.f32 %v9050_v48, %v4389_v11 }
0x1fdc   :  { %8496 = vmatprep.subr.mxu1 %v11050_v51 }
0x1fdd   :  { %8497 = vmatpush3.msra.mxu1 %v9975_v0  ;;  %v4393_v0 = vsel %vm4392_vm12, %v4390_v15, %v4387_v13 }
0x1fde   :  { %8498 = vmatprep.subr.mxu1 %v11050_v51 }
0x1fdf   :  { %8499 = vmatpush3.msra.mxu1 %v9980_v16  ;;  %v4378_v16 = vmax.f32 %v10242_v30, 0.0 }
0x1fe0   :  { %8500 = vmatprep.subr.mxu1 %v11050_v51 }
0x1fe1   :  { %8501 = vmatpush3.msra.mxu1 %v9985_v17  ;;  %v4394_v17 = vadd.f32 %v4393_v0, %v4378_v16 }
0x1fe2   :  { %8502 = vmatprep.subr.mxu1 %v11050_v51 }
0x1fe3   :  { %8503 = vmatpush3.msra.mxu1 %v9990_v18  ;;  %v4395_v18 = vsel %vm4379_vm13, %v10242_v30, %v4394_v17 }
0x1fe4   :  { %8504 = vmatprep.subr.mxu1 %v11050_v51 }
0x1fe5   :  { %8505 = vmatpush3.msra.mxu1 %v9995_v19 }
0x1fe6   :  { %8506 = vmatprep.subr.mxu1 %v11050_v51 }
0x1fe7   :  { %8507 = vmatpush3.msra.mxu1 %v10000_v20 }
0x1fe8   :  { %8508 = vmatprep.subr.mxu1 %v11050_v51 }
0x1fe9   :  { %8509 = vmatpush3.msra.mxu1 %v10005_v21 }
0x1fea   :  { %8510 = vmatprep.subr.mxu1 %v11050_v51 }
0x1feb   :  { %8511 = vmatpush3.msra.mxu1 %v10010_v22 }
0x1fec   :  { %8512 = vmatprep.subr.mxu1 %v11050_v51 }
0x1fed   :  { %8513 = vmatpush3.msra.mxu1 %v10015_v24 }
0x1fee   :  { %8514 = vmatprep.subr.mxu1 %v11050_v51 }
0x1fef   :  { %8515 = vmatpush3.msra.mxu1 %v10020_v34 }
0x1ff0   :  { %8516 = vmatprep.subr.mxu1 %v11050_v51 }
0x1ff1   :  { %8517 = vmatpush3.msra.mxu1 %v10025_v25 }
0x1ff2   :  { %8519 = vmatmul.mubr.f32.vlgmr.msra.gmra.mxu1 %v4395_v18  ;;  %8565 = vmatprep.subr.mxu1 %v11050_v51 }
0x1ff3   :  { %8566 = vmatpush3.msk.msra.mxu1 %vm255_vm0, %v9936_v59  ;;  %8567 = vmatprep.mubr.msk.f32.mxu1 %vm9290_vm1, %v11050_v51 }
0x1ff4   :  { %8605 = vmatprep.subr.mxu1 %v11050_v51 }
0x208e   :  { %v4234_v19 = vpop.f32.mrf.mxu1 }
0x208f   :  { %v4235_v22 = vadd.f32 %v10035_v26, %v4234_v19 }
0x2090   :  { %v8475_v20 = vpop.f32.mrf.mxu1 }
0x2091   :  { %v4491_v43 = vmul.f32 0.01, %v4235_v22 }
0x2092   :  { %v4304_v21 = vpop.f32.mrf.mxu1 }
0x2093   :  { %v4305_v24 = vadd.f32 %v10032_v3, %v4304_v21  ;;  %v4492_v26 = vadd.f32 %v4491_v43, %v10183_v41  ;;  %v10314_v41 = vld [vmem:[%s9344_s8] ss:$0 sm:$0xff] }
0x2094   :  { %v8480_v34 = vpop.f32.mrf.mxu1  ;;  %v1246_v29 = vadd.f32 %v10314_v41, %v9681_v63  ;;  %v10333_v63 = vld [vmem:[%s11033_s25] sm:$0xf] }
0x2095   :  { %v4475_v25 = vsub.f32 %v4235_v22, %v4305_v24 }
0x20b2   :  { %v4462_v8 = vpop.f32.mrf.mxu1 }
0x20b3   :  { %v4463_v42 = vadd.f32 %v10056_v52, %v4462_v8  ;;  %v10389_v8 = vld [vmem:[%s11041_s24 + $0x10] sm:$0xff] }
0x20b4   :  { %v8520_v55 = vpop.f32.mrf.mxu1 }
0x20b5   :  { %v7606_v59 = vmul.f32 -1.442695, %v4463_v42  ;;  %v10394_v42 = vld [vmem:[%s11041_s24 + $0x8] sm:$0xff]  ;;  %v10399_v55 = vld [vmem:[%s11041_s24] sm:$0xff] }
0x20b7   :  { %9053 = vpow2.f32 %v7606_v59 }
0x20c4   :  { %v9054_v44 = vpop.eup %9053 }
0x20c5   :  { %v4469_v45 = vadd.f32 1.0, %v9054_v44  ;;  %v10404_v44 = vld [vmem:[%s11042_s30] ss:$0 sm:$0xff] }
0x20c7   :  { %9055 = vrcp.f32 %v4469_v45 }
0x20d4   :  { %v9056_v5 = vpop.eup %9055 }
0x20d5   :  { %v4495_v3 = vmul.f32 %v9056_v5, %v7607_v49  ;;  %v4472_v36 = vand.u32 2147483647, %v9056_v5 }
0x20d7   :  { %v10301_v28 = vadd.f32 %v4495_v3, %v4492_v26  ;;  %vm4473_vm14 = vcmp.gt.f32.partialorder %v4472_v36, 1e-07 }
0x20d8   :  { %v4474_v52 = vsel %vm4473_vm14, %v9056_v5, 1e-07 }
0x20d9   :  { %8524 = vmatmul.mubr.msk.f32.vlgmr.msra.gmra.mxu0 %vm251_vm2, %v10301_v28  ;;  %8568 = vmatmul.mubr.msk.f32.vlgmr.msra.gmra.mxu1 %vm251_vm2, %v10301_v28  ;;  %9057 = vrcp.f32 %v4474_v52 }
0x20da   :  { %8527 = vmatpush3.msra.mxu0 %v10308_v53  ;;  %8530 = vmatprep.mubr.msk.f32.mxu0 %vm9290_vm1, %v11050_v51 }
0x20db   :  { %8528 = vmatprep.subr.mxu0 %v11050_v51  ;;  %8606 = vmatpush3.msk.msra.mxu1 %vm255_vm0, %v10320_v38 }
0x20dc   :  { %8529 = vmatpush3.msra.mxu0 %v10325_v60  ;;  %8607 = vmatprep.mubr.msk.f32.mxu1 %vm9290_vm1, %v11050_v51 }
0x20dd   :  { %8533 = vmatprep.subr.mxu0 %v11050_v51  ;;  %8531 = vmatmul.mubr.msk.f32.vlgmr.msra.gmra.mxu0 %vm2242_vm4, %v1246_v29 }
0x20de   :  { %8534 = vmatpush3.msk.msra.mxu0 %vm255_vm0, %v10333_v63  ;;  %8535 = vmatprep.mubr.msk.f32.mxu0 %vm9290_vm1, %v11050_v51 }
0x20df   :  { %8538 = vmatprep.subr.mxu0 %v11050_v51  ;;  %8610 = vmatprep.subr.mxu1 %v11050_v51 }
0x20e1   :  { %8536 = vmatmul.mubr.msk.f32.vlgmr.msra.gmra.mxu0 %vm251_vm2, %v10301_v28 }
0x20e2   :  { %8539 = vmatpush3.msra.mxu0 %v10344_v40  ;;  %8546 = vmatprep.mubr.msk.f32.mxu0 %vm9290_vm1, %v11050_v51 }
0x20e3   :  { %8540 = vmatprep.subr.mxu0 %v11050_v51 }
0x20e4   :  { %8541 = vmatpush3.msra.mxu0 %v10351_v46 }
0x20e5   :  { %8542 = vmatprep.subr.mxu0 %v11050_v51 }
0x20e6   :  { %v9058_v30 = vpop.eup %9057  ;;  %8543 = vmatpush3.msra.mxu0 %v10356_v47 }
0x20e7   :  { %8544 = vmatprep.subr.mxu0 %v11050_v51  ;;  %v10360_v31 = vmul.f32 %v9058_v30, %v4475_v25  ;;  %v10382_v25 = vld [vmem:[%s11041_s24 + $0x18] sm:$0xff] }
0x20e8   :  { %8545 = vmatpush3.msra.mxu0 %v10363_v50 }
0x20e9   :  { %8549 = vmatprep.subr.mxu0 %v11050_v51 }
0x2199   :  { %v4566_v10 = vpop.f32.mrf.mxu0  ;;  %v5070_v32 = vpop.f32.mrf.mxu1 }
0x219a   :  { %v10371_v27 = vadd.f32 %v10368_v2, %v4566_v10  ;;  %v10408_v3 = vadd.f32 %v10045_v6, %v5070_v32 }
0x219b   :  { %v8525_v37 = vpop.f32.mrf.mxu0  ;;  %v8569_v33 = vpop.f32.mrf.mxu1 }
0x219c   :  { %v4585_v14 = vmul.f32 %v10371_v27, %v10371_v27  ;;  %v5077_v36 = vand.u32 2147483647, %v10408_v3  ;;  %vm5075_vm9 = vcmp.ne.f32.partialorder %v10408_v3, %v10408_v3 }
0x219d   :  { %v4677_v56 = vpop.f32.mrf.mxu0 }
0x219e   :  { %v4586_v58 = vsel %vm251_vm2, %v4585_v14, 0.0  ;;  %v5078_v30 = vsub.f32 0.0, %v5077_v36  ;;  %v10486_v36 = vld [vmem:[%s11044_s4 + $0x18] sm:$0xff] }
0x219f   :  { %4587 = vadd.xlane.f32.xlu1 %v4586_v58  ;;  %v8532_v61 = vpop.f32.mrf.mxu0 }
0x21a0   :  { %v5079_v10 = vmul.f32 1.442695, %v5078_v30  ;;  %v10496_v30 = vld [vmem:[%s11044_s4 + $0x8] sm:$0xff] }
0x21a1   :  { %v4747_v54 = vpop.f32.mrf.mxu0 }
0x21a2   :  { %v4748_v62 = vadd.f32 %v4747_v54, %v4677_v56 }
0x21a3   :  { %v8537_v48 = vpop.f32.mrf.mxu0 }
0x21a4   :  { %v4751_v23 = vadd.f32 %v10377_v7, %v4748_v62 }
0x21a6   :  { %v4755_v4 = vand.u32 2147483647, %v4751_v23  ;;  %v4752_v21 = vmax.f32 %v4751_v23, 0.0  ;;  %vm4753_vm5 = vcmp.ne.f32.partialorder %v4751_v23, %v4751_v23 }
0x21a8   :  { %v4756_v11 = vsub.f32 0.0, %v4755_v4 }
0x21aa   :  { %v4757_v12 = vmul.f32 1.442695, %v4756_v11  ;;  %v10423_v11 = vld [vmem:[%s11044_s4 + $0x78] sm:$0xff] }
0x21ac   :  { %9059 = vpow2.f32 %v4757_v12  ;;  %v10430_v12 = vld [vmem:[%s11044_s4 + $0x70] sm:$0xff] }
0x21b9   :  { %v9060_v13 = vpop.eup %9059 }
0x21ba   :  { %v4759_v15 = vadd.f32 1.0, %v9060_v13  ;;  %v4762_v0 = vmul.f32 -0.5, %v9060_v13  ;;  %v4765_v17 = vand.u32 2147483647, %v9060_v13 }
0x21bc   :  { %9061 = vlog2.f32 %v4759_v15  ;;  %v4763_v16 = vadd.f32 1.0, %v4762_v0  ;;  %vm4766_vm15 = vcmp.lt.f32.partialorder %v4765_v17, 0.0004427343  ;;  %v10440_v15 = vld [vmem:[%s11044_s4 + $0x60] sm:$0xff]  ;;  %v10445_v0 = vld [vmem:[%s11044_s4 + $0x58] sm:$0xff]  ;;  %v10455_v17 = vld [vmem:[%s11044_s4 + $0x48] sm:$0xff] }
0x21be   :  { %v4764_v20 = vmul.f32 %v9060_v13, %v4763_v16  ;;  %v10435_v13 = vld [vmem:[%s11044_s4 + $0x68] sm:$0xff]  ;;  %v10450_v16 = vld [vmem:[%s11044_s4 + $0x50] sm:$0xff] }
0x21c9   :  { %v9062_v18 = vpop.eup %9061 }
0x21ca   :  { %v4761_v19 = vmul.f32 0.6931472, %v9062_v18 }
0x21cc   :  { %v4767_v22 = vsel %vm4766_vm15, %v4764_v20, %v4761_v19  ;;  %v10460_v19 = vld [vmem:[%s11044_s4 + $0x40] sm:$0xff] }
0x21cd   :  { %v4768_v24 = vadd.f32 %v4767_v22, %v4752_v21  ;;  %v10465_v21 = vld [vmem:[%s11044_s4 + $0x38] sm:$0xff] }
0x21cf   :  { %v4769_v34 = vsel %vm4753_vm5, %v4751_v23, %v4768_v24  ;;  %v10413_v23 = vld [vmem:[%s11040_s19] sm:$0xf]  ;;  %v10470_v24 = vld [vmem:[%s11044_s4 + $0x30] sm:$0xff] }
0x21d0   :  { %8547 = vmatmul.mubr.msk.f32.vlgmr.msra.gmra.mxu0 %vm329_vm3, %v4769_v34 }
0x21d1   :  { %8550 = vmatpush3.msra.mxu0 %v10382_v25  ;;  %8557 = vmatprep.mubr.msk.f32.mxu0 %vm9290_vm1, %v11050_v51 }
0x21d2   :  { %8551 = vmatprep.subr.mxu0 %v11050_v51 }
0x21d3   :  { %8552 = vmatpush3.msra.mxu0 %v10389_v8 }
0x21d4   :  { %8553 = vmatprep.subr.mxu0 %v11050_v51 }
0x21d5   :  { %8554 = vmatpush3.msra.mxu0 %v10394_v42 }
0x21d6   :  { %8555 = vmatprep.subr.mxu0 %v11050_v51 }
0x21d7   :  { %8556 = vmatpush3.msra.mxu0 %v10399_v55 }
0x21d8   :  { %8560 = vmatprep.subr.mxu0 %v11050_v51 }
0x2290   :  { %v4839_v59 = vpop.f32.mrf.mxu0 }
0x2291   :  { %v4840_v45 = vadd.f32 %v10404_v44, %v4839_v59 }
0x2292   :  { %v8548_v43 = vpop.f32.mrf.mxu0 }
0x2293   :  { %v4846_v49 = vand.u32 2147483647, %v4840_v45  ;;  %v4843_v54 = vmax.f32 %v4840_v45, 0.0  ;;  %vm4844_vm7 = vcmp.ne.f32.partialorder %v4840_v45, %v4840_v45 }
0x2295   :  { %v4847_v5 = vsub.f32 0.0, %v4846_v49  ;;  %v10480_v49 = vld [vmem:[%s11044_s4 + $0x20] sm:$0xff] }
0x2297   :  { %v4848_v26 = vmul.f32 1.442695, %v4847_v5 }
0x2299   :  { %9063 = vpow2.f32 %v4848_v26  ;;  %v5074_v26 = vmax.f32 %v10408_v3, 0.0 }
0x22a6   :  { %v9064_v52 = vpop.eup %9063 }
0x22a7   :  { %v4850_v29 = vadd.f32 1.0, %v9064_v52  ;;  %v4853_v37 = vmul.f32 -0.5, %v9064_v52  ;;  %v4856_v14 = vand.u32 2147483647, %v9064_v52 }
0x22a9   :  { %9065 = vlog2.f32 %v4850_v29  ;;  %v4854_v33 = vadd.f32 1.0, %v4853_v37  ;;  %vm4857_vm6 = vcmp.lt.f32.partialorder %v4856_v14, 0.0004427343 }
0x22aa   :  { %9067 = vpow2.f32 %v5079_v10  ;;  %v10503_v10 = vld [vmem:[%s11044_s4] sm:$0xff] }
0x22ab   :  { %v4855_v61 = vmul.f32 %v9064_v52, %v4854_v33  ;;  %v10491_v52 = vld [vmem:[%s11044_s4 + $0x10] sm:$0xff]  ;;  %v10509_v33 = vld [vmem:[%s11043_s27] sm:$0xf] }
0x22b6   :  { %v9066_v56 = vpop.eup %9065 }
0x22b7   :  { %v4852_v58 = vmul.f32 0.6931472, %v9066_v56  ;;  %v9068_v48 = vpop.eup %9067 }
0x22b8   :  { %v5081_v4 = vadd.f32 1.0, %v9068_v48  ;;  %v5084_v18 = vmul.f32 -0.5, %v9068_v48  ;;  %v5087_v34 = vand.u32 2147483647, %v9068_v48 }
0x22b9   :  { %v4858_v6 = vsel %vm4857_vm6, %v4855_v61, %v4852_v58  ;;  %v10517_v61 = vld [vmem:[%s11046_s1] ss:$0 sm:$0xff] }
0x22ba   :  { %v4859_v32 = vadd.f32 %v4858_v6, %v4843_v54  ;;  %9069 = vlog2.f32 %v5081_v4  ;;  %v5085_v22 = vadd.f32 1.0, %v5084_v18  ;;  %vm5088_vm8 = vcmp.lt.f32.partialorder %v5087_v34, 0.0004427343  ;;  %v10521_v54 = vld [vmem:[%s11045_s28] ss:$0 sm:$0xff] }
0x22bb   :  { %v10525_v4 = vld [vmem:[%s11048_s7] ss:$0 sm:$0xff] }
0x22bc   :  { %v4860_v62 = vsel %vm4844_vm7, %v4840_v45, %v4859_v32  ;;  %v10475_v45 = vld [vmem:[%s11044_s4 + $0x28] sm:$0xff]  ;;  %v5086_v43 = vmul.f32 %v9068_v48, %v5085_v22 }
0x22bd   :  { %8558 = vmatmul.mubr.msk.f32.vlgmr.msra.gmra.mxu0 %vm329_vm3, %v4860_v62 }
0x22be   :  { %8561 = vmatpush3.msk.msra.mxu0 %vm255_vm0, %v10413_v23  ;;  %8562 = vmatprep.mubr.msk.f32.mxu0 %vm9290_vm1, %v11050_v51 }
0x22bf   :  { %8570 = vmatprep.subr.mxu0 %v11050_v51 }
0x22c1   :  { %8563 = vmatmul.mubr.msk.f32.vlgmr.msra.gmra.mxu0 %vm251_vm2, %v10301_v28 }
0x22c2   :  { %8571 = vmatpush3.msra.mxu0 %v10423_v11  ;;  %8602 = vmatprep.mubr.msk.f32.mxu0 %vm9290_vm1, %v11050_v51 }
0x22c3   :  { %8572 = vmatprep.subr.mxu0 %v11050_v51 }
0x22c4   :  { %8573 = vmatpush3.msra.mxu0 %v10430_v12 }
0x22c5   :  { %8574 = vmatprep.subr.mxu0 %v11050_v51 }
0x22c6   :  { %8575 = vmatpush3.msra.mxu0 %v10435_v13 }
0x22c7   :  { %8576 = vmatprep.subr.mxu0 %v11050_v51  ;;  %v9070_v20 = vpop.eup %9069 }
0x22c8   :  { %8577 = vmatpush3.msra.mxu0 %v10440_v15  ;;  %v5083_v59 = vmul.f32 0.6931472, %v9070_v20 }
0x22c9   :  { %8578 = vmatprep.subr.mxu0 %v11050_v51 }
0x22ca   :  { %8579 = vmatpush3.msra.mxu0 %v10445_v0  ;;  %v5089_v5 = vsel %vm5088_vm8, %v5086_v43, %v5083_v59 }
0x22cb   :  { %8580 = vmatprep.subr.mxu0 %v11050_v51  ;;  %v5090_v29 = vadd.f32 %v5089_v5, %v5074_v26  ;;  %v7621_v5 = vld [vmem:[%s11049_s10 + $0x18] sm:$0xff] }
0x22cc   :  { %8581 = vmatpush3.msra.mxu0 %v10450_v16 }
0x22cd   :  { %8582 = vmatprep.subr.mxu0 %v11050_v51  ;;  %v5091_v37 = vsel %vm5075_vm9, %v10408_v3, %v5090_v29 }
0x22ce   :  { %8583 = vmatpush3.msra.mxu0 %v10455_v17 }
0x22cf   :  { %8584 = vmatprep.subr.mxu0 %v11050_v51 }
0x22d0   :  { %8585 = vmatpush3.msra.mxu0 %v10460_v19 }
0x22d1   :  { %8586 = vmatprep.subr.mxu0 %v11050_v51 }
0x22d2   :  { %8587 = vmatpush3.msra.mxu0 %v10465_v21 }
0x22d3   :  { %8588 = vmatprep.subr.mxu0 %v11050_v51 }
0x22d4   :  { %8589 = vmatpush3.msra.mxu0 %v10470_v24 }
0x22d5   :  { %8590 = vmatprep.subr.mxu0 %v11050_v51 }
0x22d6   :  { %8591 = vmatpush3.msra.mxu0 %v10475_v45 }
0x22d7   :  { %8592 = vmatprep.subr.mxu0 %v11050_v51 }
0x22d8   :  { %8593 = vmatpush3.msra.mxu0 %v10480_v49 }
0x22d9   :  { %8594 = vmatprep.subr.mxu0 %v11050_v51 }
0x22da   :  { %8595 = vmatpush3.msra.mxu0 %v10486_v36 }
0x22db   :  { %8596 = vmatprep.subr.mxu0 %v11050_v51 }
0x22dc   :  { %8597 = vmatpush3.msra.mxu0 %v10491_v52 }
0x22dd   :  { %8598 = vmatprep.subr.mxu0 %v11050_v51 }
0x22de   :  { %8599 = vmatpush3.msra.mxu0 %v10496_v30 }
0x22df   :  { %8600 = vmatprep.subr.mxu0 %v11050_v51 }
0x22e0   :  { %8601 = vmatpush3.msra.mxu0 %v10503_v10 }
0x22e1   :  { %8603 = vmatmul.mubr.f32.vlgmr.msra.gmra.mxu0 %v5091_v37  ;;  %8649 = vmatprep.subr.mxu0 %v11050_v51 }
0x22e2   :  { %8650 = vmatpush3.msk.msra.mxu0 %vm255_vm0, %v10509_v33  ;;  %8651 = vmatprep.mubr.msk.f32.mxu0 %vm9290_vm1, %v11050_v51 }
0x22e3   :  { %8689 = vmatprep.subr.mxu0 %v11050_v51 }
0x237d   :  { %v4930_v14 = vpop.f32.mrf.mxu0 }
0x237e   :  { %v4931_v3 = vadd.f32 %v10517_v61, %v4930_v14 }
0x237f   :  { %v8559_v56 = vpop.f32.mrf.mxu0 }
0x2380   :  { %v5187_v43 = vmul.f32 0.01, %v4931_v3 }
0x2381   :  { %v5000_v58 = vpop.f32.mrf.mxu0 }
0x2382   :  { %v5001_v6 = vadd.f32 %v10521_v54, %v5000_v58  ;;  %v5188_v29 = vadd.f32 %v5187_v43, %v10301_v28  ;;  %v999_v28 = vadd.f32 %v10314_v41, %v9644_v35 }
0x2383   :  { %v8564_v32 = vpop.f32.mrf.mxu0 }
0x2384   :  { %v5171_v62 = vsub.f32 %v4931_v3, %v5001_v6 }
0x23a1   :  { %v5158_v48 = vpop.f32.mrf.mxu0 }
0x23a2   :  { %v5159_v18 = vadd.f32 %v10525_v4, %v5158_v48 }
0x23a3   :  { %v8604_v20 = vpop.f32.mrf.mxu0 }
0x23a4   :  { %v7620_v22 = vmul.f32 -1.442695, %v5159_v18 }
0x23a6   :  { %9071 = vpow2.f32 %v7620_v22 }
0x23b3   :  { %v9072_v34 = vpop.eup %9071 }
0x23b4   :  { %v5165_v59 = vadd.f32 1.0, %v9072_v34 }
0x23b6   :  { %9073 = vrcp.f32 %v5165_v59 }
0x23c3   :  { %v9074_v26 = vpop.eup %9073 }
0x23c4   :  { %v5191_v37 = vmul.f32 %v9074_v26, %v7621_v5  ;;  %v5168_v14 = vand.u32 2147483647, %v9074_v26 }
0x23c6   :  { %v10530_v56 = vadd.f32 %v5191_v37, %v5188_v29  ;;  %vm5169_vm10 = vcmp.gt.f32.partialorder %v5168_v14, 1e-07 }
0x23c7   :  { %v5170_v58 = vsel %vm5169_vm10, %v9074_v26, 1e-07 }
0x23c8   :  { %8608 = vmatmul.mubr.msk.f32.vlgmr.msra.gmra.mxu1 %vm251_vm2, %v10530_v56  ;;  %8652 = vmatmul.mubr.msk.f32.vlgmr.msra.gmra.mxu0 %vm251_vm2, %v10530_v56  ;;  %9075 = vrcp.f32 %v5170_v58 }
0x23c9   :  { %8611 = vmatpush3.msra.mxu1 %v10308_v53  ;;  %8614 = vmatprep.mubr.msk.f32.mxu1 %vm9290_vm1, %v11050_v51 }
0x23ca   :  { %8612 = vmatprep.subr.mxu1 %v11050_v51  ;;  %8690 = vmatpush3.msk.msra.mxu0 %vm255_vm0, %v10320_v38 }
0x23cb   :  { %8613 = vmatpush3.msra.mxu1 %v10325_v60  ;;  %8691 = vmatprep.mubr.msk.f32.mxu0 %vm9290_vm1, %v11050_v51 }
0x23cc   :  { %8617 = vmatprep.subr.mxu1 %v11050_v51  ;;  %8615 = vmatmul.mubr.msk.f32.vlgmr.msra.gmra.mxu1 %vm2242_vm4, %v999_v28 }
0x23cd   :  { %8618 = vmatpush3.msk.msra.mxu1 %vm255_vm0, %v10333_v63  ;;  %8619 = vmatprep.mubr.msk.f32.mxu1 %vm9290_vm1, %v11050_v51 }
0x23ce   :  { %8622 = vmatprep.subr.mxu1 %v11050_v51  ;;  %8694 = vmatprep.subr.mxu0 %v11050_v51 }
0x23d0   :  { %8620 = vmatmul.mubr.msk.f32.vlgmr.msra.gmra.mxu1 %vm251_vm2, %v10530_v56 }
0x23d1   :  { %8623 = vmatpush3.msra.mxu1 %v10344_v40  ;;  %8630 = vmatprep.mubr.msk.f32.mxu1 %vm9290_vm1, %v11050_v51 }
0x23d2   :  { %8624 = vmatprep.subr.mxu1 %v11050_v51 }
0x23d3   :  { %8625 = vmatpush3.msra.mxu1 %v10351_v46 }
0x23d4   :  { %8626 = vmatprep.subr.mxu1 %v11050_v51 }
0x23d5   :  { %v9076_v35 = vpop.eup %9075  ;;  %8627 = vmatpush3.msra.mxu1 %v10356_v47 }
0x23d6   :  { %8628 = vmatprep.subr.mxu1 %v11050_v51  ;;  %v10565_v3 = vmul.f32 %v9076_v35, %v5171_v62 }
0x23d7   :  { %8629 = vmatpush3.msra.mxu1 %v10363_v50 }
0x23d8   :  { %11055 = vst [vmem:[#allocation30_spill] sm:$0xff] %v10565_v3  ;;  %8633 = vmatprep.subr.mxu1 %v11050_v51 }
0x2488   :  { %v5262_v6 = vpop.f32.mrf.mxu1  ;;  %v5766_v32 = vpop.f32.mrf.mxu0 }
0x2489   :  { %v10570_v48 = vadd.f32 %v10368_v2, %v5262_v6 }
0x248a   :  { %v8609_v18 = vpop.f32.mrf.mxu1  ;;  %v8653_v20 = vpop.f32.mrf.mxu0 }
0x248b   :  { %v5281_v22 = vmul.f32 %v10570_v48, %v10570_v48 }
0x248c   :  { %v5373_v34 = vpop.f32.mrf.mxu1 }
0x248d   :  { %v5282_v59 = vsel %vm251_vm2, %v5281_v22, 0.0 }
0x248e   :  { %5283 = vadd.xlane.f32.xlu0 %v5282_v59  ;;  %v8616_v62 = vpop.f32.mrf.mxu1 }
0x2490   :  { %v5443_v43 = vpop.f32.mrf.mxu1 }
0x2491   :  { %v5444_v5 = vadd.f32 %v5443_v43, %v5373_v34 }
0x2492   :  { %v8621_v26 = vpop.f32.mrf.mxu1 }
0x2493   :  { %v5447_v29 = vadd.f32 %v10377_v7, %v5444_v5 }
0x2495   :  { %v5451_v37 = vand.u32 2147483647, %v5447_v29  ;;  %v5448_v59 = vmax.f32 %v5447_v29, 0.0  ;;  %vm5449_vm12 = vcmp.ne.f32.partialorder %v5447_v29, %v5447_v29 }
0x2497   :  { %v5452_v14 = vsub.f32 0.0, %v5451_v37 }
0x2499   :  { %v5453_v58 = vmul.f32 1.442695, %v5452_v14  ;;  %v10589_v14 = vld [vmem:[%s11047_s2] ss:$0 sm:$0xff] }
0x249b   :  { %9077 = vpow2.f32 %v5453_v58  ;;  %v10592_v58 = vadd.f32 %v10589_v14, %v5766_v32 }
0x249d   :  { %vm5771_vm5 = vcmp.ne.f32.partialorder %v10592_v58, %v10592_v58 }
0x24a8   :  { %v9078_v28 = vpop.eup %9077 }
0x24a9   :  { %v5455_v35 = vadd.f32 1.0, %v9078_v28  ;;  %v5458_v6 = vmul.f32 -0.5, %v9078_v28  ;;  %v5461_v20 = vand.u32 2147483647, %v9078_v28 }
0x24ab   :  { %9079 = vlog2.f32 %v5455_v35  ;;  %v5459_v18 = vadd.f32 1.0, %v5458_v6  ;;  %vm5462_vm11 = vcmp.lt.f32.partialorder %v5461_v20, 0.0004427343 }
0x24ad   :  { %v5460_v22 = vmul.f32 %v9078_v28, %v5459_v18  ;;  %v5773_v28 = vand.u32 2147483647, %v10592_v58 }
0x24af   :  { %v5774_v18 = vsub.f32 0.0, %v5773_v28 }
0x24b1   :  { %v5775_v20 = vmul.f32 1.442695, %v5774_v18 }
0x24b8   :  { %v9080_v3 = vpop.eup %9079 }
0x24b9   :  { %v5457_v57 = vmul.f32 0.6931472, %v9080_v3 }
0x24bb   :  { %v5463_v62 = vsel %vm5462_vm11, %v5460_v22, %v5457_v57 }
0x24bc   :  { %v5464_v34 = vadd.f32 %v5463_v62, %v5448_v59 }
0x24be   :  { %v5465_v43 = vsel %vm5449_vm12, %v5447_v29, %v5464_v34 }
0x24bf   :  { %8631 = vmatmul.mubr.msk.f32.vlgmr.msra.gmra.mxu1 %vm329_vm3, %v5465_v43 }
0x24c0   :  { %8634 = vmatpush3.msra.mxu1 %v10382_v25  ;;  %8641 = vmatprep.mubr.msk.f32.mxu1 %vm9290_vm1, %v11050_v51 }
0x24c1   :  { %8635 = vmatprep.subr.mxu1 %v11050_v51 }
0x24c2   :  { %8636 = vmatpush3.msra.mxu1 %v10389_v8 }
0x24c3   :  { %8637 = vmatprep.subr.mxu1 %v11050_v51 }
0x24c4   :  { %8638 = vmatpush3.msra.mxu1 %v10394_v42 }
0x24c5   :  { %8639 = vmatprep.subr.mxu1 %v11050_v51 }
0x24c6   :  { %8640 = vmatpush3.msra.mxu1 %v10399_v55 }
0x24c7   :  { %8644 = vmatprep.subr.mxu1 %v11050_v51 }
0x257f   :  { %v5535_v57 = vpop.f32.mrf.mxu1 }
0x2580   :  { %v5536_v3 = vadd.f32 %v10404_v44, %v5535_v57 }
0x2581   :  { %v8632_v5 = vpop.f32.mrf.mxu1 }
0x2582   :  { %v5542_v26 = vand.u32 2147483647, %v5536_v3  ;;  %v5539_v5 = vmax.f32 %v5536_v3, 0.0  ;;  %vm5540_vm14 = vcmp.ne.f32.partialorder %v5536_v3, %v5536_v3 }
0x2584   :  { %v5543_v29 = vsub.f32 0.0, %v5542_v26 }
0x2586   :  { %v5544_v37 = vmul.f32 1.442695, %v5543_v29 }
0x2588   :  { %9081 = vpow2.f32 %v5544_v37 }
0x2595   :  { %v9082_v35 = vpop.eup %9081 }
0x2596   :  { %v5546_v6 = vadd.f32 1.0, %v9082_v35  ;;  %v5549_v22 = vmul.f32 -0.5, %v9082_v35  ;;  %v5552_v62 = vand.u32 2147483647, %v9082_v35 }
0x2598   :  { %9083 = vlog2.f32 %v5546_v6  ;;  %v5550_v59 = vadd.f32 1.0, %v5549_v22  ;;  %vm5553_vm13 = vcmp.lt.f32.partialorder %v5552_v62, 0.0004427343  ;;  %v5770_v62 = vmax.f32 %v10592_v58, 0.0 }
0x2599   :  { %9085 = vpow2.f32 %v5775_v20 }
0x259a   :  { %v5551_v57 = vmul.f32 %v9082_v35, %v5550_v59 }
0x25a5   :  { %v9084_v34 = vpop.eup %9083 }
0x25a6   :  { %v5548_v43 = vmul.f32 0.6931472, %v9084_v34  ;;  %v9086_v37 = vpop.eup %9085 }
0x25a7   :  { %v5777_v28 = vadd.f32 1.0, %v9086_v37  ;;  %v5783_v18 = vand.u32 2147483647, %v9086_v37 }
0x25a8   :  { %v5554_v26 = vsel %vm5553_vm13, %v5551_v57, %v5548_v43 }
0x25a9   :  { %v5555_v29 = vadd.f32 %v5554_v26, %v5539_v5  ;;  %9087 = vlog2.f32 %v5777_v28  ;;  %vm5784_vm15 = vcmp.lt.f32.partialorder %v5783_v18, 0.0004427343 }
0x25ab   :  { %v5556_v32 = vsel %vm5540_vm14, %v5536_v3, %v5555_v29  ;;  %v5780_v3 = vmul.f32 -0.5, %v9086_v37 }
0x25ac   :  { %8642 = vmatmul.mubr.msk.f32.vlgmr.msra.gmra.mxu1 %vm329_vm3, %v5556_v32 }
0x25ad   :  { %8645 = vmatpush3.msk.msra.mxu1 %vm255_vm0, %v10413_v23  ;;  %8646 = vmatprep.mubr.msk.f32.mxu1 %vm9290_vm1, %v11050_v51  ;;  %v5781_v6 = vadd.f32 1.0, %v5780_v3 }
0x25ae   :  { %8654 = vmatprep.subr.mxu1 %v11050_v51 }
0x25af   :  { %v5782_v22 = vmul.f32 %v9086_v37, %v5781_v6 }
0x25b0   :  { %8647 = vmatmul.mubr.msk.f32.vlgmr.msra.gmra.mxu1 %vm251_vm2, %v10530_v56 }
0x25b1   :  { %8655 = vmatpush3.msra.mxu1 %v10423_v11  ;;  %8686 = vmatprep.mubr.msk.f32.mxu1 %vm9290_vm1, %v11050_v51 }
0x25b2   :  { %8656 = vmatprep.subr.mxu1 %v11050_v51 }
0x25b3   :  { %8657 = vmatpush3.msra.mxu1 %v10430_v12 }
0x25b4   :  { %8658 = vmatprep.subr.mxu1 %v11050_v51 }
0x25b5   :  { %8659 = vmatpush3.msra.mxu1 %v10435_v13 }
0x25b6   :  { %8660 = vmatprep.subr.mxu1 %v11050_v51  ;;  %v9088_v35 = vpop.eup %9087 }
0x25b7   :  { %8661 = vmatpush3.msra.mxu1 %v10440_v15  ;;  %v5779_v20 = vmul.f32 0.6931472, %v9088_v35 }
0x25b8   :  { %8662 = vmatprep.subr.mxu1 %v11050_v51 }
0x25b9   :  { %8663 = vmatpush3.msra.mxu1 %v10445_v0  ;;  %v5785_v59 = vsel %vm5784_vm15, %v5782_v22, %v5779_v20  ;;  %vm2501_vm15 = vcmask 7168  }
0x25ba   :  { %8664 = vmatprep.subr.mxu1 %v11050_v51  ;;  %v5786_v34 = vadd.f32 %v5785_v59, %v5770_v62  ;;  %v7635_v59 = vld [vmem:[%s11049_s10 + $0x20] sm:$0xff] }
0x25bb   :  { %8665 = vmatpush3.msra.mxu1 %v10450_v16 }
0x25bc   :  { %8666 = vmatprep.subr.mxu1 %v11050_v51  ;;  %v5787_v43 = vsel %vm5771_vm5, %v10592_v58, %v5786_v34 }
0x25bd   :  { %8667 = vmatpush3.msra.mxu1 %v10455_v17 }
0x25be   :  { %8668 = vmatprep.subr.mxu1 %v11050_v51 }
0x25bf   :  { %8669 = vmatpush3.msra.mxu1 %v10460_v19 }
0x25c0   :  { %8670 = vmatprep.subr.mxu1 %v11050_v51 }
0x25c1   :  { %8671 = vmatpush3.msra.mxu1 %v10465_v21 }
0x25c2   :  { %8672 = vmatprep.subr.mxu1 %v11050_v51 }
0x25c3   :  { %8673 = vmatpush3.msra.mxu1 %v10470_v24 }
0x25c4   :  { %8674 = vmatprep.subr.mxu1 %v11050_v51 }
0x25c5   :  { %8675 = vmatpush3.msra.mxu1 %v10475_v45 }
0x25c6   :  { %8676 = vmatprep.subr.mxu1 %v11050_v51 }
0x25c7   :  { %8677 = vmatpush3.msra.mxu1 %v10480_v49 }
0x25c8   :  { %8678 = vmatprep.subr.mxu1 %v11050_v51 }
0x25c9   :  { %8679 = vmatpush3.msra.mxu1 %v10486_v36 }
0x25ca   :  { %8680 = vmatprep.subr.mxu1 %v11050_v51 }
0x25cb   :  { %8681 = vmatpush3.msra.mxu1 %v10491_v52 }
0x25cc   :  { %8682 = vmatprep.subr.mxu1 %v11050_v51 }
0x25cd   :  { %8683 = vmatpush3.msra.mxu1 %v10496_v30 }
0x25ce   :  { %8684 = vmatprep.subr.mxu1 %v11050_v51 }
0x25cf   :  { %8685 = vmatpush3.msra.mxu1 %v10503_v10 }
0x25d0   :  { %8687 = vmatmul.mubr.f32.vlgmr.msra.gmra.mxu1 %v5787_v43  ;;  %8733 = vmatprep.subr.mxu1 %v11050_v51 }
0x25d1   :  { %8734 = vmatpush3.msk.msra.mxu1 %vm255_vm0, %v10509_v33  ;;  %8735 = vmatprep.mubr.msk.f32.mxu1 %vm9290_vm1, %v11050_v51 }
0x25d2   :  { %8773 = vmatprep.subr.mxu1 %v11050_v51 }
0x266c   :  { %v5626_v57 = vpop.f32.mrf.mxu1 }
0x266d   :  { %v5627_v29 = vadd.f32 %v10517_v61, %v5626_v57 }
0x266e   :  { %v8643_v5 = vpop.f32.mrf.mxu1 }
0x266f   :  { %v5883_v22 = vmul.f32 0.01, %v5627_v29 }
0x2670   :  { %v5696_v26 = vpop.f32.mrf.mxu1 }
0x2671   :  { %v5697_v32 = vadd.f32 %v10521_v54, %v5696_v26  ;;  %v5884_v34 = vadd.f32 %v5883_v22, %v10530_v56  ;;  %v752_v56 = vadd.f32 %v10314_v41, %v9612_v1 }
0x2672   :  { %v8648_v58 = vpop.f32.mrf.mxu1 }
0x2673   :  { %v5867_v37 = vsub.f32 %v5627_v29, %v5697_v32 }
0x2690   :  { %v5854_v28 = vpop.f32.mrf.mxu1 }
0x2691   :  { %v5855_v3 = vadd.f32 %v10525_v4, %v5854_v28 }
0x2692   :  { %v8688_v35 = vpop.f32.mrf.mxu1 }
0x2693   :  { %v7634_v6 = vmul.f32 -1.442695, %v5855_v3 }
0x2695   :  { %9089 = vpow2.f32 %v7634_v6 }
0x26a2   :  { %v9090_v18 = vpop.eup %9089 }
0x26a3   :  { %v5861_v20 = vadd.f32 1.0, %v9090_v18 }
0x26a5   :  { %9091 = vrcp.f32 %v5861_v20 }
0x26b2   :  { %v9092_v62 = vpop.eup %9091 }
0x26b3   :  { %v5887_v43 = vmul.f32 %v9092_v62, %v7635_v59  ;;  %v5864_v57 = vand.u32 2147483647, %v9092_v62 }
0x26b5   :  { %v10651_v5 = vadd.f32 %v5887_v43, %v5884_v34  ;;  %vm5865_vm6 = vcmp.gt.f32.partialorder %v5864_v57, 1e-07 }
0x26b6   :  { %v5866_v26 = vsel %vm5865_vm6, %v9092_v62, 1e-07 }
0x26b7   :  { %8692 = vmatmul.mubr.msk.f32.vlgmr.msra.gmra.mxu0 %vm251_vm2, %v10651_v5  ;;  %8736 = vmatmul.mubr.msk.f32.vlgmr.msra.gmra.mxu1 %vm251_vm2, %v10651_v5  ;;  %9093 = vrcp.f32 %v5866_v26 }
0x26b8   :  { %8695 = vmatpush3.msra.mxu0 %v10308_v53  ;;  %8698 = vmatprep.mubr.msk.f32.mxu0 %vm9290_vm1, %v11050_v51 }
0x26b9   :  { %8696 = vmatprep.subr.mxu0 %v11050_v51  ;;  %8774 = vmatpush3.msk.msra.mxu1 %vm255_vm0, %v10320_v38 }
0x26ba   :  { %8697 = vmatpush3.msra.mxu0 %v10325_v60  ;;  %8775 = vmatprep.mubr.msk.f32.mxu1 %vm9290_vm1, %v11050_v51 }
0x26bb   :  { %8701 = vmatprep.subr.mxu0 %v11050_v51  ;;  %8699 = vmatmul.mubr.msk.f32.vlgmr.msra.gmra.mxu0 %vm2242_vm4, %v752_v56 }
0x26bc   :  { %8702 = vmatpush3.msk.msra.mxu0 %vm255_vm0, %v10333_v63  ;;  %8703 = vmatprep.mubr.msk.f32.mxu0 %vm9290_vm1, %v11050_v51 }
0x26bd   :  { %8706 = vmatprep.subr.mxu0 %v11050_v51  ;;  %8778 = vmatprep.subr.mxu1 %v11050_v51 }
0x26bf   :  { %8704 = vmatmul.mubr.msk.f32.vlgmr.msra.gmra.mxu0 %vm251_vm2, %v10651_v5 }
0x26c0   :  { %8707 = vmatpush3.msra.mxu0 %v10344_v40  ;;  %8714 = vmatprep.mubr.msk.f32.mxu0 %vm9290_vm1, %v11050_v51 }
0x26c1   :  { %8708 = vmatprep.subr.mxu0 %v11050_v51 }
0x26c2   :  { %8709 = vmatpush3.msra.mxu0 %v10351_v46 }
0x26c3   :  { %8710 = vmatprep.subr.mxu0 %v11050_v51 }
0x26c4   :  { %v9094_v1 = vpop.eup %9093  ;;  %8711 = vmatpush3.msra.mxu0 %v10356_v47 }
0x26c5   :  { %8712 = vmatprep.subr.mxu0 %v11050_v51  ;;  %v10686_v53 = vmul.f32 %v9094_v1, %v5867_v37 }
0x26c6   :  { %8713 = vmatpush3.msra.mxu0 %v10363_v50 }
0x26c7   :  { %8717 = vmatprep.subr.mxu0 %v11050_v51 }
0x2777   :  { %v5958_v41 = vpop.f32.mrf.mxu0  ;;  %v6462_v38 = vpop.f32.mrf.mxu1 }
0x2778   :  { %v10691_v60 = vadd.f32 %v10368_v2, %v5958_v41 }
0x2779   :  { %v8693_v63 = vpop.f32.mrf.mxu0  ;;  %v8737_v40 = vpop.f32.mrf.mxu1 }
0x277a   :  { %v5977_v46 = vmul.f32 %v10691_v60, %v10691_v60 }
0x277b   :  { %v6069_v29 = vpop.f32.mrf.mxu0 }
0x277c   :  { %v5978_v47 = vsel %vm251_vm2, %v5977_v46, 0.0 }
0x277d   :  { %5979 = vadd.xlane.f32.xlu1 %v5978_v47  ;;  %v8700_v32 = vpop.f32.mrf.mxu0 }
0x277f   :  { %v6139_v58 = vpop.f32.mrf.mxu0 }
0x2780   :  { %v6140_v37 = vadd.f32 %v6139_v58, %v6069_v29 }
0x2781   :  { %v8705_v50 = vpop.f32.mrf.mxu0 }
0x2782   :  { %v6143_v28 = vadd.f32 %v10377_v7, %v6140_v37 }
0x2784   :  { %v6147_v3 = vand.u32 2147483647, %v6143_v28  ;;  %v6144_v57 = vmax.f32 %v6143_v28, 0.0  ;;  %vm6145_vm8 = vcmp.ne.f32.partialorder %v6143_v28, %v6143_v28 }
0x2786   :  { %v6148_v35 = vsub.f32 0.0, %v6147_v3 }
0x2788   :  { %v6149_v6 = vmul.f32 1.442695, %v6148_v35 }
0x278a   :  { %9095 = vpow2.f32 %v6149_v6 }
0x2797   :  { %v9096_v2 = vpop.eup %9095 }
0x2798   :  { %v6151_v18 = vadd.f32 1.0, %v9096_v2  ;;  %v6154_v20 = vmul.f32 -0.5, %v9096_v2  ;;  %v6157_v59 = vand.u32 2147483647, %v9096_v2 }
0x279a   :  { %9097 = vlog2.f32 %v6151_v18  ;;  %v6155_v22 = vadd.f32 1.0, %v6154_v20  ;;  %vm6158_vm7 = vcmp.lt.f32.partialorder %v6157_v59, 0.0004427343 }
0x279c   :  { %v6156_v43 = vmul.f32 %v9096_v2, %v6155_v22 }
0x27a7   :  { %v9098_v62 = vpop.eup %9097 }
0x27a8   :  { %v6153_v34 = vmul.f32 0.6931472, %v9098_v62 }
0x27aa   :  { %v6159_v26 = vsel %vm6158_vm7, %v6156_v43, %v6153_v34 }
0x27ab   :  { %v6160_v56 = vadd.f32 %v6159_v26, %v6144_v57  ;;  %v7649_v26 = vld [vmem:[%s11049_s10 + $0x28] sm:$0xff] }
0x27ad   :  { %v6161_v1 = vsel %vm6145_vm8, %v6143_v28, %v6160_v56 }
0x27ae   :  { %8715 = vmatmul.mubr.msk.f32.vlgmr.msra.gmra.mxu0 %vm329_vm3, %v6161_v1 }
0x27af   :  { %8718 = vmatpush3.msra.mxu0 %v10382_v25  ;;  %8725 = vmatprep.mubr.msk.f32.mxu0 %vm9290_vm1, %v11050_v51 }
0x27b0   :  { %8719 = vmatprep.subr.mxu0 %v11050_v51 }
0x27b1   :  { %8720 = vmatpush3.msra.mxu0 %v10389_v8  ;;  %v10710_v8 = vadd.f32 %v10589_v14, %v6462_v38 }
0x27b2   :  { %8721 = vmatprep.subr.mxu0 %v11050_v51 }
0x27b3   :  { %8722 = vmatpush3.msra.mxu0 %v10394_v42  ;;  %v6469_v29 = vand.u32 2147483647, %v10710_v8  ;;  %vm6467_vm12 = vcmp.ne.f32.partialorder %v10710_v8, %v10710_v8 }
0x27b4   :  { %8723 = vmatprep.subr.mxu0 %v11050_v51 }
0x27b5   :  { %8724 = vmatpush3.msra.mxu0 %v10399_v55  ;;  %v6470_v32 = vsub.f32 0.0, %v6469_v29 }
0x27b6   :  { %8728 = vmatprep.subr.mxu0 %v11050_v51 }
0x27b7   :  { %v6471_v55 = vmul.f32 1.442695, %v6470_v32  ;;  %v9193_v32 = vld [vmem:[%s11034_s29] sm:$0xff] }
0x286e   :  { %v6231_v7 = vpop.f32.mrf.mxu0 }
0x286f   :  { %v6232_v25 = vadd.f32 %v10404_v44, %v6231_v7 }
0x2870   :  { %v8716_v41 = vpop.f32.mrf.mxu0 }
0x2871   :  { %v6238_v63 = vand.u32 2147483647, %v6232_v25  ;;  %v6235_v35 = vmax.f32 %v6232_v25, 0.0  ;;  %vm6236_vm10 = vcmp.ne.f32.partialorder %v6232_v25, %v6232_v25 }
0x2873   :  { %v6239_v40 = vsub.f32 0.0, %v6238_v63  ;;  %v9187_v63 = vld [vmem:[%s9434_s13] sm:$0xf] }
0x2875   :  { %v6240_v46 = vmul.f32 1.442695, %v6239_v40  ;;  %v9188_v40 = vld [vmem:[%s9374_s12] sm:$0xff] }
0x2877   :  { %9099 = vpow2.f32 %v6240_v46  ;;  %v9189_v46 = vld [vmem:[%s11033_s25] sm:$0xf] }
0x2884   :  { %v9100_v42 = vpop.eup %9099 }
0x2885   :  { %v6242_v47 = vadd.f32 1.0, %v9100_v42  ;;  %v6245_v58 = vmul.f32 -0.5, %v9100_v42  ;;  %v6248_v50 = vand.u32 2147483647, %v9100_v42 }
0x2887   :  { %9101 = vlog2.f32 %v6242_v47  ;;  %v6246_v37 = vadd.f32 1.0, %v6245_v58  ;;  %vm6249_vm9 = vcmp.lt.f32.partialorder %v6248_v50, 0.0004427343  ;;  %v10807_v58 = vpop.xlane.xlu1 %2492  ;;  %v11056_v50 = vld [vmem:[#allocation26_spill] sm:$0xff] }
0x2888   :  { %9103 = vpow2.f32 %v6471_v55  ;;  %v3196_v55 = vpop.xlane.xlu0 %3195 }
0x2889   :  { %v6247_v3 = vmul.f32 %v9100_v42, %v6246_v37  ;;  %v9192_v42 = vld [vmem:[%s11034_s29 + $0x8] sm:$0xff]  ;;  %v9194_v37 = vld [vmem:[%s9304_s5] sm:$0xff]  ;;  %vm3201_vm14 = vcmp.eq.f32.partialorder %v3196_v55, 0.0 }
0x2894   :  { %v9102_v44 = vpop.eup %9101 }
0x2895   :  { %v6244_v28 = vmul.f32 0.6931472, %v9102_v44  ;;  %v9104_v18 = vpop.eup %9103  ;;  %v2474_v44 = vsub.f32 %v9194_v37, %v11056_v50  ;;  %v9199_v37 = vld [vmem:[%s9304_s5 + $0x30] sm:$0xff] }
0x2896   :  { %v6473_v20 = vadd.f32 1.0, %v9104_v18 }
0x2897   :  { %v6250_v6 = vsel %vm6249_vm9, %v6247_v3, %v6244_v28  ;;  %v4588_v28 = vpop.xlane.xlu1 %4587 }
0x2898   :  { %v6251_v2 = vadd.f32 %v6250_v6, %v6235_v35  ;;  %9105 = vlog2.f32 %v6473_v20  ;;  %v10814_v6 = vld [vmem:[%s11035_s3] ss:$0 sm:$0xff]  ;;  %vm4591_vm5 = vcmp.eq.f32.partialorder %v4588_v28, inf  ;;  %vm4593_vm6 = vcmp.eq.f32.partialorder %v4588_v28, 0.0 }
0x289a   :  { %v6252_v38 = vsel %vm6236_vm10, %v6232_v25, %v6251_v2  ;;  %v9185_v25 = vld [vmem:[%s9374_s12 + $0x8] sm:$0xff] }
0x289b   :  { %8726 = vmatmul.mubr.msk.f32.vlgmr.msra.gmra.mxu0 %vm329_vm3, %v6252_v38  ;;  %v2476_v38 = vmul.f32 100.0, %v2474_v44  ;;  %v5870_v44 = vmul.f32 %v10686_v53, %v10686_v53 }
0x289c   :  { %8729 = vmatpush3.msk.msra.mxu0 %vm255_vm0, %v10413_v23  ;;  %8730 = vmatprep.mubr.msk.f32.mxu0 %vm9290_vm1, %v11050_v51  ;;  %v6476_v23 = vmul.f32 -0.5, %v9104_v18 }
0x289d   :  { %8738 = vmatprep.subr.mxu0 %v11050_v51 }
0x289f   :  { %8731 = vmatmul.mubr.msk.f32.vlgmr.msra.gmra.mxu0 %vm251_vm2, %v10651_v5 }
0x28a0   :  { %8739 = vmatpush3.msra.mxu0 %v10423_v11  ;;  %8770 = vmatprep.mubr.msk.f32.mxu0 %vm9290_vm1, %v11050_v51 }
0x28a1   :  { %8740 = vmatprep.subr.mxu0 %v11050_v51 }
0x28a2   :  { %8741 = vmatpush3.msra.mxu0 %v10430_v12  ;;  %v6477_v12 = vadd.f32 1.0, %v6476_v23 }
0x28a3   :  { %8742 = vmatprep.subr.mxu0 %v11050_v51 }
0x28a4   :  { %8743 = vmatpush3.msra.mxu0 %v10435_v13  ;;  %v6479_v13 = vand.u32 2147483647, %v9104_v18 }
0x28a5   :  { %8744 = vmatprep.subr.mxu0 %v11050_v51  ;;  %v9106_v11 = vpop.eup %9105 }
0x28a6   :  { %8745 = vmatpush3.msra.mxu0 %v10440_v15  ;;  %v6475_v15 = vmul.f32 0.6931472, %v9106_v11  ;;  %vm6480_vm11 = vcmp.lt.f32.partialorder %v6479_v13, 0.0004427343 }
0x28a7   :  { %8746 = vmatprep.subr.mxu0 %v11050_v51 }
0x28a8   :  { %8747 = vmatpush3.msra.mxu0 %v10445_v0  ;;  %v6478_v0 = vmul.f32 %v9104_v18, %v6477_v12 }
0x28a9   :  { %8748 = vmatprep.subr.mxu0 %v11050_v51 }
0x28aa   :  { %8749 = vmatpush3.msra.mxu0 %v10450_v16  ;;  %v6481_v16 = vsel %vm6480_vm11, %v6478_v0, %v6475_v15  ;;  %v2477_v15 = vmul.f32 %v2476_v38, %v2476_v38 }
0x28ab   :  { %8750 = vmatprep.subr.mxu0 %v11050_v51 }
0x28ac   :  { %8751 = vmatpush3.msra.mxu0 %v10455_v17  ;;  %v6466_v17 = vmax.f32 %v10710_v8, 0.0 }
0x28ad   :  { %8752 = vmatprep.subr.mxu0 %v11050_v51 }
0x28ae   :  { %8753 = vmatpush3.msra.mxu0 %v10460_v19  ;;  %v6482_v19 = vadd.f32 %v6481_v16, %v6466_v17 }
0x28af   :  { %8754 = vmatprep.subr.mxu0 %v11050_v51 }
0x28b0   :  { %8755 = vmatpush3.msra.mxu0 %v10465_v21  ;;  %v6483_v21 = vsel %vm6467_vm12, %v10710_v8, %v6482_v19  ;;  %v9191_v8 = vld [vmem:[%s11034_s29 + $0x10] sm:$0xff] }
0x28b1   :  { %8756 = vmatprep.subr.mxu0 %v11050_v51  ;;  %v9196_v19 = vld [vmem:[%s9304_s5 + $0x10] sm:$0xff] }
0x28b2   :  { %8757 = vmatpush3.msra.mxu0 %v10470_v24 }
0x28b3   :  { %8758 = vmatprep.subr.mxu0 %v11050_v51 }
0x28b4   :  { %8759 = vmatpush3.msra.mxu0 %v10475_v45 }
0x28b5   :  { %8760 = vmatprep.subr.mxu0 %v11050_v51 }
0x28b6   :  { %8761 = vmatpush3.msra.mxu0 %v10480_v49 }
0x28b7   :  { %8762 = vmatprep.subr.mxu0 %v11050_v51 }
0x28b8   :  { %8763 = vmatpush3.msra.mxu0 %v10486_v36 }
0x28b9   :  { %8764 = vmatprep.subr.mxu0 %v11050_v51 }
0x28ba   :  { %8765 = vmatpush3.msra.mxu0 %v10491_v52 }
0x28bb   :  { %8766 = vmatprep.subr.mxu0 %v11050_v51 }
0x28bc   :  { %8767 = vmatpush3.msra.mxu0 %v10496_v30 }
0x28bd   :  { %8768 = vmatprep.subr.mxu0 %v11050_v51 }
0x28be   :  { %8769 = vmatpush3.msra.mxu0 %v10503_v10 }
0x28bf   :  { %8771 = vmatmul.mubr.f32.vlgmr.msra.gmra.mxu0 %v6483_v21  ;;  %8817 = vmatprep.subr.mxu0 %v11050_v51  ;;  %v3874_v21 = vsub.f32 %v9196_v19, %v10223_v9 }
0x28c0   :  { %8818 = vmatpush3.msk.msra.mxu0 %vm255_vm0, %v10509_v33  ;;  %8819 = vmatprep.mubr.msk.f32.mxu0 %vm9290_vm1, %v11050_v51 }
0x28c1   :  { %8857 = vmatprep.subr.mxu0 %v11050_v51 }
0x295b   :  { %v6322_v24 = vpop.f32.mrf.mxu0 }
0x295c   :  { %v6323_v36 = vadd.f32 %v10517_v61, %v6322_v24 }
0x295d   :  { %v8727_v45 = vpop.f32.mrf.mxu0 }
0x295e   :  { %v6579_v57 = vmul.f32 0.01, %v6323_v36  ;;  %v2478_v45 = vsel %vm251_vm2, %v2477_v15, 0.0 }
0x295f   :  { %v6392_v49 = vpop.f32.mrf.mxu0 }
0x2960   :  { %v6393_v52 = vadd.f32 %v10521_v54, %v6392_v49  ;;  %v6580_v61 = vadd.f32 %v6579_v57, %v10651_v5  ;;  %v9186_v5 = vld [vmem:[%s9344_s8] ss:$0 sm:$0xff]  ;;  %v11057_v49 = vld [vmem:[#allocation27_spill] sm:$0xff] }
0x2961   :  { %v8732_v30 = vpop.f32.mrf.mxu0  ;;  %v505_v41 = vadd.f32 %v9186_v5, %v9570_v39  ;;  %v9190_v39 = vld [vmem:[%s11034_s29 + $0x18] sm:$0xff] }
0x2962   :  { %v6563_v10 = vsub.f32 %v6323_v36, %v6393_v52  ;;  %v3087_v36 = vmul.f32 %v11057_v49, %v11057_v49  ;;  %v9197_v30 = vld [vmem:[%s11038_s14] ss:$0 sm:$0xff]  ;;  %v9200_v49 = vld [vmem:[%s11041_s24 + $0x18] sm:$0xff] }
0x2964   :  { %v3088_v9 = vsel %vm251_vm2, %v3087_v36, 0.0  ;;  %v9201_v36 = vld [vmem:[%s11041_s24 + $0x10] sm:$0xff] }
0x297f   :  { %v6550_v22 = vpop.f32.mrf.mxu0 }
0x2980   :  { %v6551_v59 = vadd.f32 %v10525_v4, %v6550_v22 }
0x2981   :  { %v8772_v62 = vpop.f32.mrf.mxu0 }
0x2982   :  { %v7648_v33 = vmul.f32 -1.442695, %v6551_v59  ;;  %v5980_v59 = vpop.xlane.xlu1 %5979  ;;  %v3202_v62 = vand.u32 2147483648, %v3196_v55 }
0x2983   :  { %vm5983_vm7 = vcmp.eq.f32.partialorder %v5980_v59, inf  ;;  %v5986_v38 = vand.u32 2147483648, %v5980_v59  ;;  %vm5985_vm8 = vcmp.eq.f32.partialorder %v5980_v59, 0.0 }
0x2984   :  { %9107 = vpow2.f32 %v7648_v33 }
0x2991   :  { %v9108_v34 = vpop.eup %9107 }
0x2992   :  { %v6557_v43 = vadd.f32 1.0, %v9108_v34  ;;  %v3875_v34 = vmul.f32 100.0, %v3874_v21 }
0x2994   :  { %9109 = vrcp.f32 %v6557_v43 }
0x29a1   :  { %v9110_v56 = vpop.eup %9109 }
0x29a2   :  { %v6583_v54 = vmul.f32 %v9110_v56, %v7649_v26  ;;  %v6560_v1 = vand.u32 2147483647, %v9110_v56 }
0x29a4   :  { %v10769_v7 = vadd.f32 %v6583_v54, %v6580_v61  ;;  %vm6561_vm13 = vcmp.gt.f32.partialorder %v6560_v1, 1e-07  ;;  %v3876_v54 = vmul.f32 %v3875_v34, %v3875_v34 }
0x29a5   :  { %v6562_v4 = vsel %vm6561_vm13, %v9110_v56, 1e-07  ;;  %vm2496_vm13 = vcmp.eq.f32.partialorder %v10807_v58, inf }
0x29a6   :  { %8776 = vmatmul.mubr.msk.f32.vlgmr.msra.gmra.mxu1 %vm251_vm2, %v10769_v7  ;;  %8820 = vmatmul.mubr.msk.f32.vlgmr.msra.gmra.mxu0 %vm251_vm2, %v10769_v7  ;;  %9111 = vrcp.f32 %v6562_v4  ;;  %v9198_v4 = vld [vmem:[%s9304_s5 + $0x20] sm:$0xff]  ;;  %v3877_v5 = vsel %vm251_vm2, %v3876_v54, 0.0 }
0x29a7   :  { %8779 = vmatpush3.msra.mxu1 %v9185_v25  ;;  %8782 = vmatprep.mubr.msk.f32.mxu1 %vm9290_vm1, %v11050_v51  ;;  %9113 = vrsqrt.f32 %v3196_v55  ;;  %v5266_v25 = vsub.f32 %v9198_v4, %v10570_v48 }
0x29a8   :  { %8780 = vmatprep.subr.mxu1 %v11050_v51  ;;  %8858 = vmatpush3.msk.msra.mxu0 %vm255_vm0, %v9187_v63  ;;  %9115 = vrsqrt.f32 %v4588_v28 }
0x29a9   :  { %8781 = vmatpush3.msra.mxu1 %v9188_v40  ;;  %8859 = vmatprep.mubr.msk.f32.mxu0 %vm9290_vm1, %v11050_v51  ;;  %9117 = vrsqrt.f32 %v5980_v59  ;;  %v4594_v40 = vand.u32 2147483648, %v4588_v28 }
0x29aa   :  { %8785 = vmatprep.subr.mxu1 %v11050_v51  ;;  %8783 = vmatmul.mubr.msk.f32.vlgmr.msra.gmra.mxu1 %vm2242_vm4, %v505_v41  ;;  %vm3199_vm4 = vcmp.eq.f32.partialorder %v3196_v55, inf  ;;  %v4478_v41 = vmul.f32 %v10360_v31, %v10360_v31 }
0x29ab   :  { %8786 = vmatpush3.msk.msra.mxu1 %vm255_vm0, %v9189_v46  ;;  %8787 = vmatprep.mubr.msk.f32.mxu1 %vm9290_vm1, %v11050_v51 }
0x29ac   :  { %8790 = vmatprep.subr.mxu1 %v11050_v51  ;;  %v4479_v46 = vsel %vm251_vm2, %v4478_v41, 0.0 }
0x29ae   :  { %8788 = vmatmul.mubr.msk.f32.vlgmr.msra.gmra.mxu1 %vm251_vm2, %v10769_v7 }
0x29af   :  { %8791 = vmatpush3.msra.mxu1 %v9190_v39  ;;  %8798 = vmatprep.mubr.msk.f32.mxu1 %vm9290_vm1, %v11050_v51  ;;  %v5267_v39 = vmul.f32 100.0, %v5266_v25 }
0x29b0   :  { %8792 = vmatprep.subr.mxu1 %v11050_v51 }
0x29b1   :  { %8793 = vmatpush3.msra.mxu1 %v9191_v8  ;;  %v5268_v48 = vmul.f32 %v5267_v39, %v5267_v39 }
0x29b2   :  { %8794 = vmatprep.subr.mxu1 %v11050_v51 }
0x29b3   :  { %v9112_v29 = vpop.eup %9111  ;;  %8795 = vmatpush3.msra.mxu1 %v9192_v42  ;;  %v5269_v50 = vsel %vm251_vm2, %v5268_v48, 0.0 }
0x29b4   :  { %8796 = vmatprep.subr.mxu1 %v11050_v51  ;;  %v10803_v47 = vmul.f32 %v9112_v29, %v6563_v10  ;;  %v9114_v11 = vpop.eup %9113 }
0x29b5   :  { %8797 = vmatpush3.msra.mxu1 %v9193_v32  ;;  %v3198_v16 = vmul.f32 %v9114_v11, %v3196_v55  ;;  %v9116_v26 = vpop.eup %9115 }
0x29b6   :  { %8801 = vmatprep.subr.mxu1 %v11050_v51  ;;  %v4590_v1 = vmul.f32 %v9116_v26, %v4588_v28  ;;  %v9118_v29 = vpop.eup %9117 }
0x29b7   :  { %v3200_v22 = vsel %vm3199_vm4, %v3196_v55, %v3198_v16  ;;  %v5982_v32 = vmul.f32 %v9118_v29, %v5980_v59  ;;  %vm2498_vm4 = vcmp.eq.f32.partialorder %v10807_v58, 0.0 }
0x29b8   :  { %v3203_v43 = vsel %vm3201_vm14, %v3202_v62, %v3200_v22  ;;  %v4592_v63 = vsel %vm4591_vm5, %v4588_v28, %v4590_v1 }
0x29b9   :  { %v3204_v61 = vsel %vm2501_vm15, %v3203_v43, 0.0  ;;  %v4595_v8 = vsel %vm4593_vm6, %v4594_v40, %v4592_v63  ;;  %v5984_v28 = vsel %vm5983_vm7, %v5980_v59, %v5982_v32 }
0x29ba   :  { %v4596_v42 = vsel %vm2501_vm15, %v4595_v8, 0.0 }
0x2a66   :  { %v6654_v3 = vpop.f32.mrf.mxu1  ;;  %v10811_v35 = vpop.f32.mrf.mxu0 }
0x2a67   :  { %v10817_v2 = vadd.f32 %v10814_v6, %v6654_v3  ;;  %v10872_v41 = vadd.f32 %v10589_v14, %v10811_v35 }
0x2a68   :  { %v8777_v18 = vpop.f32.mrf.mxu1  ;;  %v8821_v20 = vpop.f32.mrf.mxu0 }
0x2a69   :  { %v6673_v23 = vmul.f32 %v10817_v2, %v10817_v2  ;;  %v6658_v31 = vsub.f32 %v9199_v37, %v10817_v2  ;;  %v5871_v18 = vsel %vm251_vm2, %v5870_v44, 0.0  ;;  %v7165_v63 = vand.u32 2147483647, %v10872_v41 }
0x2a6a   :  { %v6765_v12 = vpop.f32.mrf.mxu1 }
0x2a6b   :  { %v6674_v13 = vsel %vm251_vm2, %v6673_v23, 0.0  ;;  %v6659_v20 = vmul.f32 100.0, %v6658_v31  ;;  %v5987_v23 = vsel %vm5985_vm8, %v5986_v38, %v5984_v28  ;;  %v7166_v39 = vsub.f32 0.0, %v7165_v63  ;;  %v9206_v38 = vld [vmem:[%s11044_s4 + $0x78] sm:$0xff]  ;;  %v9224_v63 = vld [vmem:[%s11048_s7] ss:$0 sm:$0xff] }
0x2a6c   :  { %6675 = vadd.xlane.f32.xlu0 %v6674_v13  ;;  %v8784_v0 = vpop.f32.mrf.mxu1  ;;  %v5988_v11 = vsel %vm2501_vm15, %v5987_v23, 0.0  ;;  %v9209_v23 = vld [vmem:[%s11044_s4 + $0x60] sm:$0xff] }
0x2a6d   :  { %v6660_v2 = vmul.f32 %v6659_v20, %v6659_v20  ;;  %v7167_v8 = vmul.f32 1.442695, %v7166_v39  ;;  %v9208_v20 = vld [vmem:[%s11044_s4 + $0x68] sm:$0xff] }
0x2a6e   :  { %v6835_v17 = vpop.f32.mrf.mxu1 }
0x2a6f   :  { %v6836_v24 = vadd.f32 %v6835_v17, %v6765_v12  ;;  %v6661_v53 = vsel %vm251_vm2, %v6660_v2, 0.0  ;;  %v9211_v2 = vld [vmem:[%s11044_s4 + $0x50] sm:$0xff] }
0x2a70   :  { %2479 = vadd.xlane.f32.xlu0 %v2478_v45  ;;  %v8789_v52 = vpop.f32.mrf.mxu1 }
0x2a71   :  { %v10828_v10 = vadd.f32 %v9197_v30, %v6836_v24  ;;  %v9202_v52 = vld [vmem:[%s11041_s24 + $0x8] sm:$0xff]  ;;  %v9203_v30 = vld [vmem:[%s11041_s24] sm:$0xff] }
0x2a73   :  { %v6843_v33 = vand.u32 2147483647, %v10828_v10  ;;  %v6840_v19 = vmax.f32 %v10828_v10, 0.0  ;;  %vm6841_vm10 = vcmp.ne.f32.partialorder %v10828_v10, %v10828_v10 }
0x2a74   :  { %3089 = vadd.xlane.f32.xlu0 %v3088_v9 }
0x2a75   :  { %v6844_v57 = vsub.f32 0.0, %v6843_v33 }
0x2a77   :  { %v6845_v56 = vmul.f32 1.442695, %v6844_v57 }
0x2a78   :  { %3205 = vadd.xlane.f32.xlu0 %v3204_v61  ;;  %v9204_v61 = vld [vmem:[%s11042_s30] ss:$0 sm:$0xff] }
0x2a79   :  { %9119 = vpow2.f32 %v6845_v56 }
0x2a7c   :  { %3878 = vadd.xlane.f32.xlu0 %v3877_v5 }
0x2a80   :  { %4480 = vadd.xlane.f32.xlu0 %v4479_v46 }
0x2a84   :  { %4597 = vadd.xlane.f32.xlu0 %v4596_v42 }
0x2a86   :  { %v9120_v55 = vpop.eup %9119 }
0x2a87   :  { %v6847_v3 = vadd.f32 1.0, %v9120_v55  ;;  %v6850_v12 = vmul.f32 -0.5, %v9120_v55  ;;  %v6853_v15 = vand.u32 2147483647, %v9120_v55 }
0x2a88   :  { %5270 = vadd.xlane.f32.xlu0 %v5269_v50 }
0x2a89   :  { %9121 = vlog2.f32 %v6847_v3  ;;  %v6851_v13 = vadd.f32 1.0, %v6850_v12  ;;  %vm6854_vm9 = vcmp.lt.f32.partialorder %v6853_v15, 0.0004427343  ;;  %v9205_v3 = vld [vmem:[%s11040_s19] sm:$0xf]  ;;  %v9212_v12 = vld [vmem:[%s11044_s4 + $0x48] sm:$0xff] }
0x2a8b   :  { %v6852_v17 = vmul.f32 %v9120_v55, %v6851_v13  ;;  %v9213_v13 = vld [vmem:[%s11044_s4 + $0x40] sm:$0xff] }
0x2a8c   :  { %5872 = vadd.xlane.f32.xlu0 %v5871_v18  ;;  %v9207_v18 = vld [vmem:[%s11044_s4 + $0x70] sm:$0xff] }
0x2a90   :  { %5989 = vadd.xlane.f32.xlu0 %v5988_v11  ;;  %v9210_v11 = vld [vmem:[%s11044_s4 + $0x58] sm:$0xff] }
0x2a94   :  { %6662 = vadd.xlane.f32.xlu0 %v6661_v53 }
0x2a96   :  { %v9122_v0 = vpop.eup %9121 }
0x2a97   :  { %v6849_v16 = vmul.f32 0.6931472, %v9122_v0  ;;  %v9214_v0 = vld [vmem:[%s11044_s4 + $0x38] sm:$0xff] }
0x2a99   :  { %v6855_v21 = vsel %vm6854_vm9, %v6852_v17, %v6849_v16  ;;  %v9215_v17 = vld [vmem:[%s11044_s4 + $0x30] sm:$0xff] }
0x2a9a   :  { %v6856_v24 = vadd.f32 %v6855_v21, %v6840_v19 }
0x2a9c   :  { %v6857_v45 = vsel %vm6841_vm10, %v10828_v10, %v6856_v24  ;;  %v10863_v10 = vpop.xlane.xlu0 %3891  ;;  %v9216_v24 = vld [vmem:[%s11044_s4 + $0x28] sm:$0xff] }
0x2a9d   :  { %8799 = vmatmul.mubr.msk.f32.vlgmr.msra.gmra.mxu1 %vm329_vm3, %v6857_v45  ;;  %vm3895_vm14 = vcmp.eq.f32.partialorder %v10863_v10, inf  ;;  %vm3897_vm5 = vcmp.eq.f32.partialorder %v10863_v10, 0.0 }
0x2a9e   :  { %8802 = vmatpush3.msra.mxu1 %v9200_v49  ;;  %8809 = vmatprep.mubr.msk.f32.mxu1 %vm9290_vm1, %v11050_v51  ;;  %v9217_v49 = vld [vmem:[%s11044_s4 + $0x20] sm:$0xff] }
0x2a9f   :  { %8803 = vmatprep.subr.mxu1 %v11050_v51 }
0x2aa0   :  { %8804 = vmatpush3.msra.mxu1 %v9201_v36  ;;  %v10865_v22 = vpop.xlane.xlu0 %5283 }
0x2aa1   :  { %8805 = vmatprep.subr.mxu1 %v11050_v51  ;;  %vm5287_vm6 = vcmp.eq.f32.partialorder %v10865_v22, inf  ;;  %vm5289_vm7 = vcmp.eq.f32.partialorder %v10865_v22, 0.0 }
0x2aa2   :  { %8806 = vmatpush3.msra.mxu1 %v9202_v52  ;;  %v7162_v52 = vmax.f32 %v10872_v41, 0.0 }
0x2aa3   :  { %8807 = vmatprep.subr.mxu1 %v11050_v51 }
0x2aa4   :  { %8808 = vmatpush3.msra.mxu1 %v9203_v30  ;;  %v9218_v30 = vld [vmem:[%s11044_s4 + $0x18] sm:$0xff] }
0x2aa5   :  { %8812 = vmatprep.subr.mxu1 %v11050_v51 }
0x2af5   :  { %v10867_v59 = vpop.xlane.xlu0 %6675 }
0x2af6   :  { %vm6679_vm8 = vcmp.eq.f32.partialorder %v10867_v59, inf  ;;  %vm6681_vm9 = vcmp.eq.f32.partialorder %v10867_v59, 0.0 }
0x2af9   :  { %v2480_v62 = vpop.xlane.xlu0 %2479 }
0x2afa   :  { %v2481_v33 = vrot.slane %v2480_v62, 4 }
0x2afc   :  { %v2482_v9 = vadd.f32 %v2481_v33, %v2480_v62  ;;  %v9219_v62 = vld [vmem:[%s11044_s4 + $0x10] sm:$0xff] }
0x2afe   :  { %v2483_v34 = vrot.slane %v2482_v9, 2 }
0x2b00   :  { %v2484_v43 = vadd.f32 %v2483_v34, %v2482_v9  ;;  %v9220_v9 = vld [vmem:[%s11044_s4 + $0x8] sm:$0xff]  ;;  %v9221_v34 = vld [vmem:[%s11044_s4] sm:$0xff] }
0x2b02   :  { %v2485_v57 = vrot.slane %v2484_v43, 1 }
0x2b04   :  { %v2486_v26 = vadd.f32 %v2485_v57, %v2484_v43 }
0x2b06   :  { %8862 = vpush %v2486_v26 }
0x2b5d   :  { %v6927_v56 = vpop.f32.mrf.mxu1 }
0x2b5e   :  { %v6928_v54 = vadd.f32 %v9204_v61, %v6927_v56  ;;  %v9222_v61 = vld [vmem:[%s11046_s1] ss:$0 sm:$0xff] }
0x2b5f   :  { %v8800_v1 = vpop.f32.mrf.mxu1 }
0x2b60   :  { %v6934_v4 = vand.u32 2147483647, %v6928_v54  ;;  %v6931_v31 = vmax.f32 %v6928_v54, 0.0  ;;  %vm6932_vm12 = vcmp.ne.f32.partialorder %v6928_v54, %v6928_v54  ;;  %v9223_v1 = vld [vmem:[%s11045_s28] ss:$0 sm:$0xff] }
0x2b62   :  { %v6935_v25 = vsub.f32 0.0, %v6934_v4 }
0x2b64   :  { %v6936_v5 = vmul.f32 1.442695, %v6935_v25 }
0x2b66   :  { %9123 = vpow2.f32 %v6936_v5 }
0x2b73   :  { %v9124_v40 = vpop.eup %9123 }
0x2b74   :  { %v6938_v46 = vadd.f32 1.0, %v9124_v40  ;;  %v6941_v29 = vmul.f32 -0.5, %v9124_v40  ;;  %v6944_v48 = vand.u32 2147483647, %v9124_v40 }
0x2b76   :  { %9125 = vlog2.f32 %v6938_v46  ;;  %v6942_v42 = vadd.f32 1.0, %v6941_v29  ;;  %vm6945_vm11 = vcmp.lt.f32.partialorder %v6944_v48, 0.0004427343 }
0x2b77   :  { %9127 = vpow2.f32 %v7167_v8 }
0x2b78   :  { %v6943_v37 = vmul.f32 %v9124_v40, %v6942_v42  ;;  %v7663_v42 = vld [vmem:[%s11049_s10 + $0x30] sm:$0xff] }
0x2b83   :  { %v9126_v32 = vpop.eup %9125 }
0x2b84   :  { %v6940_v55 = vmul.f32 0.6931472, %v9126_v32  ;;  %v9128_v44 = vpop.eup %9127 }
0x2b85   :  { %v7169_v28 = vadd.f32 1.0, %v9128_v44  ;;  %v7172_v53 = vmul.f32 -0.5, %v9128_v44  ;;  %v7175_v19 = vand.u32 2147483647, %v9128_v44 }
0x2b86   :  { %v6946_v14 = vsel %vm6945_vm11, %v6943_v37, %v6940_v55 }
0x2b87   :  { %v6947_v35 = vadd.f32 %v6946_v14, %v6931_v31  ;;  %9129 = vlog2.f32 %v7169_v28  ;;  %v7173_v16 = vadd.f32 1.0, %v7172_v53 }
0x2b89   :  { %v6948_v50 = vsel %vm6932_vm12, %v6928_v54, %v6947_v35  ;;  %v7174_v45 = vmul.f32 %v9128_v44, %v7173_v16 }
0x2b8a   :  { %8810 = vmatmul.mubr.msk.f32.vlgmr.msra.gmra.mxu1 %vm329_vm3, %v6948_v50 }
0x2b8b   :  { %8813 = vmatpush3.msk.msra.mxu1 %vm255_vm0, %v9205_v3  ;;  %8814 = vmatprep.mubr.msk.f32.mxu1 %vm9290_vm1, %v11050_v51  ;;  %vm7176_vm0 = vcmp.lt.f32.partialorder %v7175_v19, 0.0004427343 }
0x2b8c   :  { %8822 = vmatprep.subr.mxu1 %v11050_v51 }
0x2b8e   :  { %8815 = vmatmul.mubr.msk.f32.vlgmr.msra.gmra.mxu1 %vm251_vm2, %v10769_v7 }
0x2b8f   :  { %8823 = vmatpush3.msra.mxu1 %v9206_v38  ;;  %8854 = vmatprep.mubr.msk.f32.mxu1 %vm9290_vm1, %v11050_v51  ;;  %vm7163_vm1 = vcmp.ne.f32.partialorder %v10872_v41, %v10872_v41 }
0x2b90   :  { %8824 = vmatprep.subr.mxu1 %v11050_v51 }
0x2b91   :  { %8825 = vmatpush3.msra.mxu1 %v9207_v18  ;;  %v9225_v18 = vld [vmem:[%s9304_s5 + $0x8] sm:$0xff] }
0x2b92   :  { %8826 = vmatprep.subr.mxu1 %v11050_v51 }
0x2b93   :  { %8827 = vmatpush3.msra.mxu1 %v9208_v20  ;;  %v11058_v20 = vld [vmem:[#allocation28_spill] sm:$0xff] }
0x2b94   :  { %8828 = vmatprep.subr.mxu1 %v11050_v51  ;;  %v9130_v15 = vpop.eup %9129 }
0x2b95   :  { %8829 = vmatpush3.msra.mxu1 %v9209_v23  ;;  %v7171_v21 = vmul.f32 0.6931472, %v9130_v15  ;;  %v3178_v23 = vsub.f32 %v9225_v18, %v11058_v20 }
0x2b96   :  { %8830 = vmatprep.subr.mxu1 %v11050_v51 }
0x2b97   :  { %8831 = vmatpush3.msra.mxu1 %v9210_v11  ;;  %v7177_v36 = vsel %vm7176_vm0, %v7174_v45, %v7171_v21 }
0x2b98   :  { %8832 = vmatprep.subr.mxu1 %v11050_v51  ;;  %v7178_v33 = vadd.f32 %v7177_v36, %v7162_v52  ;;  %v11059_v36 = vld [vmem:[#allocation29_spill] sm:$0xff] }
0x2b99   :  { %8833 = vmatpush3.msra.mxu1 %v9211_v2 }
0x2b9a   :  { %8834 = vmatprep.subr.mxu1 %v11050_v51  ;;  %v7179_v43 = vsel %vm7163_vm1, %v10872_v41, %v7178_v33 }
0x2b9b   :  { %8835 = vmatpush3.msra.mxu1 %v9212_v12 }
0x2b9c   :  { %8836 = vmatprep.subr.mxu1 %v11050_v51 }
0x2b9d   :  { %8837 = vmatpush3.msra.mxu1 %v9213_v13  ;;  %v2499_v13 = vand.u32 2147483648, %v10807_v58 }
0x2b9e   :  { %8838 = vmatprep.subr.mxu1 %v11050_v51 }
0x2b9f   :  { %8839 = vmatpush3.msra.mxu1 %v9214_v0  ;;  %v3179_v0 = vmul.f32 100.0, %v3178_v23 }
0x2ba0   :  { %8840 = vmatprep.subr.mxu1 %v11050_v51 }
0x2ba1   :  { %8841 = vmatpush3.msra.mxu1 %v9215_v17  ;;  %v3180_v19 = vmul.f32 %v3179_v0, %v3179_v0 }
0x2ba2   :  { %8842 = vmatprep.subr.mxu1 %v11050_v51 }
0x2ba3   :  { %8843 = vmatpush3.msra.mxu1 %v9216_v24  ;;  %v9226_v24 = vld [vmem:[%s9304_s5 + $0x18] sm:$0xff] }
0x2ba4   :  { %8844 = vmatprep.subr.mxu1 %v11050_v51  ;;  %v4570_v45 = vsub.f32 %v9226_v24, %v10371_v27 }
0x2ba5   :  { %8845 = vmatpush3.msra.mxu1 %v9217_v49  ;;  %v3181_v49 = vsel %vm251_vm2, %v3180_v19, 0.0 }
0x2ba6   :  { %8846 = vmatprep.subr.mxu1 %v11050_v51  ;;  %v4571_v33 = vmul.f32 100.0, %v4570_v45 }
0x2ba7   :  { %8847 = vmatpush3.msra.mxu1 %v9218_v30  ;;  %v3898_v30 = vand.u32 2147483648, %v10863_v10 }
0x2ba8   :  { %8848 = vmatprep.subr.mxu1 %v11050_v51 }
0x2ba9   :  { %8849 = vmatpush3.msra.mxu1 %v9219_v62 }
0x2baa   :  { %8850 = vmatprep.subr.mxu1 %v11050_v51 }
0x2bab   :  { %8851 = vmatpush3.msra.mxu1 %v9220_v9 }
0x2bac   :  { %8852 = vmatprep.subr.mxu1 %v11050_v51 }
0x2bad   :  { %8853 = vmatpush3.msra.mxu1 %v9221_v34 }
0x2bae   :  { %8855 = vmatmul.mubr.f32.vlgmr.msra.gmra.mxu1 %v7179_v43  ;;  %v4572_v43 = vmul.f32 %v4571_v33, %v4571_v33 }
0x2c4a   :  { %v7018_v57 = vpop.f32.mrf.mxu1 }
0x2c4b   :  { %v7019_v54 = vadd.f32 %v9222_v61, %v7018_v57  ;;  %v4573_v61 = vsel %vm251_vm2, %v4572_v43, 0.0 }
0x2c4c   :  { %v8811_v26 = vpop.f32.mrf.mxu1 }
0x2c4d   :  { %v7275_v41 = vmul.f32 0.01, %v7019_v54  ;;  %v9227_v26 = vld [vmem:[%s9304_s5 + $0x28] sm:$0xff] }
0x2c4e   :  { %v7088_v56 = vpop.f32.mrf.mxu1 }
0x2c4f   :  { %v7089_v4 = vadd.f32 %v9223_v1, %v7088_v56  ;;  %v7276_v32 = vadd.f32 %v7275_v41, %v10769_v7  ;;  %v5962_v56 = vsub.f32 %v9227_v26, %v10691_v60  ;;  %v6566_v41 = vmul.f32 %v10803_v47, %v10803_v47 }
0x2c50   :  { %v8816_v25 = vpop.f32.mrf.mxu1 }
0x2c51   :  { %v7259_v5 = vsub.f32 %v7019_v54, %v7089_v4  ;;  %v11060_v54 = vld [vmem:[#allocation30_spill] sm:$0xff]  ;;  %v5290_v4 = vand.u32 2147483648, %v10865_v22 }
0x2c6e   :  { %v7246_v51 = vpop.f32.mrf.mxu1 }
0x2c6f   :  { %v7247_v40 = vadd.f32 %v9224_v63, %v7246_v51 }
0x2c70   :  { %v8856_v46 = vpop.f32.mrf.mxu1 }
0x2c71   :  { %v7662_v39 = vmul.f32 -1.442695, %v7247_v40 }
0x2c73   :  { %9131 = vpow2.f32 %v7662_v39  ;;  %v9228_v39 = vld [vmem:[%s9304_s5 + $0x38] sm:$0xff]  ;;  %s8863_s5 = spop %8862 }
0x2c74   :  { %s2488_s24 = smul.f32 -0.5, %s8863_s5 }
0x2c76   :  { %s7569_s1 = sadd.f32 117.95941, %s2488_s24 }
0x2c80   :  { %v9132_v8 = vpop.eup %9131 }
0x2c81   :  { %v7253_v29 = vadd.f32 1.0, %v9132_v8 }
0x2c83   :  { %9133 = vrcp.f32 %v7253_v29 }
0x2c90   :  { %v9134_v48 = vpop.eup %9133 }
0x2c91   :  { %v7279_v55 = vmul.f32 %v9134_v48, %v7663_v42  ;;  %v7256_v37 = vand.u32 2147483647, %v9134_v48  ;;  %v6682_v42 = vand.u32 2147483648, %v10867_v59 }
0x2c93   :  { %v7280_v31 = vadd.f32 %v7279_v55, %v7276_v32  ;;  %vm7257_vm3 = vcmp.gt.f32.partialorder %v7256_v37, 1e-07 }
0x2c94   :  { %v7258_v14 = vsel %vm7257_vm3, %v9134_v48, 1e-07  ;;  %v6567_v48 = vsel %vm251_vm2, %v6566_v41, 0.0 }
0x2c95   :  { %8860 = vmatmul.mubr.msk.f32.vlgmr.msra.gmra.mxu0 %vm251_vm2, %v7280_v31  ;;  %9135 = vrcp.f32 %v7258_v14  ;;  %v11061_v14 = vld [vmem:[#allocation24_spill] sm:$0xff] }
0x2c96   :  { %9137 = vrsqrt.f32 %v10807_v58 }
0x2c97   :  { %9139 = vrsqrt.f32 %v10863_v10 }
0x2c98   :  { %9141 = vrsqrt.f32 %v10865_v22 }
0x2c99   :  { %9143 = vrsqrt.f32 %v10867_v59 }
0x2ca2   :  { %v9136_v35 = vpop.eup %9135 }
0x2ca3   :  { %v7261_v50 = vmul.f32 %v9136_v35, %v7259_v5  ;;  %v9138_v7 = vpop.eup %9137  ;;  %v5963_v5 = vmul.f32 100.0, %v5962_v56  ;;  %v11062_v35 = vld [vmem:[#allocation25_spill] sm:$0xff] }
0x2ca4   :  { %v2495_v28 = vmul.f32 %v9138_v7, %v10807_v58  ;;  %v3090_v7 = vpop.xlane.xlu0 %3089 }
0x2ca5   :  { %v7262_v44 = vmul.f32 %v7261_v50, %v7261_v50  ;;  %v5964_v40 = vmul.f32 %v5963_v5, %v5963_v5  ;;  %v11063_v50 = vsub.f32 %v11061_v14, %v11062_v35 }
0x2ca6   :  { %v2497_v53 = vsel %vm2496_vm13, %v10807_v58, %v2495_v28  ;;  %v3782_v58 = vmul.f32 %v11059_v36, %v11059_v36 }
0x2ca7   :  { %v7263_v3 = vsel %vm251_vm2, %v7262_v44, 0.0  ;;  %v2500_v16 = vsel %vm2498_vm4, %v2499_v13, %v2497_v53  ;;  %v5965_v29 = vsel %vm251_vm2, %v5964_v40, 0.0  ;;  %v7417_v44 = vmul.f32 0.5, %v11063_v50 }
0x2ca8   :  { %7264 = vadd.xlane.f32.xlu0 %v7263_v3  ;;  %v2502_v17 = vsel %vm2501_vm15, %v2500_v16, 0.0  ;;  %v3783_v62 = vsel %vm251_vm2, %v3782_v58, 0.0  ;;  %v3206_v28 = vpop.xlane.xlu0 %3205 }
0x2ca9   :  { %v7418_v3 = vsel %vm251_vm2, %v7417_v44, 0.0  ;;  %v3207_v23 = vrot.slane %v3206_v28, 4 }
0x2cab   :  { %v3208_v53 = vadd.f32 %v3207_v23, %v3206_v28 }
0x2d55   :  { %v7350_v38 = vpop.f32.mrf.mxu0 }
0x2d56   :  { %v10933_v11 = vadd.f32 %v10814_v6, %v7350_v38  ;;  %v9140_v6 = vpop.eup %9139  ;;  %v3091_v38 = vrot.slane %v3090_v7, 4 }
0x2d57   :  { %v8861_v2 = vpop.f32.mrf.mxu0  ;;  %v3894_v21 = vmul.f32 %v9140_v6, %v10863_v10  ;;  %v9142_v9 = vpop.eup %9141  ;;  %v3209_v6 = vrot.slane %v3208_v53, 2 }
0x2d58   :  { %v7369_v12 = vmul.f32 %v10933_v11, %v10933_v11  ;;  %v5286_v57 = vmul.f32 %v9142_v9, %v10865_v22  ;;  %v9144_v51 = vpop.eup %9143  ;;  %v7354_v8 = vsub.f32 %v9228_v39, %v10933_v11  ;;  %v3092_v20 = vadd.f32 %v3091_v38, %v3090_v7 }
0x2d59   :  { %v3896_v52 = vsel %vm3895_vm14, %v10863_v10, %v3894_v21  ;;  %v5174_v10 = vmul.f32 %v11060_v54, %v11060_v54  ;;  %v6678_v46 = vmul.f32 %v9144_v51, %v10867_v59 }
0x2d5a   :  { %v7370_v15 = vsel %vm251_vm2, %v7369_v12, 0.0  ;;  %v3899_v27 = vsel %vm3897_vm5, %v3898_v30, %v3896_v52  ;;  %v5288_v1 = vsel %vm5287_vm6, %v10865_v22, %v5286_v57  ;;  %v7355_v32 = vmul.f32 100.0, %v7354_v8 }
0x2d5b   :  { %7371 = vadd.xlane.f32.xlu1 %v7370_v15  ;;  %v3900_v34 = vsel %vm2501_vm15, %v3899_v27, 0.0  ;;  %v5175_v25 = vsel %vm251_vm2, %v5174_v10, 0.0  ;;  %v5291_v60 = vsel %vm5289_vm7, %v5290_v4, %v5288_v1  ;;  %v6680_v22 = vsel %vm6679_vm8, %v10867_v59, %v6678_v46  ;;  %v3879_v59 = vpop.xlane.xlu0 %3878 }
0x2d5c   :  { %v5292_v63 = vsel %vm2501_vm15, %v5291_v60, 0.0  ;;  %v6683_v55 = vsel %vm6681_vm9, %v6682_v42, %v6680_v22  ;;  %v7356_v31 = vmul.f32 %v7355_v32, %v7355_v32  ;;  %v3093_v2 = vrot.slane %v3092_v20, 2 }
0x2d5d   :  { %v6684_v37 = vsel %vm2501_vm15, %v6683_v55, 0.0  ;;  %v3880_v13 = vrot.slane %v3879_v59, 4 }
0x2d5e   :  { %v7357_v47 = vsel %vm251_vm2, %v7356_v31, 0.0  ;;  %v3094_v16 = vadd.f32 %v3093_v2, %v3092_v20 }
0x2d5f   :  { %2503 = vadd.xlane.f32.xlu1 %v2502_v17  ;;  %v4481_v18 = vpop.xlane.xlu0 %4480  ;;  %v3881_v17 = vadd.f32 %v3880_v13, %v3879_v59 }
0x2d60   :  { %v4482_v24 = vrot.slane %v4481_v18, 4  ;;  %v3095_v58 = vrot.slane %v3094_v16, 1 }
0x2d61   :  { %v3882_v52 = vrot.slane %v3881_v17, 2 }
0x2d62   :  { %v4483_v9 = vadd.f32 %v4482_v24, %v4481_v18 }
0x2d63   :  { %3182 = vadd.xlane.f32.xlu1 %v3181_v49  ;;  %v4598_v12 = vpop.xlane.xlu0 %4597 }
0x2d64   :  { %v4599_v30 = vrot.slane %v4598_v12, 4  ;;  %v4484_v40 = vrot.slane %v4483_v9, 2 }
0x2d66   :  { %v4600_v10 = vadd.f32 %v4599_v30, %v4598_v12  ;;  %v4485_v7 = vadd.f32 %v4484_v40, %v4483_v9 }
0x2d67   :  { %3784 = vadd.xlane.f32.xlu1 %v3783_v62  ;;  %v5271_v19 = vpop.xlane.xlu0 %5270  ;;  %v3210_v62 = vadd.f32 %v3209_v6, %v3208_v53 }
0x2d68   :  { %v5272_v1 = vrot.slane %v5271_v19, 4  ;;  %v4601_v42 = vrot.slane %v4600_v10, 2 }
0x2d69   :  { %v3211_v4 = vrot.slane %v3210_v62, 1 }
0x2d6a   :  { %v4602_v18 = vadd.f32 %v4601_v42, %v4600_v10 }
0x2d6b   :  { %3901 = vadd.xlane.f32.xlu1 %v3900_v34  ;;  %v5873_v43 = vpop.xlane.xlu0 %5872  ;;  %v3212_v44 = vadd.f32 %v3211_v4, %v3210_v62 }
0x2d6c   :  { %v5874_v35 = vrot.slane %v5873_v43, 4 }
0x2d6e   :  { %v5875_v12 = vadd.f32 %v5874_v35, %v5873_v43 }
0x2d6f   :  { %4574 = vadd.xlane.f32.xlu1 %v4573_v61  ;;  %v3096_v61 = vadd.f32 %v3095_v58, %v3094_v16  ;;  %v5990_v55 = vpop.xlane.xlu0 %5989 }
0x2d70   :  { %v5991_v53 = vrot.slane %v5990_v55, 4  ;;  %v5876_v58 = vrot.slane %v5875_v12, 2 }
0x2d73   :  { %5176 = vadd.xlane.f32.xlu1 %v5175_v25  ;;  %v3883_v25 = vadd.f32 %v3882_v52, %v3881_v17  ;;  %v6663_v16 = vpop.xlane.xlu0 %6662  ;;  %v5992_v52 = vadd.f32 %v5991_v53, %v5990_v55 }
0x2d74   :  { %v6664_v30 = vrot.slane %v6663_v16, 4 }
0x2d75   :  { %v5993_v10 = vrot.slane %v5992_v52, 2 }
0x2d77   :  { %5293 = vadd.xlane.f32.xlu1 %v5292_v63 }
0x2d7b   :  { %5966 = vadd.xlane.f32.xlu1 %v5965_v29 }
0x2d7f   :  { %6568 = vadd.xlane.f32.xlu1 %v6567_v48  ;;  %v5273_v48 = vadd.f32 %v5272_v1, %v5271_v19  ;;  %v6665_v1 = vadd.f32 %v6664_v30, %v6663_v16 }
0x2d81   :  { %v5274_v20 = vrot.slane %v5273_v48, 2 }
0x2d83   :  { %6685 = vadd.xlane.f32.xlu1 %v6684_v37 }
0x2d87   :  { %7358 = vadd.xlane.f32.xlu1 %v7357_v47 }
0x2d8b   :  { %7419 = vadd.xlane.f32.xlu1 %v7418_v3  ;;  %v3884_v3 = vrot.slane %v3883_v25, 1 }
0x2de4   :  { %v7372_v11 = vpop.xlane.xlu1 %7371 }
0x2de5   :  { %9145 = vrsqrt.f32 %v7372_v11  ;;  %vm7375_vm2 = vcmp.eq.f32.partialorder %v7372_v11, inf  ;;  %vm7377_vm10 = vcmp.eq.f32.partialorder %v7372_v11, 0.0  ;;  %v7378_v39 = vand.u32 2147483648, %v7372_v11 }
0x2de8   :  { %v2504_v15 = vpop.xlane.xlu1 %2503 }
0x2de9   :  { %v2505_v0 = vrot.slane %v2504_v15, 4 }
0x2deb   :  { %v2506_v21 = vadd.f32 %v2505_v0, %v2504_v15  ;;  %v3885_v15 = vadd.f32 %v3884_v3, %v3883_v25  ;;  %v4486_v0 = vrot.slane %v4485_v7, 1 }
0x2dec   :  { %v3183_v45 = vpop.xlane.xlu1 %3182 }
0x2ded   :  { %v2507_v49 = vrot.slane %v2506_v21, 2  ;;  %v3184_v36 = vrot.slane %v3183_v45, 4 }
0x2def   :  { %v3185_v33 = vadd.f32 %v3184_v36, %v3183_v45  ;;  %v2508_v27 = vadd.f32 %v2507_v49, %v2506_v21  ;;  %v4603_v21 = vrot.slane %v4602_v18, 1  ;;  %v5275_v36 = vadd.f32 %v5274_v20, %v5273_v48 }
0x2df0   :  { %v3785_v34 = vpop.xlane.xlu1 %3784  ;;  %v5994_v48 = vadd.f32 %v5993_v10, %v5992_v52 }
0x2df1   :  { %v3186_v57 = vrot.slane %v3185_v33, 2  ;;  %v3786_v26 = vrot.slane %v3785_v34, 4  ;;  %v2509_v56 = vrot.slane %v2508_v27, 1 }
0x2df2   :  { %v9146_v54 = vpop.eup %9145  ;;  %v5995_v3 = vrot.slane %v5994_v48, 1 }
0x2df3   :  { %v3787_v5 = vadd.f32 %v3786_v26, %v3785_v34  ;;  %v2510_v60 = vadd.f32 %v2509_v56, %v2508_v27  ;;  %v7374_v51 = vmul.f32 %v9146_v54, %v7372_v11  ;;  %v3187_v63 = vadd.f32 %v3186_v57, %v3185_v33  ;;  %v7265_v27 = vpop.xlane.xlu0 %7264 }
0x2df4   :  { %v3902_v46 = vpop.xlane.xlu1 %3901  ;;  %v4487_v33 = vadd.f32 %v4486_v0, %v4485_v7  ;;  %v4604_v57 = vadd.f32 %v4603_v21, %v4602_v18  ;;  %v5276_v54 = vrot.slane %v5275_v36, 1  ;;  %v7266_v4 = vrot.slane %v7265_v27, 4 }
0x2df5   :  { %v3788_v8 = vrot.slane %v3787_v5, 2  ;;  %v3903_v29 = vrot.slane %v3902_v46, 4  ;;  %8864 = vpush %v2510_v60  ;;  %v7376_v41 = vsel %vm7375_vm2, %v7372_v11, %v7374_v51  ;;  %v3188_v22 = vrot.slane %v3187_v63, 1 }
0x2df6   :  { %8866 = vpush %v3096_v61  ;;  %v7379_v32 = vsel %vm7377_vm10, %v7378_v39, %v7376_v41  ;;  %v5277_v39 = vadd.f32 %v5276_v54, %v5275_v36  ;;  %v7267_v41 = vadd.f32 %v7266_v4, %v7265_v27 }
0x2df7   :  { %v3904_v37 = vadd.f32 %v3903_v29, %v3902_v46  ;;  %v7380_v31 = vsel %vm2501_vm15, %v7379_v32, 0.0  ;;  %v3189_v47 = vadd.f32 %v3188_v22, %v3187_v63  ;;  %v3789_v14 = vadd.f32 %v3788_v8, %v3787_v5 }
0x2df8   :  { %7381 = vadd.xlane.f32.xlu0 %v7380_v31  ;;  %v4575_v50 = vpop.xlane.xlu1 %4574  ;;  %v5877_v5 = vadd.f32 %v5876_v58, %v5875_v12  ;;  %v6666_v29 = vrot.slane %v6665_v1, 2  ;;  %v7268_v35 = vrot.slane %v7267_v41, 2 }
0x2df9   :  { %v3905_v28 = vrot.slane %v3904_v37, 2  ;;  %v4576_v59 = vrot.slane %v4575_v50, 4  ;;  %8868 = vpush %v3189_v47  ;;  %v3790_v38 = vrot.slane %v3789_v14, 1 }
0x2dfa   :  { %8870 = vpush %v3212_v44  ;;  %v5878_v42 = vrot.slane %v5877_v5, 1  ;;  %v6667_v7 = vadd.f32 %v6666_v29, %v6665_v1  ;;  %v7269_v53 = vadd.f32 %v7268_v35, %v7267_v41 }
0x2dfb   :  { %v4577_v23 = vadd.f32 %v4576_v59, %v4575_v50  ;;  %v3791_v11 = vadd.f32 %v3790_v38, %v3789_v14  ;;  %v3906_v2 = vadd.f32 %v3905_v28, %v3904_v37 }
0x2dfc   :  { %v5177_v13 = vpop.xlane.xlu1 %5176  ;;  %v5879_v44 = vadd.f32 %v5878_v42, %v5877_v5  ;;  %v6668_v12 = vrot.slane %v6667_v7, 1  ;;  %v7270_v21 = vrot.slane %v7269_v53, 1 }
0x2dfd   :  { %v4578_v6 = vrot.slane %v4577_v23, 2  ;;  %v5178_v17 = vrot.slane %v5177_v13, 4  ;;  %8872 = vpush %v3791_v11  ;;  %v3907_v19 = vrot.slane %v3906_v2, 1 }
0x2dfe   :  { %8874 = vpush %v3885_v15  ;;  %v7271_v58 = vadd.f32 %v7270_v21, %v7269_v53 }
0x2dff   :  { %v5179_v24 = vadd.f32 %v5178_v17, %v5177_v13  ;;  %v3908_v45 = vadd.f32 %v3907_v19, %v3906_v2  ;;  %v4579_v49 = vadd.f32 %v4578_v6, %v4577_v23  ;;  %v5996_v2 = vadd.f32 %v5995_v3, %v5994_v48 }
0x2e00   :  { %v5294_v62 = vpop.xlane.xlu1 %5293  ;;  %v6669_v19 = vadd.f32 %v6668_v12, %v6667_v7 }
0x2e01   :  { %v5180_v9 = vrot.slane %v5179_v24, 2  ;;  %v5295_v34 = vrot.slane %v5294_v62, 4  ;;  %8876 = vpush %v3908_v45  ;;  %v4580_v43 = vrot.slane %v4579_v49, 1 }
0x2e02   :  { %8878 = vpush %v4487_v33 }
0x2e03   :  { %v5296_v26 = vadd.f32 %v5295_v34, %v5294_v62  ;;  %v4581_v56 = vadd.f32 %v4580_v43, %v4579_v49  ;;  %v5181_v61 = vadd.f32 %v5180_v9, %v5179_v24 }
0x2e04   :  { %v5967_v25 = vpop.xlane.xlu1 %5966 }
0x2e05   :  { %v5297_v60 = vrot.slane %v5296_v26, 2  ;;  %v5968_v51 = vrot.slane %v5967_v25, 4  ;;  %8880 = vpush %v4581_v56  ;;  %v5182_v63 = vrot.slane %v5181_v61, 1 }
0x2e06   :  { %8882 = vpush %v4604_v57 }
0x2e07   :  { %v5969_v40 = vadd.f32 %v5968_v51, %v5967_v25  ;;  %v5183_v46 = vadd.f32 %v5182_v63, %v5181_v61  ;;  %v5298_v8 = vadd.f32 %v5297_v60, %v5296_v26 }
0x2e08   :  { %v6569_v22 = vpop.xlane.xlu1 %6568 }
0x2e09   :  { %v5970_v32 = vrot.slane %v5969_v40, 2  ;;  %v6570_v55 = vrot.slane %v6569_v22, 4  ;;  %8884 = vpush %v5183_v46  ;;  %v5299_v37 = vrot.slane %v5298_v8, 1 }
0x2e0a   :  { %8886 = vpush %v5277_v39 }
0x2e0b   :  { %v6571_v31 = vadd.f32 %v6570_v55, %v6569_v22  ;;  %v5300_v47 = vadd.f32 %v5299_v37, %v5298_v8  ;;  %v5971_v14 = vadd.f32 %v5970_v32, %v5969_v40 }
0x2e0c   :  { %v6686_v50 = vpop.xlane.xlu1 %6685 }
0x2e0d   :  { %v6572_v28 = vrot.slane %v6571_v31, 2  ;;  %v6687_v59 = vrot.slane %v6686_v50, 4  ;;  %8888 = vpush %v5300_v47  ;;  %v5972_v38 = vrot.slane %v5971_v14, 1 }
0x2e0e   :  { %8890 = vpush %v5879_v44 }
0x2e0f   :  { %v6688_v18 = vadd.f32 %v6687_v59, %v6686_v50  ;;  %v5973_v20 = vadd.f32 %v5972_v38, %v5971_v14  ;;  %v6573_v23 = vadd.f32 %v6572_v28, %v6571_v31 }
0x2e10   :  { %v7359_v11 = vpop.xlane.xlu1 %7358 }
0x2e11   :  { %v6689_v13 = vrot.slane %v6688_v18, 2  ;;  %v7360_v15 = vrot.slane %v7359_v11, 4  ;;  %8892 = vpush %v5973_v20  ;;  %v6574_v0 = vrot.slane %v6573_v23, 1 }
0x2e12   :  { %8894 = vpush %v5996_v2 }
0x2e13   :  { %v7361_v16 = vadd.f32 %v7360_v15, %v7359_v11  ;;  %v6575_v6 = vadd.f32 %v6574_v0, %v6573_v23  ;;  %v6690_v17 = vadd.f32 %v6689_v13, %v6688_v18 }
0x2e14   :  { %v7420_v62 = vpop.xlane.xlu1 %7419 }
0x2e15   :  { %v7362_v24 = vrot.slane %v7361_v16, 2  ;;  %8896 = vpush %v6575_v6  ;;  %v6691_v45 = vrot.slane %v6690_v17, 1  ;;  %v7421_v33 = vrot.slane %v7420_v62, 4 }
0x2e16   :  { %8898 = vpush %v6669_v19 }
0x2e17   :  { %v6692_v49 = vadd.f32 %v6691_v45, %v6690_v17  ;;  %v7363_v36 = vadd.f32 %v7362_v24, %v7361_v16  ;;  %v7422_v27 = vadd.f32 %v7421_v33, %v7420_v62 }
0x2e19   :  { %8900 = vpush %v6692_v49  ;;  %v7364_v52 = vrot.slane %v7363_v36, 1  ;;  %v7423_v9 = vrot.slane %v7422_v27, 2 }
0x2e1a   :  { %8902 = vpush %v7271_v58 }
0x2e1b   :  { %v7365_v30 = vadd.f32 %v7364_v52, %v7363_v36  ;;  %v7424_v26 = vadd.f32 %v7423_v9, %v7422_v27 }
0x2e1d   :  { %8904 = vpush %v7365_v30  ;;  %v7425_v54 = vrot.slane %v7424_v26, 1 }
0x2e1f   :  { %v7426_v4 = vadd.f32 %v7425_v54, %v7424_v26 }
0x2e26   :  { %s8865_s13 = spop %8864 }
0x2e27   :  { %s8867_s8 = spop %8866 }
0x2e28   :  { %s3098_s16 = smul.f32 0.005, %s8867_s8 }
0x2e2a   :  { %s8869_s12 = spop %8868 }
0x2e2b   :  { %s8871_s11 = spop %8870  ;;  %s3191_s29 = smul.f32 -0.5, %s8869_s12 }
0x2e2c   :  { %s3215_s15 = sadd.f32 %s8871_s11, %s8865_s13 }
0x2e2d   :  { %s7582_s27 = sadd.f32 117.95941, %s3191_s29 }
0x2e2e   :  { %s8873_s18 = spop %8872 }
0x2e2f   :  { %s3793_s22 = smul.f32 0.005, %s8873_s18  ;;  %s8875_s26 = spop %8874 }
0x2e30   :  { %s3887_s2 = smul.f32 -0.5, %s8875_s26  ;;  %s3214_s13 = sadd.f32 %s7582_s27, %s7569_s1 }
0x2e31   :  { %s3794_s23 = sadd.f32 %s3793_s22, %s3098_s16 }
0x2e32   :  { %s8877_s0 = spop %8876  ;;  %s7596_s22 = sadd.f32 117.95941, %s3887_s2 }
0x2e33   :  { %s8879_s17 = spop %8878  ;;  %s3911_s21 = sadd.f32 %s8877_s0, %s3215_s15 }
0x2e34   :  { %s4489_s25 = smul.f32 0.005, %s8879_s17  ;;  %s3910_s29 = sadd.f32 %s7596_s22, %s3214_s13 }
0x2e36   :  { %s4490_s3 = sadd.f32 %s4489_s25, %s3794_s23  ;;  %s8881_s14 = spop %8880 }
0x2e37   :  { %s8883_s19 = spop %8882  ;;  %s4583_s11 = smul.f32 -0.5, %s8881_s14 }
0x2e38   :  { %s4607_s30 = sadd.f32 %s8883_s19, %s3911_s21 }
0x2e39   :  { %s7610_s17 = sadd.f32 117.95941, %s4583_s11 }
0x2e3a   :  { %s8885_s4 = spop %8884 }
0x2e3b   :  { %s5185_s28 = smul.f32 0.005, %s8885_s4  ;;  %s8887_s10 = spop %8886 }
0x2e3c   :  { %s5279_s12 = smul.f32 -0.5, %s8887_s10  ;;  %s4606_s26 = sadd.f32 %s7610_s17, %s3910_s29 }
0x2e3d   :  { %s5186_s7 = sadd.f32 %s5185_s28, %s4490_s3 }
0x2e3e   :  { %s8889_s8 = spop %8888  ;;  %s7624_s19 = sadd.f32 117.95941, %s5279_s12 }
0x2e3f   :  { %s8891_s16 = spop %8890  ;;  %s5303_s18 = sadd.f32 %s8889_s8, %s4607_s30 }
0x2e40   :  { %s5881_s15 = smul.f32 0.005, %s8891_s16  ;;  %s5302_s1 = sadd.f32 %s7624_s19, %s4606_s26 }
0x2e41   :  { %s9295_s26 = smov [#allocation6]  }
0x2e42   :  { %s5882_s23 = sadd.f32 %s5881_s15, %s5186_s7  ;;  %s8893_s0 = spop %8892 }
0x2e43   :  { %s8895_s5 = spop %8894  ;;  %s5975_s21 = smul.f32 -0.5, %s8893_s0 }
0x2e44   :  { %s5999_s25 = sadd.f32 %s8895_s5, %s5303_s18 }
0x2e45   :  { %s7638_s4 = sadd.f32 117.95941, %s5975_s21 }
0x2e46   :  { %s8897_s24 = spop %8896 }
0x2e47   :  { %s6577_s3 = smul.f32 0.005, %s8897_s24  ;;  %s8899_s27 = spop %8898 }
0x2e48   :  { %s6671_s14 = smul.f32 -0.5, %s8899_s27  ;;  %s5998_s11 = sadd.f32 %s7638_s4, %s5302_s1 }
0x2e49   :  { %s6578_s28 = sadd.f32 %s6577_s3, %s5882_s23  ;;  %s9293_s23 = smov [#allocation2]  }
0x2e4a   :  { %s8901_s30 = spop %8900  ;;  %s7652_s2 = sadd.f32 117.95941, %s6671_s14 }
0x2e4b   :  { %s8903_s10 = spop %8902  ;;  %s10987_s7 = sadd.f32 %s8901_s30, %s5999_s25 }
0x2e4c   :  { %s7273_s8 = smul.f32 0.005, %s8903_s10  ;;  %s6694_s15 = sadd.f32 %s7652_s2, %s5998_s11 }
0x2e4d   :  { %s9294_s24 = smov [#allocation4]  }
0x2e4e   :  { %s10989_s16 = sadd.f32 %s7273_s8, %s6578_s28  ;;  %s8905_s13 = spop %8904 }
0x2e4f   :  { %s7367_s18 = smul.f32 -0.5, %s8905_s13 }
0x2e50   :  { %s7431_s17 = smul.f32 35.0, %s10989_s16 }
0x2e51   :  { %s7666_s22 = sadd.f32 117.95941, %s7367_s18 }
0x2e53   :  { %s7390_s12 = sadd.f32 %s7666_s22, %s6694_s15 }
0x2e55   :  { %s7428_s0 = smul.f32 0.125, %s7390_s12 }
0x2e57   :  { %7430 = sst [smem:[#allocation2]] %s7428_s0 }
0x2e58   :  { %7446 = dma.smem_to_hbm %s9293_s23, 16, %s9454_s6, [#allocation3]  }
0x2e81   :  { %v7382_v34 = vpop.xlane.xlu0 %7381 }
0x2e82   :  { %v7383_v43 = vrot.slane %v7382_v34, 4 }
0x2e84   :  { %v7384_v57 = vadd.f32 %v7383_v43, %v7382_v34 }
0x2e86   :  { %v7385_v56 = vrot.slane %v7384_v57, 2 }
0x2e88   :  { %v7386_v61 = vadd.f32 %v7385_v56, %v7384_v57 }
0x2e8a   :  { %v7387_v10 = vrot.slane %v7386_v61, 1 }
0x2e8c   :  { %v7388_v1 = vadd.f32 %v7387_v10, %v7386_v61 }
0x2e8e   :  { %8906 = vpush %v7388_v1 }
0x2e8f   :  { %8908 = vpush %v7426_v4 }
0x2ebf   :  { %s8907_s6 = spop %8906 }
0x2ec0   :  { %s7391_s5 = sadd.f32 %s8907_s6, %s10987_s7  ;;  %s8909_s21 = spop %8908 }
0x2ec1   :  { %s7432_s25 = sadd.f32 %s8909_s21, %s7431_s17 }
0x2ec2   :  { %s7436_s29 = smul.f32 0.125, %s7391_s5 }
0x2ec3   :  { %s7433_s19 = smul.f32 0.125, %s7432_s25 }
0x2ec4   :  { %7438 = sst [smem:[#allocation6]] %s7436_s29 }
0x2ec5   :  { %7435 = sst [smem:[#allocation4]] %s7433_s19 }
0x2ec6   :  { %7454 = dma.smem_to_hbm %s9294_s24, 16, %s9459_s20, [#allocation5]  }
0x2ec7   :  { %7462 = dma.smem_to_hbm %s9295_s26, 16, %s9464_s9, [#allocation5]  }
0x2ec8   :  { %9253 = dma.done.wait [#allocation3], 16  }
0x2ec9   :  { %9254 = vsyncadd [#allocation3], 4294967280 }
0x2eca   :  { %9255 = dma.done.wait [#allocation5], 32  }
0x2ecb   :  { %9256 = vsyncadd [#allocation5], 4294967264 }
0x2ecc   :  { %7472 = sfence }
0x2ecd   :  { %7473 = vsyncpa [#allocation3], 1 }
0x2ece   :  { %7474 = vsyncpa [#allocation5], 1 }

</bundles_post_ra>
